<compile_context>
chip_gen: v5e
topology: v5e:2x2
jax: 0.10.0
libtpu: 0.0.40
codegen_flags: <defaults>
</compile_context>

<pallas_src>
import functools

import jax
import jax.numpy as jnp
from jax.experimental import pallas as pl
from jax.experimental.pallas import tpu as pltpu

OMEGA = 30.0              # SIREN sine frequency: sin(30 * x)
IN_FEATURES = 3
PADDED_IN = 8             # coords padded 3 -> 8 (aligned K for the first matmul)
OUT_FEATURES = 1
HIDDEN = 128              # lane-aligned stand-in for the 256-wide SIREN
NUM_HIDDEN_LAYERS = 3     # hidden->hidden sine layers after the first layer
DEFAULT_TILE_M = 1024     # row tile; sweepable 512/1024/2048 (VMEM is a non-issue)

# ----------------------------- bounded-range sine -----------------------------
_INV_TWO_PI = 0.15915494309189535
_TWO_PI_HI = 6.28125                     # exactly representable in fp32
_TWO_PI_LO = 1.9353071795864769e-03      # 2*pi - _TWO_PI_HI
_PI = 3.141592653589793
_HALF_PI = 1.5707963267948966


def _sin_bounded(z):
    """sin(z) for moderate |z| (SIREN pre-activations are |z| <~ 35).

    Single Cody-Waite reduction to [-pi, pi], fold to [-pi/2, pi/2], then a
    degree-11 odd polynomial.  Error vs. libm sin is ~1e-7, well inside the
    test tolerance, at a fraction of the generic jnp.sin VPU cost.
    """
    k = jnp.floor(z * _INV_TWO_PI + 0.5)           # round(z / 2pi)
    r = z - k * _TWO_PI_HI
    r = r - k * _TWO_PI_LO                         # r in [-pi, pi]
    r = jnp.where(r > _HALF_PI, _PI - r, r)        # fold to [-pi/2, pi/2]
    r = jnp.where(r < -_HALF_PI, -_PI - r, r)
    x2 = r * r
    p = jnp.float32(-2.5052108e-08)
    p = p * x2 + jnp.float32(2.7557319e-06)
    p = p * x2 + jnp.float32(-1.9841270e-04)
    p = p * x2 + jnp.float32(8.3333333e-03)
    p = p * x2 + jnp.float32(-1.6666667e-01)
    return r + r * (x2 * p)


# ----------------------------------- kernel -----------------------------------
def _siren_mlp_kernel(x_ref,
                      w0_ref, b0_ref,
                      w1_ref, b1_ref,
                      w2_ref, b2_ref,
                      w3_ref, b3_ref,
                      w4_ref, b4_ref,
                      out_ref):
    """One row-tile of the SIREN MLP: 4 sine layers (omega pre-folded) + linear."""
    h = _sin_bounded(jnp.dot(x_ref[...], w0_ref[...],
                             preferred_element_type=jnp.float32) + b0_ref[...])
    h = _sin_bounded(jnp.dot(h, w1_ref[...],
                             preferred_element_type=jnp.float32) + b1_ref[...])
    h = _sin_bounded(jnp.dot(h, w2_ref[...],
                             preferred_element_type=jnp.float32) + b2_ref[...])
    h = _sin_bounded(jnp.dot(h, w3_ref[...],
                             preferred_element_type=jnp.float32) + b3_ref[...])
    out_ref[...] = (jnp.dot(h, w4_ref[...],
                            preferred_element_type=jnp.float32) + b4_ref[...])


# ----------------------------------- wrapper ----------------------------------
def _round_up(x, m):
    return (x + m - 1) // m * m


def _const_spec(shape):
    # Whole-array block, constant block index -> weights stay VMEM-resident
    # across the grid (no re-DMA).
    return pl.BlockSpec(shape, lambda i: (0,) * len(shape))


def prepare_params(params):
    """One-time param prep: fold omega=30 into sine layers, pad w0's K dim 3->8.

    sin(30*(x@W + b)) == sin(x@(30W) + 30b), so the in-kernel scale disappears.
    Call once outside the hot path (amortized over all forward calls).
    """
    (w0, b0, w1, b1, w2, b2, w3, b3, w4, b4) = params
    w0p = jnp.pad(w0 * OMEGA, ((0, PADDED_IN - IN_FEATURES), (0, 0)))
    return (w0p, b0 * OMEGA,
            w1 * OMEGA, b1 * OMEGA,
            w2 * OMEGA, b2 * OMEGA,
            w3 * OMEGA, b3 * OMEGA,
            w4, b4)


@functools.partial(jax.jit, static_argnames=("tile_m",))
def sdf_decoder_forward(coords, prepared_params, tile_m=DEFAULT_TILE_M):
    """coords: (B, N, 3) float32 -> model_out: (B, N, 1) float32."""
    B, N, F = coords.shape
    assert F == IN_FEATURES
    M = B * N
    # Row tile: as large as requested, but never larger than the (8-aligned)
    # row count.  Rows are padded up to a tile multiple and sliced off at the end.
    tm = min(tile_m, _round_up(M, 8))
    m_pad = _round_up(M, tm)

    x = coords.reshape(M, F).astype(jnp.float32)
    x = jnp.pad(x, ((0, m_pad - M), (0, PADDED_IN - F)))

    (w0, b0, w1, b1, w2, b2, w3, b3, w4, b4) = prepared_params

    out = pl.pallas_call(
        _siren_mlp_kernel,
        out_shape=jax.ShapeDtypeStruct((m_pad, OUT_FEATURES), jnp.float32),
        grid_spec=pltpu.PrefetchScalarGridSpec(
            num_scalar_prefetch=0,
            grid=(m_pad // tm,),
            in_specs=[
                pl.BlockSpec((tm, PADDED_IN), lambda i: (i, 0)),  # coords tile
                _const_spec(w0.shape), _const_spec(b0.shape),
                _const_spec(w1.shape), _const_spec(b1.shape),
                _const_spec(w2.shape), _const_spec(b2.shape),
                _const_spec(w3.shape), _const_spec(b3.shape),
                _const_spec(w4.shape), _const_spec(b4.shape),
            ],
            out_specs=pl.BlockSpec((tm, OUT_FEATURES), lambda i: (i, 0)),
        ),
        compiler_params=pltpu.CompilerParams(
            dimension_semantics=("parallel",)),   # shards row tiles across TCs (v7x)
    )(x, w0, b0, w1, b1, w2, b2, w3, b3, w4, b4)

    return out[:M].reshape(B, N, OUT_FEATURES)


# ------------------------------ params & reference ----------------------------
def init_siren_params(key):
    """Deterministic SIREN initialization (weights stored as (in, out))."""
    ks = jax.random.split(key, 10)
    params = []
    lim0 = 1.0 / IN_FEATURES
    params.append(jax.random.uniform(ks[0], (IN_FEATURES, HIDDEN),
                                     jnp.float32, -lim0, lim0))
    params.append(jnp.zeros((1, HIDDEN), jnp.float32))
    limh = jnp.sqrt(6.0 / HIDDEN) / OMEGA
    for l in range(NUM_HIDDEN_LAYERS):
        params.append(jax.random.uniform(ks[1 + 2 * l], (HIDDEN, HIDDEN),
                                         jnp.float32, -limh, limh))
        params.append(jnp.zeros((1, HIDDEN), jnp.float32))
    params.append(jax.random.uniform(ks[8], (HIDDEN, OUT_FEATURES),
                                     jnp.float32, -limh, limh))
    params.append(jnp.zeros((1, OUT_FEATURES), jnp.float32))
    return tuple(params)


def reference_forward(coords, params):
    (w0, b0, w1, b1, w2, b2, w3, b3, w4, b4) = params
    h = jnp.sin(OMEGA * (coords @ w0 + b0))
    h = jnp.sin(OMEGA * (h @ w1 + b1))
    h = jnp.sin(OMEGA * (h @ w2 + b2))
    h = jnp.sin(OMEGA * (h @ w3 + b3))
    return h @ w4 + b4


if __name__ == "__main__":
    key = jax.random.PRNGKey(0)
    k_coords, k_params = jax.random.split(key)

    B, N = 2, 128                      # (batch, num query points)
    coords = jax.random.uniform(k_coords, (B, N, IN_FEATURES),
                                jnp.float32, -1.0, 1.0)
    raw_params = init_siren_params(k_params)
    prepared = prepare_params(raw_params)

    out = sdf_decoder_forward(coords, prepared)
    out = jax.block_until_ready(out)
    assert out.shape == (B, N, OUT_FEATURES)

    ref = reference_forward(coords, raw_params)
    max_err = float(jnp.max(jnp.abs(out - ref)))
    assert jnp.allclose(out, ref, atol=2e-4, rtol=2e-4), max_err

    print("KERNEL_OK")
</pallas_src>

<mosaic_0001>
module attributes {stable_mosaic.version = 11 : i64} {
  func.func @_siren_mlp_kernel(%arg0: i32, %arg1: memref<256x8xf32, #tpu.memory_space<vmem>>, %arg2: memref<8x128xf32, #tpu.memory_space<vmem>>, %arg3: memref<1x128xf32, #tpu.memory_space<vmem>>, %arg4: memref<128x128xf32, #tpu.memory_space<vmem>>, %arg5: memref<1x128xf32, #tpu.memory_space<vmem>>, %arg6: memref<128x128xf32, #tpu.memory_space<vmem>>, %arg7: memref<1x128xf32, #tpu.memory_space<vmem>>, %arg8: memref<128x128xf32, #tpu.memory_space<vmem>>, %arg9: memref<1x128xf32, #tpu.memory_space<vmem>>, %arg10: memref<128x1xf32, #tpu.memory_space<vmem>>, %arg11: memref<1x1xf32, #tpu.memory_space<vmem>>, %arg12: memref<256x1xf32, #tpu.memory_space<vmem>>) attributes {dimension_semantics = [#tpu.dimension_semantics<parallel>], iteration_bounds = array<i64: 1>, scalar_prefetch = 0 : i64, scratch_operands = 0 : i64, tpu.core_type = #tpu.core_type<tc>, window_params = [{transform_indices = @transform_0, window_bounds = array<i64: 256, 8>}, {pipeline_mode = #tpu.pipeline_mode<synchronous>, transform_indices = @transform_1, window_bounds = array<i64: 8, 128>}, {pipeline_mode = #tpu.pipeline_mode<synchronous>, transform_indices = @transform_2, window_bounds = array<i64: 1, 128>}, {pipeline_mode = #tpu.pipeline_mode<synchronous>, transform_indices = @transform_3, window_bounds = array<i64: 128, 128>}, {pipeline_mode = #tpu.pipeline_mode<synchronous>, transform_indices = @transform_4, window_bounds = array<i64: 1, 128>}, {pipeline_mode = #tpu.pipeline_mode<synchronous>, transform_indices = @transform_5, window_bounds = array<i64: 128, 128>}, {pipeline_mode = #tpu.pipeline_mode<synchronous>, transform_indices = @transform_6, window_bounds = array<i64: 1, 128>}, {pipeline_mode = #tpu.pipeline_mode<synchronous>, transform_indices = @transform_7, window_bounds = array<i64: 128, 128>}, {pipeline_mode = #tpu.pipeline_mode<synchronous>, transform_indices = @transform_8, window_bounds = array<i64: 1, 128>}, {pipeline_mode = #tpu.pipeline_mode<synchronous>, transform_indices = @transform_9, window_bounds = array<i64: 128, 1>}, {pipeline_mode = #tpu.pipeline_mode<synchronous>, transform_indices = @transform_10, window_bounds = array<i64: 1, 1>}, {transform_indices = @transform_11, window_bounds = array<i64: 256, 1>}]} {
    %c0 = arith.constant 0 : index
    %c0_0 = arith.constant 0 : index
    %0 = vector.load %arg1[%c0, %c0_0] : memref<256x8xf32, #tpu.memory_space<vmem>>, vector<256x8xf32>
    %c0_1 = arith.constant 0 : index
    %c0_2 = arith.constant 0 : index
    %1 = vector.load %arg2[%c0_1, %c0_2] : memref<8x128xf32, #tpu.memory_space<vmem>>, vector<8x128xf32>
    %cst = arith.constant dense<0.000000e+00> : vector<256x128xf32>
    %2 = tpu.matmul %0, %1, %cst {dimension_numbers = #tpu.dot_dimension_numbers<[1], [0], [0], [1], [0, 0, 1, 1], [], []>} : vector<256x8xf32>, vector<8x128xf32>, vector<256x128xf32> -> vector<256x128xf32>
    %c0_3 = arith.constant 0 : index
    %c0_4 = arith.constant 0 : index
    %3 = vector.load %arg3[%c0_3, %c0_4] : memref<1x128xf32, #tpu.memory_space<vmem>>, vector<1x128xf32>
    %4 = vector.broadcast %3 : vector<1x128xf32> to vector<256x128xf32>
    %5 = arith.addf %2, %4 : vector<256x128xf32>
    %cst_5 = arith.constant 0.159154937 : f32
    %6 = vector.broadcast %cst_5 : f32 to vector<256x128xf32>
    %7 = arith.mulf %5, %6 : vector<256x128xf32>
    %cst_6 = arith.constant 5.000000e-01 : f32
    %8 = vector.broadcast %cst_6 : f32 to vector<256x128xf32>
    %9 = arith.addf %7, %8 : vector<256x128xf32>
    %10 = math.floor %9 : vector<256x128xf32>
    %cst_7 = arith.constant 6.281250e+00 : f32
    %11 = vector.broadcast %cst_7 : f32 to vector<256x128xf32>
    %12 = arith.mulf %10, %11 : vector<256x128xf32>
    %13 = arith.subf %5, %12 : vector<256x128xf32>
    %cst_8 = arith.constant 0.00193530717 : f32
    %14 = vector.broadcast %cst_8 : f32 to vector<256x128xf32>
    %15 = arith.mulf %10, %14 : vector<256x128xf32>
    %16 = arith.subf %13, %15 : vector<256x128xf32>
    %cst_9 = arith.constant 1.57079637 : f32
    %17 = vector.broadcast %cst_9 : f32 to vector<256x128xf32>
    %18 = arith.cmpf ogt, %16, %17 : vector<256x128xf32>
    %cst_10 = arith.constant 3.14159274 : f32
    %19 = vector.broadcast %cst_10 : f32 to vector<256x128xf32>
    %20 = arith.subf %19, %16 : vector<256x128xf32>
    %21 = arith.select %18, %20, %16 : vector<256x128xi1>, vector<256x128xf32>
    %cst_11 = arith.constant -1.57079637 : f32
    %22 = vector.broadcast %cst_11 : f32 to vector<256x128xf32>
    %23 = arith.cmpf olt, %21, %22 : vector<256x128xf32>
    %cst_12 = arith.constant -3.14159274 : f32
    %24 = vector.broadcast %cst_12 : f32 to vector<256x128xf32>
    %25 = arith.subf %24, %21 : vector<256x128xf32>
    %26 = arith.select %23, %25, %21 : vector<256x128xi1>, vector<256x128xf32>
    %27 = arith.mulf %26, %26 : vector<256x128xf32>
    %cst_13 = arith.constant -2.50521079E-8 : f32
    %28 = vector.broadcast %cst_13 : f32 to vector<256x128xf32>
    %29 = arith.mulf %28, %27 : vector<256x128xf32>
    %cst_14 = arith.constant 2.75573188E-6 : f32
    %30 = vector.broadcast %cst_14 : f32 to vector<256x128xf32>
    %31 = arith.addf %29, %30 : vector<256x128xf32>
    %32 = arith.mulf %31, %27 : vector<256x128xf32>
    %cst_15 = arith.constant -1.98412701E-4 : f32
    %33 = vector.broadcast %cst_15 : f32 to vector<256x128xf32>
    %34 = arith.addf %32, %33 : vector<256x128xf32>
    %35 = arith.mulf %34, %27 : vector<256x128xf32>
    %cst_16 = arith.constant 0.00833333284 : f32
    %36 = vector.broadcast %cst_16 : f32 to vector<256x128xf32>
    %37 = arith.addf %35, %36 : vector<256x128xf32>
    %38 = arith.mulf %37, %27 : vector<256x128xf32>
    %cst_17 = arith.constant -0.166666672 : f32
    %39 = vector.broadcast %cst_17 : f32 to vector<256x128xf32>
    %40 = arith.addf %38, %39 : vector<256x128xf32>
    %41 = arith.mulf %27, %40 : vector<256x128xf32>
    %42 = arith.mulf %26, %41 : vector<256x128xf32>
    %43 = arith.addf %26, %42 : vector<256x128xf32>
    %c0_18 = arith.constant 0 : index
    %c0_19 = arith.constant 0 : index
    %44 = vector.load %arg4[%c0_18, %c0_19] : memref<128x128xf32, #tpu.memory_space<vmem>>, vector<128x128xf32>
    %cst_20 = arith.constant dense<0.000000e+00> : vector<256x128xf32>
    %45 = tpu.matmul %43, %44, %cst_20 {dimension_numbers = #tpu.dot_dimension_numbers<[1], [0], [0], [1], [0, 0, 1, 1], [], []>} : vector<256x128xf32>, vector<128x128xf32>, vector<256x128xf32> -> vector<256x128xf32>
    %c0_21 = arith.constant 0 : index
    %c0_22 = arith.constant 0 : index
    %46 = vector.load %arg5[%c0_21, %c0_22] : memref<1x128xf32, #tpu.memory_space<vmem>>, vector<1x128xf32>
    %47 = vector.broadcast %46 : vector<1x128xf32> to vector<256x128xf32>
    %48 = arith.addf %45, %47 : vector<256x128xf32>
    %cst_23 = arith.constant 0.159154937 : f32
    %49 = vector.broadcast %cst_23 : f32 to vector<256x128xf32>
    %50 = arith.mulf %48, %49 : vector<256x128xf32>
    %cst_24 = arith.constant 5.000000e-01 : f32
    %51 = vector.broadcast %cst_24 : f32 to vector<256x128xf32>
    %52 = arith.addf %50, %51 : vector<256x128xf32>
    %53 = math.floor %52 : vector<256x128xf32>
    %cst_25 = arith.constant 6.281250e+00 : f32
    %54 = vector.broadcast %cst_25 : f32 to vector<256x128xf32>
    %55 = arith.mulf %53, %54 : vector<256x128xf32>
    %56 = arith.subf %48, %55 : vector<256x128xf32>
    %cst_26 = arith.constant 0.00193530717 : f32
    %57 = vector.broadcast %cst_26 : f32 to vector<256x128xf32>
    %58 = arith.mulf %53, %57 : vector<256x128xf32>
    %59 = arith.subf %56, %58 : vector<256x128xf32>
    %cst_27 = arith.constant 1.57079637 : f32
    %60 = vector.broadcast %cst_27 : f32 to vector<256x128xf32>
    %61 = arith.cmpf ogt, %59, %60 : vector<256x128xf32>
    %cst_28 = arith.constant 3.14159274 : f32
    %62 = vector.broadcast %cst_28 : f32 to vector<256x128xf32>
    %63 = arith.subf %62, %59 : vector<256x128xf32>
    %64 = arith.select %61, %63, %59 : vector<256x128xi1>, vector<256x128xf32>
    %cst_29 = arith.constant -1.57079637 : f32
    %65 = vector.broadcast %cst_29 : f32 to vector<256x128xf32>
    %66 = arith.cmpf olt, %64, %65 : vector<256x128xf32>
    %cst_30 = arith.constant -3.14159274 : f32
    %67 = vector.broadcast %cst_30 : f32 to vector<256x128xf32>
    %68 = arith.subf %67, %64 : vector<256x128xf32>
    %69 = arith.select %66, %68, %64 : vector<256x128xi1>, vector<256x128xf32>
    %70 = arith.mulf %69, %69 : vector<256x128xf32>
    %cst_31 = arith.constant -2.50521079E-8 : f32
    %71 = vector.broadcast %cst_31 : f32 to vector<256x128xf32>
    %72 = arith.mulf %71, %70 : vector<256x128xf32>
    %cst_32 = arith.constant 2.75573188E-6 : f32
    %73 = vector.broadcast %cst_32 : f32 to vector<256x128xf32>
    %74 = arith.addf %72, %73 : vector<256x128xf32>
    %75 = arith.mulf %74, %70 : vector<256x128xf32>
    %cst_33 = arith.constant -1.98412701E-4 : f32
    %76 = vector.broadcast %cst_33 : f32 to vector<256x128xf32>
    %77 = arith.addf %75, %76 : vector<256x128xf32>
    %78 = arith.mulf %77, %70 : vector<256x128xf32>
    %cst_34 = arith.constant 0.00833333284 : f32
    %79 = vector.broadcast %cst_34 : f32 to vector<256x128xf32>
    %80 = arith.addf %78, %79 : vector<256x128xf32>
    %81 = arith.mulf %80, %70 : vector<256x128xf32>
    %cst_35 = arith.constant -0.166666672 : f32
    %82 = vector.broadcast %cst_35 : f32 to vector<256x128xf32>
    %83 = arith.addf %81, %82 : vector<256x128xf32>
    %84 = arith.mulf %70, %83 : vector<256x128xf32>
    %85 = arith.mulf %69, %84 : vector<256x128xf32>
    %86 = arith.addf %69, %85 : vector<256x128xf32>
    %c0_36 = arith.constant 0 : index
    %c0_37 = arith.constant 0 : index
    %87 = vector.load %arg6[%c0_36, %c0_37] : memref<128x128xf32, #tpu.memory_space<vmem>>, vector<128x128xf32>
    %cst_38 = arith.constant dense<0.000000e+00> : vector<256x128xf32>
    %88 = tpu.matmul %86, %87, %cst_38 {dimension_numbers = #tpu.dot_dimension_numbers<[1], [0], [0], [1], [0, 0, 1, 1], [], []>} : vector<256x128xf32>, vector<128x128xf32>, vector<256x128xf32> -> vector<256x128xf32>
    %c0_39 = arith.constant 0 : index
    %c0_40 = arith.constant 0 : index
    %89 = vector.load %arg7[%c0_39, %c0_40] : memref<1x128xf32, #tpu.memory_space<vmem>>, vector<1x128xf32>
    %90 = vector.broadcast %89 : vector<1x128xf32> to vector<256x128xf32>
    %91 = arith.addf %88, %90 : vector<256x128xf32>
    %cst_41 = arith.constant 0.159154937 : f32
    %92 = vector.broadcast %cst_41 : f32 to vector<256x128xf32>
    %93 = arith.mulf %91, %92 : vector<256x128xf32>
    %cst_42 = arith.constant 5.000000e-01 : f32
    %94 = vector.broadcast %cst_42 : f32 to vector<256x128xf32>
    %95 = arith.addf %93, %94 : vector<256x128xf32>
    %96 = math.floor %95 : vector<256x128xf32>
    %cst_43 = arith.constant 6.281250e+00 : f32
    %97 = vector.broadcast %cst_43 : f32 to vector<256x128xf32>
    %98 = arith.mulf %96, %97 : vector<256x128xf32>
    %99 = arith.subf %91, %98 : vector<256x128xf32>
    %cst_44 = arith.constant 0.00193530717 : f32
    %100 = vector.broadcast %cst_44 : f32 to vector<256x128xf32>
    %101 = arith.mulf %96, %100 : vector<256x128xf32>
    %102 = arith.subf %99, %101 : vector<256x128xf32>
    %cst_45 = arith.constant 1.57079637 : f32
    %103 = vector.broadcast %cst_45 : f32 to vector<256x128xf32>
    %104 = arith.cmpf ogt, %102, %103 : vector<256x128xf32>
    %cst_46 = arith.constant 3.14159274 : f32
    %105 = vector.broadcast %cst_46 : f32 to vector<256x128xf32>
    %106 = arith.subf %105, %102 : vector<256x128xf32>
    %107 = arith.select %104, %106, %102 : vector<256x128xi1>, vector<256x128xf32>
    %cst_47 = arith.constant -1.57079637 : f32
    %108 = vector.broadcast %cst_47 : f32 to vector<256x128xf32>
    %109 = arith.cmpf olt, %107, %108 : vector<256x128xf32>
    %cst_48 = arith.constant -3.14159274 : f32
    %110 = vector.broadcast %cst_48 : f32 to vector<256x128xf32>
    %111 = arith.subf %110, %107 : vector<256x128xf32>
    %112 = arith.select %109, %111, %107 : vector<256x128xi1>, vector<256x128xf32>
    %113 = arith.mulf %112, %112 : vector<256x128xf32>
    %cst_49 = arith.constant -2.50521079E-8 : f32
    %114 = vector.broadcast %cst_49 : f32 to vector<256x128xf32>
    %115 = arith.mulf %114, %113 : vector<256x128xf32>
    %cst_50 = arith.constant 2.75573188E-6 : f32
    %116 = vector.broadcast %cst_50 : f32 to vector<256x128xf32>
    %117 = arith.addf %115, %116 : vector<256x128xf32>
    %118 = arith.mulf %117, %113 : vector<256x128xf32>
    %cst_51 = arith.constant -1.98412701E-4 : f32
    %119 = vector.broadcast %cst_51 : f32 to vector<256x128xf32>
    %120 = arith.addf %118, %119 : vector<256x128xf32>
    %121 = arith.mulf %120, %113 : vector<256x128xf32>
    %cst_52 = arith.constant 0.00833333284 : f32
    %122 = vector.broadcast %cst_52 : f32 to vector<256x128xf32>
    %123 = arith.addf %121, %122 : vector<256x128xf32>
    %124 = arith.mulf %123, %113 : vector<256x128xf32>
    %cst_53 = arith.constant -0.166666672 : f32
    %125 = vector.broadcast %cst_53 : f32 to vector<256x128xf32>
    %126 = arith.addf %124, %125 : vector<256x128xf32>
    %127 = arith.mulf %113, %126 : vector<256x128xf32>
    %128 = arith.mulf %112, %127 : vector<256x128xf32>
    %129 = arith.addf %112, %128 : vector<256x128xf32>
    %c0_54 = arith.constant 0 : index
    %c0_55 = arith.constant 0 : index
    %130 = vector.load %arg8[%c0_54, %c0_55] : memref<128x128xf32, #tpu.memory_space<vmem>>, vector<128x128xf32>
    %cst_56 = arith.constant dense<0.000000e+00> : vector<256x128xf32>
    %131 = tpu.matmul %129, %130, %cst_56 {dimension_numbers = #tpu.dot_dimension_numbers<[1], [0], [0], [1], [0, 0, 1, 1], [], []>} : vector<256x128xf32>, vector<128x128xf32>, vector<256x128xf32> -> vector<256x128xf32>
    %c0_57 = arith.constant 0 : index
    %c0_58 = arith.constant 0 : index
    %132 = vector.load %arg9[%c0_57, %c0_58] : memref<1x128xf32, #tpu.memory_space<vmem>>, vector<1x128xf32>
    %133 = vector.broadcast %132 : vector<1x128xf32> to vector<256x128xf32>
    %134 = arith.addf %131, %133 : vector<256x128xf32>
    %cst_59 = arith.constant 0.159154937 : f32
    %135 = vector.broadcast %cst_59 : f32 to vector<256x128xf32>
    %136 = arith.mulf %134, %135 : vector<256x128xf32>
    %cst_60 = arith.constant 5.000000e-01 : f32
    %137 = vector.broadcast %cst_60 : f32 to vector<256x128xf32>
    %138 = arith.addf %136, %137 : vector<256x128xf32>
    %139 = math.floor %138 : vector<256x128xf32>
    %cst_61 = arith.constant 6.281250e+00 : f32
    %140 = vector.broadcast %cst_61 : f32 to vector<256x128xf32>
    %141 = arith.mulf %139, %140 : vector<256x128xf32>
    %142 = arith.subf %134, %141 : vector<256x128xf32>
    %cst_62 = arith.constant 0.00193530717 : f32
    %143 = vector.broadcast %cst_62 : f32 to vector<256x128xf32>
    %144 = arith.mulf %139, %143 : vector<256x128xf32>
    %145 = arith.subf %142, %144 : vector<256x128xf32>
    %cst_63 = arith.constant 1.57079637 : f32
    %146 = vector.broadcast %cst_63 : f32 to vector<256x128xf32>
    %147 = arith.cmpf ogt, %145, %146 : vector<256x128xf32>
    %cst_64 = arith.constant 3.14159274 : f32
    %148 = vector.broadcast %cst_64 : f32 to vector<256x128xf32>
    %149 = arith.subf %148, %145 : vector<256x128xf32>
    %150 = arith.select %147, %149, %145 : vector<256x128xi1>, vector<256x128xf32>
    %cst_65 = arith.constant -1.57079637 : f32
    %151 = vector.broadcast %cst_65 : f32 to vector<256x128xf32>
    %152 = arith.cmpf olt, %150, %151 : vector<256x128xf32>
    %cst_66 = arith.constant -3.14159274 : f32
    %153 = vector.broadcast %cst_66 : f32 to vector<256x128xf32>
    %154 = arith.subf %153, %150 : vector<256x128xf32>
    %155 = arith.select %152, %154, %150 : vector<256x128xi1>, vector<256x128xf32>
    %156 = arith.mulf %155, %155 : vector<256x128xf32>
    %cst_67 = arith.constant -2.50521079E-8 : f32
    %157 = vector.broadcast %cst_67 : f32 to vector<256x128xf32>
    %158 = arith.mulf %157, %156 : vector<256x128xf32>
    %cst_68 = arith.constant 2.75573188E-6 : f32
    %159 = vector.broadcast %cst_68 : f32 to vector<256x128xf32>
    %160 = arith.addf %158, %159 : vector<256x128xf32>
    %161 = arith.mulf %160, %156 : vector<256x128xf32>
    %cst_69 = arith.constant -1.98412701E-4 : f32
    %162 = vector.broadcast %cst_69 : f32 to vector<256x128xf32>
    %163 = arith.addf %161, %162 : vector<256x128xf32>
    %164 = arith.mulf %163, %156 : vector<256x128xf32>
    %cst_70 = arith.constant 0.00833333284 : f32
    %165 = vector.broadcast %cst_70 : f32 to vector<256x128xf32>
    %166 = arith.addf %164, %165 : vector<256x128xf32>
    %167 = arith.mulf %166, %156 : vector<256x128xf32>
    %cst_71 = arith.constant -0.166666672 : f32
    %168 = vector.broadcast %cst_71 : f32 to vector<256x128xf32>
    %169 = arith.addf %167, %168 : vector<256x128xf32>
    %170 = arith.mulf %156, %169 : vector<256x128xf32>
    %171 = arith.mulf %155, %170 : vector<256x128xf32>
    %172 = arith.addf %155, %171 : vector<256x128xf32>
    %c0_72 = arith.constant 0 : index
    %c0_73 = arith.constant 0 : index
    %173 = vector.load %arg10[%c0_72, %c0_73] : memref<128x1xf32, #tpu.memory_space<vmem>>, vector<128x1xf32>
    %cst_74 = arith.constant dense<0.000000e+00> : vector<256x1xf32>
    %174 = tpu.matmul %172, %173, %cst_74 {dimension_numbers = #tpu.dot_dimension_numbers<[1], [0], [0], [1], [0, 0, 1, 1], [], []>} : vector<256x128xf32>, vector<128x1xf32>, vector<256x1xf32> -> vector<256x1xf32>
    %c0_75 = arith.constant 0 : index
    %c0_76 = arith.constant 0 : index
    %175 = vector.load %arg11[%c0_75, %c0_76] : memref<1x1xf32, #tpu.memory_space<vmem>>, vector<1x1xf32>
    %176 = vector.broadcast %175 : vector<1x1xf32> to vector<256x1xf32>
    %177 = arith.addf %174, %176 : vector<256x1xf32>
    %c0_77 = arith.constant 0 : index
    %c0_78 = arith.constant 0 : index
    %178 = vector.load %arg12[%c0_77, %c0_78] : memref<256x1xf32, #tpu.memory_space<vmem>>, vector<256x1xf32>
    tpu.vector_store %arg12[%c0_77, %c0_78], %177 {strides = array<i32>} : memref<256x1xf32, #tpu.memory_space<vmem>>, vector<256x1xf32>,
    return
  }
  func.func @transform_0(%arg0: i32) -> (i32, i32) {
    %c0_i32 = arith.constant 0 : i32
    %c0_i32_0 = arith.constant 0 : i32
    return %arg0, %c0_i32 : i32, i32
  }
  func.func @transform_1(%arg0: i32) -> (i32, i32) {
    %c0_i32 = arith.constant 0 : i32
    %c0_i32_0 = arith.constant 0 : i32
    %c0_i32_1 = arith.constant 0 : i32
    return %c0_i32, %c0_i32_0 : i32, i32
  }
  func.func @transform_2(%arg0: i32) -> (i32, i32) {
    %c0_i32 = arith.constant 0 : i32
    %c0_i32_0 = arith.constant 0 : i32
    %c0_i32_1 = arith.constant 0 : i32
    return %c0_i32, %c0_i32_0 : i32, i32
  }
  func.func @transform_3(%arg0: i32) -> (i32, i32) {
    %c0_i32 = arith.constant 0 : i32
    %c0_i32_0 = arith.constant 0 : i32
    %c0_i32_1 = arith.constant 0 : i32
    return %c0_i32, %c0_i32_0 : i32, i32
  }
  func.func @transform_4(%arg0: i32) -> (i32, i32) {
    %c0_i32 = arith.constant 0 : i32
    %c0_i32_0 = arith.constant 0 : i32
    %c0_i32_1 = arith.constant 0 : i32
    return %c0_i32, %c0_i32_0 : i32, i32
  }
  func.func @transform_5(%arg0: i32) -> (i32, i32) {
    %c0_i32 = arith.constant 0 : i32
    %c0_i32_0 = arith.constant 0 : i32
    %c0_i32_1 = arith.constant 0 : i32
    return %c0_i32, %c0_i32_0 : i32, i32
  }
  func.func @transform_6(%arg0: i32) -> (i32, i32) {
    %c0_i32 = arith.constant 0 : i32
    %c0_i32_0 = arith.constant 0 : i32
    %c0_i32_1 = arith.constant 0 : i32
    return %c0_i32, %c0_i32_0 : i32, i32
  }
  func.func @transform_7(%arg0: i32) -> (i32, i32) {
    %c0_i32 = arith.constant 0 : i32
    %c0_i32_0 = arith.constant 0 : i32
    %c0_i32_1 = arith.constant 0 : i32
    return %c0_i32, %c0_i32_0 : i32, i32
  }
  func.func @transform_8(%arg0: i32) -> (i32, i32) {
    %c0_i32 = arith.constant 0 : i32
    %c0_i32_0 = arith.constant 0 : i32
    %c0_i32_1 = arith.constant 0 : i32
    return %c0_i32, %c0_i32_0 : i32, i32
  }
  func.func @transform_9(%arg0: i32) -> (i32, i32) {
    %c0_i32 = arith.constant 0 : i32
    %c0_i32_0 = arith.constant 0 : i32
    %c0_i32_1 = arith.constant 0 : i32
    return %c0_i32, %c0_i32_0 : i32, i32
  }
  func.func @transform_10(%arg0: i32) -> (i32, i32) {
    %c0_i32 = arith.constant 0 : i32
    %c0_i32_0 = arith.constant 0 : i32
    %c0_i32_1 = arith.constant 0 : i32
    return %c0_i32, %c0_i32_0 : i32, i32
  }
  func.func @transform_11(%arg0: i32) -> (i32, i32) {
    %c0_i32 = arith.constant 0 : i32
    %c0_i32_0 = arith.constant 0 : i32
    return %arg0, %c0_i32 : i32, i32
  }
}

</mosaic_0001>

<bundles_post_ra>
// kernel: sdf_decoder_forward.1
= control target key start
LH: loop header
LB: loop body
LE: loop exit
PB: predicated region body
PF: predicated region fallthrough
CT: control target
= control target key end

     0   :  { %vm77_vm0 = vcmask 64512   ;;  %s7532_s1 = inlined_call_operand.vmem [shape: f32[8,128], index: 1, kind: input, shape index: {}]   ;;  %s7533_s0 = inlined_call_operand.vmem [shape: f32[256,8], index: 0, kind: input, shape index: {}]   ;;  %s7534_s2 = inlined_call_operand.vmem [shape: f32[1,128], index: 2, kind: input, shape index: {}]   ;;  %s7535_s3 = inlined_call_operand.vmem [shape: f32[128,128], index: 3, kind: input, shape index: {}]   ;;  %s7536_s4 = inlined_call_operand.vmem [shape: f32[1,128], index: 4, kind: input, shape index: {}]   ;;  %s7537_s5 = inlined_call_operand.vmem [shape: f32[128,128], index: 5, kind: input, shape index: {}]   ;;  %s7538_s6 = inlined_call_operand.vmem [shape: f32[1,128], index: 6, kind: input, shape index: {}]   ;;  %s7539_s7 = inlined_call_operand.vmem [shape: f32[128,128], index: 7, kind: input, shape index: {}]   ;;  %s7540_s8 = inlined_call_operand.vmem [shape: f32[1,128], index: 8, kind: input, shape index: {}]   ;;  %s7541_s9 = inlined_call_operand.vmem [shape: f32[128,1], index: 9, kind: input, shape index: {}]   ;;  %s7542_s10 = inlined_call_operand.<no memory space> [shape: f32[1,1], index: 10, kind: input, shape index: {}]   ;;  %s7543_s11 = inlined_call_operand.vmem [shape: f32[256,1], index: 11, kind: output, shape index: {}]  }
   0x1   :  { %v72_v0 = vld [vmem:[%s7532_s1] sm:$0xff]  ;;  %v41_v2 = vld [vmem:[%s7533_s0 + $0x8] sm:$0xff]  ;;  %v50_v3 = vld [vmem:[%s7533_s0 + $0x50] sm:$0xff] }
   0x2   :  { %v40_v1 = vld [vmem:[%s7533_s0] sm:$0xff]  ;;  %189 = vmatpush.msra.mxu0 %v72_v0  ;;  %4088 = vmatpush.msra.mxu1 %v72_v0  ;;  %v42_v4 = vld [vmem:[%s7533_s0 + $0x10] sm:$0xff]  ;;  %v51_v5 = vld [vmem:[%s7533_s0 + $0x58] sm:$0xff] }
   0x3   :  { %4056 = vmatmul.msk.f32.vlgmr.msra.gmra.mxu0 %vm77_vm0, %v40_v1  ;;  %4089 = vmatpush.msra.mxu2 %v72_v0  ;;  %v43_v6 = vld [vmem:[%s7533_s0 + $0x18] sm:$0xff]  ;;  %v52_v7 = vld [vmem:[%s7533_s0 + $0x60] sm:$0xff]  ;;  %v53_v9 = vld [vmem:[%s7533_s0 + $0x68] sm:$0xff] }
   0x4   :  { %4090 = vmatpush.msra.mxu3 %v72_v0  ;;  %4066 = vmatmul.msk.f32.vlgmr.msra.gmra.mxu1 %vm77_vm0, %v50_v3  ;;  %v44_v8 = vld [vmem:[%s7533_s0 + $0x20] sm:$0xff]  ;;  %v45_v10 = vld [vmem:[%s7533_s0 + $0x28] sm:$0xff]  ;;  %v54_v11 = vld [vmem:[%s7533_s0 + $0x70] sm:$0xff] }
   0x5   :  { %v1102_v12 = vld [vmem:[%s7535_s3 + $0x78] sm:$0xff]  ;;  %v1101_v13 = vld [vmem:[%s7535_s3 + $0x70] sm:$0xff]  ;;  %v1100_v15 = vld [vmem:[%s7535_s3 + $0x68] sm:$0xff] }
   0x6   :  { %1107 = vmatpush.msrb.mxu1 %v1102_v12  ;;  %v59_v14 = vld [vmem:[%s7533_s0 + $0x98] sm:$0xff]  ;;  %v46_v16 = vld [vmem:[%s7533_s0 + $0x30] sm:$0xff]  ;;  %v1099_v17 = vld [vmem:[%s7535_s3 + $0x60] sm:$0xff] }
   0x7   :  { %4075 = vmatmul.msk.f32.vlgmr.msra.gmra.mxu2 %vm77_vm0, %v59_v14  ;;  %v55_v18 = vld [vmem:[%s7533_s0 + $0x78] sm:$0xff]  ;;  %v60_v20 = vld [vmem:[%s7533_s0 + $0xa0] sm:$0xff]  ;;  %v1097_v21 = vld [vmem:[%s7535_s3 + $0x50] sm:$0xff] }
   0x8   :  { %1108 = vmatpush.msrb.mxu1 %v1101_v13  ;;  %v1098_v19 = vld [vmem:[%s7535_s3 + $0x58] sm:$0xff]  ;;  %v56_v23 = vld [vmem:[%s7533_s0 + $0x80] sm:$0xff]  ;;  %v57_v25 = vld [vmem:[%s7533_s0 + $0x88] sm:$0xff] }
   0x9   :  { %v47_v22 = vld [vmem:[%s7533_s0 + $0x38] sm:$0xff]  ;;  %v48_v24 = vld [vmem:[%s7533_s0 + $0x40] sm:$0xff]  ;;  %v49_v26 = vld [vmem:[%s7533_s0 + $0x48] sm:$0xff] }
   0xa   :  { %1109 = vmatpush.msrb.mxu1 %v1100_v15  ;;  %v58_v27 = vld [vmem:[%s7533_s0 + $0x90] sm:$0xff]  ;;  %v61_v28 = vld [vmem:[%s7533_s0 + $0xa8] sm:$0xff]  ;;  %v1095_v31 = vld [vmem:[%s7535_s3 + $0x40] sm:$0xff] }
   0xb   :  { %4057 = vmatmul.msk.f32.gmra.mxu0 %vm77_vm0, %v41_v2  ;;  %v62_v29 = vld [vmem:[%s7533_s0 + $0xb0] sm:$0xff]  ;;  %v1096_v30 = vld [vmem:[%s7535_s3 + $0x48] sm:$0xff]  ;;  %v63_v32 = vld [vmem:[%s7533_s0 + $0xb8] sm:$0xff] }
   0xc   :  { %4067 = vmatmul.msk.f32.gmra.mxu1 %vm77_vm0, %v51_v5  ;;  %v1094_v33 = vld [vmem:[%s7535_s3 + $0x38] sm:$0xff]  ;;  %v1093_v34 = vld [vmem:[%s7535_s3 + $0x30] sm:$0xff]  ;;  %v64_v35 = vld [vmem:[%s7533_s0 + $0xc0] sm:$0xff] }
   0xd   :  { %1110 = vmatpush.msrb.mxu1 %v1099_v17  ;;  %v4315_v36 = vld [vmem:[%s7534_s2] ss:$0 sm:$0xff]  ;;  %v1092_v37 = vld [vmem:[%s7535_s3 + $0x28] sm:$0xff]  ;;  %v1090_v44 = vld [vmem:[%s7535_s3 + $0x18] sm:$0xff] }
   0xe   :  { %v1091_v38 = vld [vmem:[%s7535_s3 + $0x20] sm:$0xff]  ;;  %v65_v41 = vld [vmem:[%s7533_s0 + $0xc8] sm:$0xff]  ;;  %v1089_v46 = vld [vmem:[%s7535_s3 + $0x10] sm:$0xff] }
   0xf   :  { %1111 = vmatpush.msrb.mxu1 %v1098_v19  ;;  %4076 = vmatmul.msk.f32.gmra.mxu2 %vm77_vm0, %v60_v20  ;;  %v1088_v50 = vld [vmem:[%s7535_s3 + $0x8] sm:$0xff]  ;;  %v66_v51 = vld [vmem:[%s7533_s0 + $0xd0] sm:$0xff]  ;;  %v1087_v55 = vld [vmem:[%s7535_s3] sm:$0xff] }
  0x10   :  { %v67_v5 = vld [vmem:[%s7533_s0 + $0xd8] sm:$0xff] }
  0x11   :  { %1112 = vmatpush.msrb.mxu1 %v1097_v21  ;;  %4083 = vmatmul.msk.f32.vlgmr.msra.gmra.mxu3 %vm77_vm0, %v67_v5 }
  0x13   :  { %4058 = vmatmul.msk.f32.gmra.mxu0 %vm77_vm0, %v42_v4  ;;  %1113 = vmatpush.msrb.mxu1 %v1096_v30 }
  0x14   :  { %4068 = vmatmul.msk.f32.gmra.mxu1 %vm77_vm0, %v52_v7 }
  0x15   :  { %1114 = vmatpush.msrb.mxu1 %v1095_v31 }
  0x17   :  { %4077 = vmatmul.msk.f32.gmra.mxu2 %vm77_vm0, %v61_v28  ;;  %1115 = vmatpush.msrb.mxu1 %v1094_v33 }
  0x19   :  { %1116 = vmatpush.msrb.mxu1 %v1093_v34 }
  0x1b   :  { %4059 = vmatmul.msk.f32.gmra.mxu0 %vm77_vm0, %v43_v6  ;;  %1117 = vmatpush.msrb.mxu1 %v1092_v37 }
  0x1c   :  { %4069 = vmatmul.msk.f32.gmra.mxu1 %vm77_vm0, %v53_v9 }
  0x1d   :  { %1118 = vmatpush.msrb.mxu1 %v1091_v38 }
  0x1f   :  { %4078 = vmatmul.msk.f32.gmra.mxu2 %vm77_vm0, %v62_v29  ;;  %1119 = vmatpush.msrb.mxu1 %v1090_v44 }
  0x21   :  { %1120 = vmatpush.msrb.mxu1 %v1089_v46 }
  0x23   :  { %4060 = vmatmul.msk.f32.gmra.mxu0 %vm77_vm0, %v44_v8  ;;  %1121 = vmatpush.msrb.mxu1 %v1088_v50 }
  0x24   :  { %4070 = vmatmul.msk.f32.gmra.mxu1 %vm77_vm0, %v54_v11 }
  0x25   :  { %1122 = vmatpush.msrb.mxu1 %v1087_v55 }
  0x27   :  { %4079 = vmatmul.msk.f32.gmra.mxu2 %vm77_vm0, %v63_v32 }
  0x2b   :  { %4061 = vmatmul.msk.f32.gmra.mxu0 %vm77_vm0, %v45_v10 }
  0x2c   :  { %4071 = vmatmul.msk.f32.gmra.mxu1 %vm77_vm0, %v55_v18 }
  0x2f   :  { %4080 = vmatmul.msk.f32.gmra.mxu2 %vm77_vm0, %v64_v35 }
  0x33   :  { %4062 = vmatmul.msk.f32.gmra.mxu0 %vm77_vm0, %v46_v16 }
  0x34   :  { %4072 = vmatmul.msk.f32.gmra.mxu1 %vm77_vm0, %v56_v23 }
  0x37   :  { %4081 = vmatmul.msk.f32.gmra.mxu2 %vm77_vm0, %v65_v41 }
  0x3b   :  { %4063 = vmatmul.msk.f32.gmra.mxu0 %vm77_vm0, %v47_v22 }
  0x3c   :  { %4073 = vmatmul.msk.f32.gmra.mxu1 %vm77_vm0, %v57_v25 }
  0x3f   :  { %4082 = vmatmul.msk.f32.gmra.mxu2 %vm77_vm0, %v66_v51  ;;  %v69_v51 = vld [vmem:[%s7533_s0 + $0xe8] sm:$0xff] }
  0x43   :  { %4064 = vmatmul.msk.f32.gmra.mxu0 %vm77_vm0, %v48_v24 }
  0x44   :  { %4074 = vmatmul.msk.f32.gmra.mxu1 %vm77_vm0, %v58_v27  ;;  %v68_v27 = vld [vmem:[%s7533_s0 + $0xe0] sm:$0xff] }
  0x45   :  { %4084 = vmatmul.msk.f32.gmra.mxu3 %vm77_vm0, %v68_v27 }
  0x4b   :  { %4065 = vmatmul.msk.f32.gmra.mxu0 %vm77_vm0, %v49_v26 }
  0x4d   :  { %4085 = vmatmul.msk.f32.gmra.mxu3 %vm77_vm0, %v69_v51 }
  0x80   :  { %v191_v39 = vpop.f32.mrf.mxu0 }
  0x81   :  { %v192_v40 = vadd.f32 %v4315_v36, %v191_v39  ;;  %v221_v60 = vpop.f32.mrf.mxu1 }
  0x83   :  { %v287_v42 = vmul.f32 0.15915494, %v192_v40 }
  0x85   :  { %v319_v43 = vadd.f32 0.5, %v287_v42 }
  0x87   :  { %v351_v45 = vfloor.f32 %v319_v43 }
  0x88   :  { %v194_v47 = vpop.f32.mrf.mxu0 }
  0x89   :  { %v383_v48 = vmul.f32 6.28125, %v351_v45  ;;  %v195_v49 = vadd.f32 %v4315_v36, %v194_v47  ;;  %v447_v53 = vmul.f32 0.0019353072, %v351_v45  ;;  %v224_v17 = vpop.f32.mrf.mxu1  ;;  %v4368_v45 = vadd.f32 %v4315_v36, %v221_v60 }
  0x8b   :  { %v415_v52 = vsub.f32 %v192_v40, %v383_v48  ;;  %v288_v54 = vmul.f32 0.15915494, %v195_v49 }
  0x8d   :  { %v479_v56 = vsub.f32 %v415_v52, %v447_v53  ;;  %v320_v57 = vadd.f32 0.5, %v288_v54 }
  0x8f   :  { %vm511_vm1 = vcmp.gt.f32.partialorder %v479_v56, 1.5707964  ;;  %v543_v58 = vsub.f32 3.1415927, %v479_v56  ;;  %v352_v59 = vfloor.f32 %v320_v57 }
  0x90   :  { %v197_v61 = vpop.f32.mrf.mxu0 }
  0x91   :  { %v384_v62 = vmul.f32 6.28125, %v352_v59  ;;  %v198_v63 = vadd.f32 %v4315_v36, %v197_v61  ;;  %v575_v0 = vsel %vm511_vm1, %v543_v58, %v479_v56  ;;  %v448_v3 = vmul.f32 0.0019353072, %v352_v59  ;;  %v227_v38 = vpop.f32.mrf.mxu1 }
  0x92   :  { %vm607_vm2 = vcmp.lt.f32.partialorder %v575_v0, -1.5707964  ;;  %v639_v1 = vsub.f32 -3.1415927, %v575_v0  ;;  %v297_v59 = vmul.f32 0.15915494, %v4368_v45 }
  0x93   :  { %v416_v2 = vsub.f32 %v195_v49, %v384_v62  ;;  %v289_v4 = vmul.f32 0.15915494, %v198_v63 }
  0x94   :  { %v4349_v6 = vsel %vm607_vm2, %v639_v1, %v575_v0  ;;  %v4385_v0 = vadd.f32 %v4315_v36, %v224_v17 }
  0x95   :  { %v480_v7 = vsub.f32 %v416_v2, %v448_v3  ;;  %v321_v8 = vadd.f32 0.5, %v289_v4  ;;  %v703_v9 = vmul.f32 %v4349_v6, %v4349_v6 }
  0x97   :  { %v544_v10 = vsub.f32 3.1415927, %v480_v7  ;;  %v353_v11 = vfloor.f32 %v321_v8  ;;  %v735_v12 = vmul.f32 -2.5052108e-08, %v703_v9  ;;  %vm512_vm3 = vcmp.gt.f32.partialorder %v480_v7, 1.5707964 }
  0x98   :  { %v200_v13 = vpop.f32.mrf.mxu0 }
  0x99   :  { %v385_v14 = vmul.f32 6.28125, %v353_v11  ;;  %v201_v15 = vadd.f32 %v4315_v36, %v200_v13  ;;  %v767_v16 = vadd.f32 2.7557319e-06, %v735_v12  ;;  %v449_v18 = vmul.f32 0.0019353072, %v353_v11  ;;  %v4389_v4 = vpop.f32.mrf.mxu1 }
  0x9a   :  { %v576_v19 = vsel %vm512_vm3, %v544_v10, %v480_v7  ;;  %v329_v10 = vadd.f32 0.5, %v297_v59 }
  0x9b   :  { %v417_v20 = vsub.f32 %v198_v63, %v385_v14  ;;  %v290_v21 = vmul.f32 0.15915494, %v201_v15  ;;  %v799_v22 = vmul.f32 %v767_v16, %v703_v9  ;;  %vm608_vm4 = vcmp.lt.f32.partialorder %v576_v19, -1.5707964 }
  0x9c   :  { %v640_v23 = vsub.f32 -3.1415927, %v576_v19 }
  0x9d   :  { %v481_v24 = vsub.f32 %v417_v20, %v449_v18  ;;  %v322_v25 = vadd.f32 0.5, %v290_v21  ;;  %v831_v26 = vadd.f32 -0.0001984127, %v799_v22  ;;  %v4396_v18 = vadd.f32 %v4315_v36, %v227_v38 }
  0x9e   :  { %v4358_v28 = vsel %vm608_vm4, %v640_v23, %v576_v19  ;;  %v361_v22 = vfloor.f32 %v329_v10 }
  0x9f   :  { %v545_v29 = vsub.f32 3.1415927, %v481_v24  ;;  %v354_v30 = vfloor.f32 %v322_v25  ;;  %v863_v31 = vmul.f32 %v831_v26, %v703_v9  ;;  %v4363_v32 = vmul.f32 %v4358_v28, %v4358_v28 }
  0xa0   :  { %v203_v33 = vpop.f32.mrf.mxu0  ;;  %vm513_vm5 = vcmp.gt.f32.partialorder %v481_v24, 1.5707964 }
  0xa1   :  { %v386_v34 = vmul.f32 6.28125, %v354_v30  ;;  %v204_v35 = vadd.f32 %v4315_v36, %v203_v33  ;;  %v895_v37 = vadd.f32 0.008333333, %v863_v31  ;;  %v450_v39 = vmul.f32 0.0019353072, %v354_v30  ;;  %v4414_v38 = vpop.f32.mrf.mxu1 }
  0xa2   :  { %v736_v40 = vmul.f32 -2.5052108e-08, %v4363_v32  ;;  %v577_v41 = vsel %vm513_vm5, %v545_v29, %v481_v24 }
  0xa3   :  { %v418_v42 = vsub.f32 %v201_v15, %v386_v34  ;;  %v291_v43 = vmul.f32 0.15915494, %v204_v35  ;;  %v927_v44 = vmul.f32 %v895_v37, %v703_v9  ;;  %vm609_vm6 = vcmp.lt.f32.partialorder %v577_v41, -1.5707964 }
  0xa4   :  { %v768_v46 = vadd.f32 2.7557319e-06, %v736_v40  ;;  %v641_v47 = vsub.f32 -3.1415927, %v577_v41  ;;  %v298_v15 = vmul.f32 0.15915494, %v4385_v0 }
  0xa5   :  { %v482_v48 = vsub.f32 %v418_v42, %v450_v39  ;;  %v323_v49 = vadd.f32 0.5, %v291_v43  ;;  %v959_v50 = vadd.f32 -0.16666667, %v927_v44  ;;  %v299_v37 = vmul.f32 0.15915494, %v4396_v18 }
  0xa6   :  { %v800_v52 = vmul.f32 %v768_v46, %v4363_v32  ;;  %v4374_v53 = vsel %vm609_vm6, %v641_v47, %v577_v41  ;;  %v4405_v30 = vadd.f32 0.5, %v298_v15  ;;  %v393_v43 = vmul.f32 6.28125, %v361_v22 }
  0xa7   :  { %v546_v54 = vsub.f32 3.1415927, %v482_v48  ;;  %v355_v55 = vfloor.f32 %v323_v49  ;;  %v991_v56 = vmul.f32 %v959_v50, %v703_v9  ;;  %v4379_v57 = vmul.f32 %v4374_v53, %v4374_v53 }
  0xa8   :  { %v206_v58 = vpop.f32.mrf.mxu0  ;;  %v832_v60 = vadd.f32 -0.0001984127, %v800_v52  ;;  %vm514_vm7 = vcmp.gt.f32.partialorder %v482_v48, 1.5707964  ;;  %v362_v51 = vfloor.f32 %v4405_v30 }
  0xa9   :  { %v387_v61 = vmul.f32 6.28125, %v355_v55  ;;  %v207_v62 = vadd.f32 %v4315_v36, %v206_v58  ;;  %v1023_v63 = vmul.f32 %v991_v56, %v4349_v6  ;;  %v451_v1 = vmul.f32 0.0019353072, %v355_v55  ;;  %v71_v55 = vld [vmem:[%s7533_s0 + $0xf8] sm:$0xff] }
  0xaa   :  { %v864_v2 = vmul.f32 %v832_v60, %v4363_v32  ;;  %v737_v3 = vmul.f32 -2.5052108e-08, %v4379_v57  ;;  %v578_v9 = vsel %vm514_vm7, %v546_v54, %v482_v48  ;;  %v331_v54 = vadd.f32 0.5, %v299_v37 }
  0xab   :  { %v419_v5 = vsub.f32 %v204_v35, %v387_v61  ;;  %v292_v7 = vmul.f32 0.15915494, %v207_v62  ;;  %v1055_v8 = vadd.f32 %v1023_v63, %v4349_v6  ;;  %vm610_vm8 = vcmp.lt.f32.partialorder %v578_v9, -1.5707964  ;;  %v70_v6 = vld [vmem:[%s7533_s0 + $0xf0] sm:$0xff] }
  0xac   :  { %v896_v11 = vadd.f32 0.008333333, %v864_v2  ;;  %v769_v12 = vadd.f32 2.7557319e-06, %v737_v3  ;;  %v642_v19 = vsub.f32 -3.1415927, %v578_v9  ;;  %4086 = vmatmul.msk.f32.gmra.mxu3 %vm77_vm0, %v70_v6  ;;  %v425_v61 = vsub.f32 %v4368_v45, %v393_v43 }
  0xad   :  { %v483_v13 = vsub.f32 %v419_v5, %v451_v1  ;;  %v324_v14 = vadd.f32 0.5, %v292_v7  ;;  %1123 = vmatmul.f32.vlgmr.msrb.gmra.mxu1 %v1055_v8  ;;  %v457_v56 = vmul.f32 0.0019353072, %v361_v22  ;;  %v4432_v63 = vadd.f32 %v4315_v36, %v4389_v4 }
  0xae   :  { %v928_v16 = vmul.f32 %v896_v11, %v4363_v32  ;;  %v801_v17 = vmul.f32 %v769_v12, %v4379_v57  ;;  %v4402_v26 = vsel %vm610_vm8, %v642_v19, %v578_v9  ;;  %v394_v8 = vmul.f32 6.28125, %v362_v51 }
  0xaf   :  { %v547_v20 = vsub.f32 3.1415927, %v483_v13  ;;  %v356_v21 = vfloor.f32 %v324_v14  ;;  %vm515_vm9 = vcmp.gt.f32.partialorder %v483_v13, 1.5707964  ;;  %v4409_v31 = vmul.f32 %v4402_v26, %v4402_v26 }
  0xb0   :  { %v209_v23 = vpop.f32.mrf.mxu0  ;;  %v960_v24 = vadd.f32 -0.16666667, %v928_v16  ;;  %v833_v25 = vadd.f32 -0.0001984127, %v801_v17  ;;  %v363_v9 = vfloor.f32 %v331_v54  ;;  %v300_v16 = vmul.f32 0.15915494, %v4432_v63 }
  0xb1   :  { %v388_v27 = vmul.f32 6.28125, %v356_v21  ;;  %v210_v29 = vadd.f32 %v4315_v36, %v209_v23  ;;  %v452_v33 = vmul.f32 0.0019353072, %v356_v21  ;;  %v738_v41 = vmul.f32 -2.5052108e-08, %v4409_v31 }
  0xb2   :  { %v992_v34 = vmul.f32 %v960_v24, %v4363_v32  ;;  %v865_v35 = vmul.f32 %v833_v25, %v4379_v57  ;;  %v579_v42 = vsel %vm515_vm9, %v547_v20, %v483_v13  ;;  %v4445_v13 = vpop.f32.mrf.mxu1  ;;  %v4449_v19 = vsub.f32 %v425_v61, %v457_v56 }
  0xb3   :  { %v420_v39 = vsub.f32 %v207_v62, %v388_v27  ;;  %v293_v40 = vmul.f32 0.15915494, %v210_v29  ;;  %vm611_vm10 = vcmp.lt.f32.partialorder %v579_v42, -1.5707964  ;;  %v770_v32 = vadd.f32 2.7557319e-06, %v738_v41 }
  0xb4   :  { %v1024_v44 = vmul.f32 %v992_v34, %v4358_v28  ;;  %v897_v46 = vadd.f32 0.008333333, %v865_v35  ;;  %v643_v49 = vsub.f32 -3.1415927, %v579_v42  ;;  %4087 = vmatmul.msk.f32.gmra.mxu3 %vm77_vm0, %v71_v55  ;;  %v395_v23 = vmul.f32 6.28125, %v363_v9 }
  0xb5   :  { %v484_v47 = vsub.f32 %v420_v39, %v452_v33  ;;  %v325_v48 = vadd.f32 0.5, %v293_v40  ;;  %v802_v59 = vmul.f32 %v770_v32, %v4409_v31  ;;  %v426_v30 = vsub.f32 %v4385_v0, %v394_v8 }
  0xb6   :  { %v1056_v50 = vadd.f32 %v1024_v44, %v4358_v28  ;;  %v929_v52 = vmul.f32 %v897_v46, %v4379_v57  ;;  %v4426_v60 = vsel %vm611_vm10, %v643_v49, %v579_v42  ;;  %v458_v33 = vmul.f32 0.0019353072, %v362_v51 }
  0xb7   :  { %v357_v58 = vfloor.f32 %v325_v48  ;;  %v4436_v1 = vmul.f32 %v4426_v60, %v4426_v60  ;;  %v548_v2 = vsub.f32 3.1415927, %v484_v47  ;;  %v834_v7 = vadd.f32 -0.0001984127, %v802_v59 }
  0xb8   :  { %1126 = vmatmul.f32.gmra.mxu1 %v1056_v50  ;;  %v212_v28 = vpop.f32.mrf.mxu0  ;;  %v961_v62 = vadd.f32 -0.16666667, %v929_v52  ;;  %vm516_vm11 = vcmp.gt.f32.partialorder %v484_v47, 1.5707964  ;;  %v332_v35 = vadd.f32 0.5, %v300_v16  ;;  %v427_v42 = vsub.f32 %v4396_v18, %v395_v23 }
  0xb9   :  { %v389_v3 = vmul.f32 6.28125, %v357_v58  ;;  %v4439_v5 = vadd.f32 %v4315_v36, %v212_v28  ;;  %v739_v10 = vmul.f32 -2.5052108e-08, %v4436_v1  ;;  %v866_v12 = vmul.f32 %v834_v7, %v4409_v31 }
  0xba   :  { %v993_v45 = vmul.f32 %v961_v62, %v4379_v57  ;;  %v453_v14 = vmul.f32 0.0019353072, %v357_v58  ;;  %v580_v20 = vsel %vm516_vm11, %v548_v2, %v484_v47  ;;  %v459_v43 = vmul.f32 0.0019353072, %v363_v9  ;;  %v239_v55 = vpop.f32.mrf.mxu1 }
  0xbb   :  { %v421_v11 = vsub.f32 %v210_v29, %v389_v3  ;;  %v294_v4 = vmul.f32 0.15915494, %v4439_v5  ;;  %v771_v17 = vadd.f32 2.7557319e-06, %v739_v10  ;;  %v898_v6 = vadd.f32 0.008333333, %v866_v12 }
  0xbc   :  { %v1025_v15 = vmul.f32 %v993_v45, %v4374_v53  ;;  %vm612_vm12 = vcmp.lt.f32.partialorder %v580_v20, -1.5707964  ;;  %v644_v29 = vsub.f32 -3.1415927, %v580_v20  ;;  %v364_v50 = vfloor.f32 %v332_v35 }
  0xbd   :  { %v326_v57 = vadd.f32 0.5, %v294_v4  ;;  %v485_v21 = vsub.f32 %v421_v11, %v453_v14  ;;  %v803_v24 = vmul.f32 %v771_v17, %v4436_v1  ;;  %v930_v27 = vmul.f32 %v898_v6, %v4409_v31 }
  0xbe   :  { %v1057_v22 = vadd.f32 %v1025_v15, %v4374_v53  ;;  %v4458_v53 = vadd.f32 %v4315_v36, %v4414_v38  ;;  %v4462_v46 = vsel %vm612_vm12, %v644_v29, %v580_v20  ;;  %v553_v56 = vsub.f32 3.1415927, %v4449_v19 }
  0xbf   :  { %v358_v25 = vfloor.f32 %v326_v57  ;;  %v835_v37 = vadd.f32 -0.0001984127, %v803_v24  ;;  %v962_v41 = vadd.f32 -0.16666667, %v930_v27  ;;  %v549_v0 = vsub.f32 3.1415927, %v485_v21 }
  0xc0   :  { %1129 = vmatmul.f32.gmra.mxu1 %v1057_v22  ;;  %v215_v34 = vpop.f32.mrf.mxu0  ;;  %v4467_v32 = vmul.f32 %v4462_v46, %v4462_v46  ;;  %vm517_vm13 = vcmp.gt.f32.partialorder %v485_v21, 1.5707964  ;;  %v301_v52 = vmul.f32 0.15915494, %v4458_v53  ;;  %v4480_v7 = vmul.f32 6.28125, %v364_v50 }
  0xc1   :  { %v390_v39 = vmul.f32 6.28125, %v358_v25  ;;  %v216_v40 = vadd.f32 %v4315_v36, %v215_v34  ;;  %v867_v44 = vmul.f32 %v835_v37, %v4436_v1  ;;  %v994_v48 = vmul.f32 %v962_v41, %v4409_v31 }
  0xc2   :  { %v740_v54 = vmul.f32 -2.5052108e-08, %v4467_v32  ;;  %v4474_v31 = vsub.f32 %v426_v30, %v458_v33  ;;  %v454_v58 = vmul.f32 0.0019353072, %v358_v25  ;;  %v581_v2 = vsel %vm517_vm13, %v549_v0, %v485_v21  ;;  %v242_v30 = vpop.f32.mrf.mxu1 }
  0xc3   :  { %v295_v47 = vmul.f32 0.15915494, %v216_v40  ;;  %v422_v49 = vsub.f32 %v4439_v5, %v390_v39  ;;  %v899_v38 = vadd.f32 0.008333333, %v867_v44  ;;  %v1026_v18 = vmul.f32 %v994_v48, %v4402_v26 }
  0xc4   :  { %v772_v62 = vadd.f32 2.7557319e-06, %v740_v54  ;;  %v4478_v5 = vsub.f32 %v427_v42, %v459_v43  ;;  %v4483_v11 = vadd.f32 0.5, %v301_v52  ;;  %vm613_vm14 = vcmp.lt.f32.partialorder %v581_v2, -1.5707964 }
  0xc5   :  { %v327_v51 = vadd.f32 0.5, %v295_v47  ;;  %v931_v59 = vmul.f32 %v899_v38, %v4436_v1  ;;  %v1058_v28 = vadd.f32 %v1026_v18, %v4402_v26  ;;  %v486_v3 = vsub.f32 %v422_v49, %v454_v58 }
  0xc6   :  { %v804_v4 = vmul.f32 %v772_v62, %v4467_v32  ;;  %v4489_v26 = vadd.f32 %v4315_v36, %v4445_v13  ;;  %v645_v14 = vsub.f32 -3.1415927, %v581_v2  ;;  %v554_v24 = vsub.f32 3.1415927, %v4474_v31 }
  0xc7   :  { %v359_v61 = vfloor.f32 %v327_v51  ;;  %v963_v45 = vadd.f32 -0.16666667, %v931_v59  ;;  %v550_v6 = vsub.f32 3.1415927, %v486_v3  ;;  %vm518_vm15 = vcmp.gt.f32.partialorder %v486_v3, 1.5707964 }
  0xc8   :  { %v218_v8 = vpop.f32.mrf.mxu0  ;;  %1132 = vmatmul.f32.gmra.mxu1 %v1058_v28  ;;  %v836_v57 = vadd.f32 -0.0001984127, %v804_v4  ;;  %v4492_v21 = vsel %vm613_vm14, %v645_v14, %v581_v2  ;;  %v555_v25 = vsub.f32 3.1415927, %v4478_v5  ;;  %v460_v27 = vmul.f32 0.0019353072, %v364_v50 }
  0xc9   :  { %v391_v9 = vmul.f32 6.28125, %v359_v61  ;;  %v219_v10 = vadd.f32 %v4315_v36, %v218_v8  ;;  %v995_v12 = vmul.f32 %v963_v45, %v4436_v1  ;;  %v455_v16 = vmul.f32 0.0019353072, %v359_v61 }
  0xca   :  { %v868_v1 = vmul.f32 %v836_v57, %v4467_v32  ;;  %v4497_v13 = vmul.f32 %v4492_v21, %v4492_v21  ;;  %v428_v39 = vsub.f32 %v4432_v63, %v4480_v7  ;;  %v582_v41 = vsel %vm518_vm15, %v550_v6, %v486_v3  ;;  %v245_v3 = vpop.f32.mrf.mxu1 }
  0xcb   :  { %v423_v15 = vsub.f32 %v216_v40, %v391_v9  ;;  %v296_v17 = vmul.f32 0.15915494, %v219_v10  ;;  %v1027_v20 = vmul.f32 %v995_v12, %v4426_v60  ;;  %v302_v40 = vmul.f32 0.15915494, %v4489_v26 }
  0xcc   :  { %v900_v35 = vadd.f32 0.008333333, %v868_v1  ;;  %v741_v37 = vmul.f32 -2.5052108e-08, %v4497_v13  ;;  %v365_v43 = vfloor.f32 %v4483_v11  ;;  %v4510_v47 = vadd.f32 %v4315_v36, %v239_v55 }
  0xcd   :  { %v487_v22 = vsub.f32 %v423_v15, %v455_v16  ;;  %v328_v23 = vadd.f32 0.5, %v296_v17  ;;  %v1059_v29 = vadd.f32 %v1027_v20, %v4426_v60  ;;  %vm614_vm1 = vcmp.lt.f32.partialorder %v582_v41, -1.5707964 }
  0xce   :  { %v932_v60 = vmul.f32 %v900_v35, %v4467_v32  ;;  %v773_v44 = vadd.f32 2.7557319e-06, %v741_v37  ;;  %v646_v38 = vsub.f32 -3.1415927, %v582_v41  ;;  %v334_v51 = vadd.f32 0.5, %v302_v40  ;;  %v248_v40 = vpop.f32.mrf.mxu2 }
  0xcf   :  { %v551_v33 = vsub.f32 3.1415927, %v487_v22  ;;  %v360_v34 = vfloor.f32 %v328_v23  ;;  %vm519_vm0 = vcmp.gt.f32.partialorder %v487_v22, 1.5707964  ;;  %v4514_v18 = vadd.f32 %v4315_v36, %v242_v30 }
  0xd0   :  { %1135 = vmatmul.f32.gmra.mxu1 %v1059_v29  ;;  %v964_v63 = vadd.f32 -0.16666667, %v932_v60  ;;  %v805_v50 = vmul.f32 %v773_v44, %v4497_v13  ;;  %v4517_v61 = vsel %vm614_vm1, %v646_v38, %v582_v41  ;;  %v397_v55 = vmul.f32 6.28125, %v365_v43 }
  0xd1   :  { %v392_v42 = vmul.f32 6.28125, %v360_v34  ;;  %v456_v0 = vmul.f32 0.0019353072, %v360_v34  ;;  %v583_v48 = vsel %vm519_vm0, %v551_v33, %v487_v22  ;;  %v303_v28 = vmul.f32 0.15915494, %v4510_v47 }
  0xd2   :  { %vm615_vm2 = vcmp.lt.f32.partialorder %v583_v48, -1.5707964  ;;  %v647_v52 = vsub.f32 -3.1415927, %v583_v48  ;;  %v996_v58 = vmul.f32 %v964_v63, %v4467_v32  ;;  %v837_v59 = vadd.f32 -0.0001984127, %v805_v50 }
  0xd3   :  { %v424_v49 = vsub.f32 %v219_v10, %v392_v42  ;;  %v4522_v62 = vmul.f32 %v4517_v61, %v4517_v61  ;;  %v4526_v7 = vsub.f32 %v428_v39, %v460_v27  ;;  %v366_v10 = vfloor.f32 %v334_v51 }
  0xd4   :  { %v4524_v2 = vsel %vm615_vm2, %v647_v52, %v583_v48  ;;  %v1028_v8 = vmul.f32 %v996_v58, %v4462_v46  ;;  %v869_v45 = vmul.f32 %v837_v59, %v4497_v13  ;;  %v304_v4 = vmul.f32 0.15915494, %v4514_v18 }
  0xd5   :  { %v488_v54 = vsub.f32 %v424_v49, %v456_v0  ;;  %v4532_v32 = vmul.f32 %v4524_v2, %v4524_v2  ;;  %v742_v11 = vmul.f32 -2.5052108e-08, %v4522_v62  ;;  %v4539_v16 = vadd.f32 %v4315_v36, %v245_v3 }
  0xd6   :  { %v1060_v12 = vadd.f32 %v1028_v8, %v4462_v46  ;;  %v901_v14 = vadd.f32 0.008333333, %v869_v45  ;;  %v429_v17 = vsub.f32 %v4458_v53, %v397_v55  ;;  %v461_v57 = vmul.f32 0.0019353072, %v365_v43 }
  0xd7   :  { %v552_v9 = vsub.f32 3.1415927, %v488_v54  ;;  %v743_v15 = vmul.f32 -2.5052108e-08, %v4532_v32  ;;  %v335_v6 = vadd.f32 0.5, %v303_v28  ;;  %v336_v27 = vadd.f32 0.5, %v304_v4  ;;  %v251_v4 = vpop.f32.mrf.mxu2 }
  0xd8   :  { %v774_v20 = vadd.f32 2.7557319e-06, %v742_v11  ;;  %1138 = vmatmul.f32.gmra.mxu1 %v1060_v12  ;;  %v933_v22 = vmul.f32 %v901_v14, %v4497_v13  ;;  %v305_v1 = vmul.f32 0.15915494, %v4539_v16  ;;  %vm520_vm3 = vcmp.gt.f32.partialorder %v488_v54, 1.5707964 }
  0xd9   :  { %v775_v23 = vadd.f32 2.7557319e-06, %v743_v15  ;;  %v584_v29 = vsel %vm520_vm3, %v552_v9, %v488_v54  ;;  %vm521_vm4 = vcmp.gt.f32.partialorder %v4449_v19, 1.5707964  ;;  %v398_v30 = vmul.f32 6.28125, %v366_v10 }
  0xda   :  { %v806_v46 = vmul.f32 %v774_v20, %v4522_v62  ;;  %v965_v33 = vadd.f32 -0.16666667, %v933_v22  ;;  %vm616_vm5 = vcmp.lt.f32.partialorder %v584_v29, -1.5707964  ;;  %v556_v34 = vsub.f32 3.1415927, %v4526_v7 }
  0xdb   :  { %v807_v53 = vmul.f32 %v775_v23, %v4532_v32  ;;  %v367_v35 = vfloor.f32 %v335_v6  ;;  %v648_v39 = vsub.f32 -3.1415927, %v584_v29  ;;  %v337_v43 = vadd.f32 0.5, %v305_v1 }
  0xdc   :  { %v838_v37 = vadd.f32 -0.0001984127, %v806_v46  ;;  %v997_v41 = vmul.f32 %v965_v33, %v4497_v13  ;;  %v585_v60 = vsel %vm521_vm4, %v553_v56, %v4449_v19  ;;  %v4552_v44 = vsub.f32 %v429_v17, %v461_v57 }
  0xdd   :  { %v839_v42 = vadd.f32 -0.0001984127, %v807_v53  ;;  %v368_v48 = vfloor.f32 %v336_v27  ;;  %v4555_v49 = vsel %vm616_vm5, %v648_v39, %v584_v29  ;;  %v430_v63 = vsub.f32 %v4489_v26, %v398_v30 }
  0xde   :  { %v870_v0 = vmul.f32 %v838_v37, %v4522_v62  ;;  %v462_v50 = vmul.f32 0.0019353072, %v366_v10  ;;  %v1029_v38 = vmul.f32 %v997_v41, %v4492_v21  ;;  %v399_v51 = vmul.f32 6.28125, %v367_v35 }
  0xdf   :  { %v871_v13 = vmul.f32 %v839_v42, %v4532_v32  ;;  %v4562_v54 = vmul.f32 %v4555_v49, %v4555_v49  ;;  %vm617_vm6 = vcmp.lt.f32.partialorder %v585_v60, -1.5707964  ;;  %v369_v58 = vfloor.f32 %v337_v43  ;;  %v254_v43 = vpop.f32.mrf.mxu2 }
  0xe0   :  { %v902_v52 = vadd.f32 0.008333333, %v870_v0  ;;  %v1061_v19 = vadd.f32 %v1029_v38, %v4492_v21  ;;  %v649_v59 = vsub.f32 -3.1415927, %v585_v60  ;;  %v400_v26 = vmul.f32 6.28125, %v368_v48 }
  0xe1   :  { %v903_v56 = vadd.f32 0.008333333, %v871_v13  ;;  %v744_v28 = vmul.f32 -2.5052108e-08, %v4562_v54  ;;  %vm522_vm7 = vcmp.gt.f32.partialorder %v4474_v31, 1.5707964  ;;  %v4568_v3 = vsub.f32 %v430_v63, %v462_v50 }
  0xe2   :  { %v934_v55 = vmul.f32 %v902_v52, %v4522_v62  ;;  %1141 = vmatmul.f32.gmra.mxu1 %v1061_v19  ;;  %v4572_v45 = vadd.f32 %v4315_v36, %v248_v40  ;;  %v4574_v9 = vsel %vm617_vm6, %v649_v59, %v585_v60  ;;  %v586_v12 = vsel %vm522_vm7, %v554_v24, %v4474_v31 }
  0xe3   :  { %v935_v8 = vmul.f32 %v903_v56, %v4532_v32  ;;  %v776_v10 = vadd.f32 2.7557319e-06, %v744_v28  ;;  %v4578_v11 = vmul.f32 %v4574_v9, %v4574_v9  ;;  %v431_v14 = vsub.f32 %v4510_v47, %v399_v51 }
  0xe4   :  { %v966_v21 = vadd.f32 -0.16666667, %v934_v55  ;;  %v463_v15 = vmul.f32 0.0019353072, %v367_v35  ;;  %v401_v57 = vmul.f32 6.28125, %v369_v58  ;;  %v432_v20 = vsub.f32 %v4514_v18, %v400_v26 }
  0xe5   :  { %v967_v17 = vadd.f32 -0.16666667, %v935_v8  ;;  %v464_v22 = vmul.f32 0.0019353072, %v368_v48  ;;  %v808_v23 = vmul.f32 %v776_v10, %v4562_v54  ;;  %v465_v46 = vmul.f32 0.0019353072, %v369_v58 }
  0xe6   :  { %v998_v6 = vmul.f32 %v966_v21, %v4522_v62  ;;  %v745_v27 = vmul.f32 -2.5052108e-08, %v4578_v11  ;;  %vm618_vm8 = vcmp.lt.f32.partialorder %v586_v12, -1.5707964  ;;  %v306_v47 = vmul.f32 0.15915494, %v4572_v45 }
  0xe7   :  { %v999_v1 = vmul.f32 %v967_v17, %v4532_v32  ;;  %v840_v24 = vadd.f32 -0.0001984127, %v808_v23  ;;  %v650_v29 = vsub.f32 -3.1415927, %v586_v12  ;;  %v433_v30 = vsub.f32 %v4539_v16, %v401_v57  ;;  %v257_v17 = vpop.f32.mrf.mxu2 }
  0xe8   :  { %v1030_v31 = vmul.f32 %v998_v6, %v4517_v61  ;;  %v777_v62 = vadd.f32 2.7557319e-06, %v745_v27  ;;  %v4593_v18 = vadd.f32 %v4315_v36, %v251_v4  ;;  %vm523_vm9 = vcmp.gt.f32.partialorder %v4478_v5, 1.5707964 }
  0xe9   :  { %v557_v32 = vsub.f32 3.1415927, %v4552_v44  ;;  %v872_v53 = vmul.f32 %v840_v24, %v4562_v54  ;;  %v4599_v35 = vsel %vm618_vm8, %v650_v29, %v586_v12  ;;  %v558_v37 = vsub.f32 3.1415927, %v4568_v3 }
  0xea   :  { %v1062_v33 = vadd.f32 %v1030_v31, %v4517_v61  ;;  %v1031_v39 = vmul.f32 %v999_v1, %v4524_v2  ;;  %v809_v16 = vmul.f32 %v777_v62, %v4578_v11  ;;  %v4606_v40 = vmul.f32 %v4599_v35, %v4599_v35 }
  0xeb   :  { %v4608_v41 = vsub.f32 %v431_v14, %v463_v15  ;;  %v4610_v42 = vsub.f32 %v432_v20, %v464_v22  ;;  %v904_v61 = vadd.f32 0.008333333, %v872_v53  ;;  %v587_v60 = vsel %vm523_vm9, %v555_v25, %v4478_v5 }
  0xec   :  { %1144 = vmatmul.f32.gmra.mxu1 %v1062_v33  ;;  %v4615_v0 = vsub.f32 %v433_v30, %v465_v46  ;;  %v338_v48 = vadd.f32 0.5, %v306_v47  ;;  %v841_v63 = vadd.f32 -0.0001984127, %v809_v16  ;;  %v307_v50 = vmul.f32 0.15915494, %v4593_v18 }
  0xed   :  { %v936_v38 = vmul.f32 %v904_v61, %v4562_v54  ;;  %v746_v13 = vmul.f32 -2.5052108e-08, %v4606_v40  ;;  %vm619_vm10 = vcmp.lt.f32.partialorder %v587_v60, -1.5707964  ;;  %v651_v51 = vsub.f32 -3.1415927, %v587_v60 }
  0xee   :  { %v1063_v52 = vadd.f32 %v1031_v39, %v4524_v2  ;;  %v873_v19 = vmul.f32 %v841_v63, %v4578_v11  ;;  %v4623_v56 = vadd.f32 %v4315_v36, %v254_v43  ;;  %vm524_vm11 = vcmp.gt.f32.partialorder %v4526_v7, 1.5707964 }
  0xef   :  { %v968_v5 = vadd.f32 -0.16666667, %v936_v38  ;;  %v778_v25 = vadd.f32 2.7557319e-06, %v746_v13  ;;  %v4626_v58 = vsel %vm619_vm10, %v651_v51, %v587_v60  ;;  %v588_v59 = vsel %vm524_vm11, %v556_v34, %v4526_v7 }
  0xf0   :  { %v370_v55 = vfloor.f32 %v338_v48  ;;  %v905_v26 = vadd.f32 0.008333333, %v873_v19  ;;  %v339_v28 = vadd.f32 0.5, %v307_v50  ;;  %v4633_v2 = vmul.f32 %v4626_v58, %v4626_v58 }
  0xf1   :  { %v1000_v8 = vmul.f32 %v968_v5, %v4562_v54  ;;  %v810_v21 = vmul.f32 %v778_v25, %v4606_v40  ;;  %vm620_vm12 = vcmp.lt.f32.partialorder %v588_v59, -1.5707964  ;;  %v652_v10 = vsub.f32 -3.1415927, %v588_v59 }
  0xf2   :  { %vm526_vm13 = vcmp.gt.f32.partialorder %v4568_v3, 1.5707964  ;;  %v559_v4 = vsub.f32 3.1415927, %v4608_v41  ;;  %v560_v12 = vsub.f32 3.1415927, %v4610_v42  ;;  %v937_v7 = vmul.f32 %v905_v26, %v4578_v11 }
  0xf3   :  { %v308_v34 = vmul.f32 0.15915494, %v4623_v56  ;;  %v1032_v14 = vmul.f32 %v1000_v8, %v4555_v49  ;;  %v842_v15 = vadd.f32 -0.0001984127, %v810_v21  ;;  %v747_v54 = vmul.f32 -2.5052108e-08, %v4633_v2 }
  0xf4   :  { %1147 = vmatmul.f32.gmra.mxu1 %v1063_v52  ;;  %v4644_v57 = vsel %vm620_vm12, %v652_v10, %v588_v59  ;;  %v561_v6 = vsub.f32 3.1415927, %v4615_v0  ;;  %v969_v20 = vadd.f32 -0.16666667, %v937_v7  ;;  %v371_v22 = vfloor.f32 %v339_v28  ;;  %v2035_v52 = vld [vmem:[%s7537_s5 + $0x78] sm:$0xff] }
  0xf5   :  { %v4648_v23 = vadd.f32 %v4315_v36, %v257_v17  ;;  %v402_v1 = vmul.f32 6.28125, %v370_v55  ;;  %v874_v46 = vmul.f32 %v842_v15, %v4606_v40  ;;  %v779_v27 = vadd.f32 2.7557319e-06, %v747_v54  ;;  %2040 = vmatpush.msrb.mxu2 %v2035_v52 }
  0xf6   :  { %v4653_v31 = vmul.f32 %v4644_v57, %v4644_v57  ;;  %vm527_vm14 = vcmp.gt.f32.partialorder %v4608_v41, 1.5707964  ;;  %v1064_v24 = vadd.f32 %v1032_v14, %v4555_v49  ;;  %v340_v47 = vadd.f32 0.5, %v308_v34 }
  0xf7   :  { %v309_v29 = vmul.f32 0.15915494, %v4648_v23  ;;  %vm525_vm15 = vcmp.gt.f32.partialorder %v4552_v44, 1.5707964  ;;  %v906_v30 = vadd.f32 0.008333333, %v874_v46  ;;  %v811_v62 = vmul.f32 %v779_v27, %v4633_v2 }
  0xf8   :  { %v748_v33 = vmul.f32 -2.5052108e-08, %v4653_v31  ;;  %v589_v53 = vsel %vm525_vm15, %v557_v32, %v4552_v44  ;;  %v1001_v39 = vmul.f32 %v969_v20, %v4578_v11  ;;  %v403_v16 = vmul.f32 6.28125, %v371_v22  ;;  %v260_v32 = vpop.f32.mrf.mxu2 }
  0xf9   :  { %v341_v61 = vadd.f32 0.5, %v309_v29  ;;  %vm621_vm0 = vcmp.lt.f32.partialorder %v589_v53, -1.5707964  ;;  %v938_v49 = vmul.f32 %v906_v30, %v4606_v40  ;;  %v843_v43 = vadd.f32 -0.0001984127, %v811_v62 }
  0xfa   :  { %v780_v60 = vadd.f32 2.7557319e-06, %v748_v33  ;;  %v653_v48 = vsub.f32 -3.1415927, %v589_v53  ;;  %v434_v63 = vsub.f32 %v4572_v45, %v402_v1  ;;  %v466_v50 = vmul.f32 0.0019353072, %v370_v55 }
  0xfb   :  { %v372_v38 = vfloor.f32 %v340_v47  ;;  %v373_v13 = vfloor.f32 %v341_v61  ;;  %vm528_vm1 = vcmp.gt.f32.partialorder %v4610_v42, 1.5707964  ;;  %v970_v51 = vadd.f32 -0.16666667, %v938_v49  ;;  %v2034_v45 = vld [vmem:[%s7537_s5 + $0x70] sm:$0xff]  ;;  %v2033_v33 = vld [vmem:[%s7537_s5 + $0x68] sm:$0xff] }
  0xfc   :  { %1150 = vmatmul.f32.gmra.mxu1 %v1064_v24  ;;  %v875_v44 = vmul.f32 %v843_v43, %v4633_v2  ;;  %v812_v11 = vmul.f32 %v780_v60, %v4653_v31  ;;  %v4677_v19 = vsel %vm621_vm0, %v653_v48, %v589_v53  ;;  %v435_v5 = vsub.f32 %v4593_v18, %v403_v16  ;;  %v4730_v53 = vld [vmem:[%s7534_s2] ss:$0 sm:$0xff] }
  0xfd   :  { %v467_v25 = vmul.f32 0.0019353072, %v371_v22  ;;  %v4681_v59 = vadd.f32 %v4315_v36, %v260_v32  ;;  %v4685_v55 = vmul.f32 %v4677_v19, %v4677_v19  ;;  %v1033_v26 = vmul.f32 %v1001_v39, %v4574_v9  ;;  %2041 = vmatpush.msrb.mxu2 %v2034_v45 }
  0xfe   :  { %v907_v28 = vadd.f32 0.008333333, %v875_v44  ;;  %v844_v8 = vadd.f32 -0.0001984127, %v812_v11  ;;  %v590_v21 = vsel %vm526_vm13, %v558_v37, %v4568_v3  ;;  %v404_v18 = vmul.f32 6.28125, %v372_v38 }
  0xff   :  { %v405_v10 = vmul.f32 6.28125, %v373_v13  ;;  %v749_v36 = vmul.f32 -2.5052108e-08, %v4685_v55  ;;  %vm622_vm2 = vcmp.lt.f32.partialorder %v590_v21, -1.5707964  ;;  %v1002_v7 = vmul.f32 %v970_v51, %v4606_v40  ;;  %2042 = vmatpush.msrb.mxu2 %v2033_v33 }
 0x100   :  { %v939_v34 = vmul.f32 %v907_v28, %v4633_v2  ;;  %v310_v14 = vmul.f32 0.15915494, %v4681_v59  ;;  %v654_v15 = vsub.f32 -3.1415927, %v590_v21  ;;  %vm529_vm3 = vcmp.gt.f32.partialorder %v4615_v0, 1.5707964  ;;  %v263_v62 = vpop.f32.mrf.mxu2 }
 0x101   :  { %v4698_v54 = vsub.f32 %v434_v63, %v466_v50  ;;  %v4700_v17 = vsub.f32 %v435_v5, %v467_v25  ;;  %v876_v3 = vmul.f32 %v844_v8, %v4653_v31  ;;  %v781_v37 = vadd.f32 2.7557319e-06, %v749_v36  ;;  %v2031_v8 = vld [vmem:[%s7537_s5 + $0x58] sm:$0xff] }
 0x102   :  { %v1065_v20 = vadd.f32 %v1033_v26, %v4574_v9  ;;  %v468_v22 = vmul.f32 0.0019353072, %v372_v38  ;;  %v4704_v1 = vsel %vm622_vm2, %v654_v15, %v590_v21  ;;  %v591_v40 = vsel %vm527_vm14, %v559_v4, %v4608_v41  ;;  %v2032_v41 = vld [vmem:[%s7537_s5 + $0x60] sm:$0xff] }
 0x103   :  { %v436_v46 = vsub.f32 %v4623_v56, %v404_v18  ;;  %v437_v27 = vsub.f32 %v4648_v23, %v405_v10  ;;  %v469_v24 = vmul.f32 0.0019353072, %v373_v13  ;;  %v813_v47 = vmul.f32 %v781_v37, %v4685_v55  ;;  %2043 = vmatpush.msrb.mxu2 %v2032_v41 }
 0x104   :  { %1153 = vmatmul.f32.gmra.mxu1 %v1065_v20  ;;  %v1034_v29 = vmul.f32 %v1002_v7, %v4599_v35  ;;  %v971_v9 = vadd.f32 -0.16666667, %v939_v34  ;;  %v4715_v30 = vadd.f32 0.5, %v310_v14  ;;  %v4725_v56 = vmul.f32 %v4704_v1, %v4704_v1 }
 0x105   :  { %v908_v4 = vadd.f32 0.008333333, %v876_v3  ;;  %v845_v23 = vadd.f32 -0.0001984127, %v813_v47  ;;  %v4733_v39 = vadd.f32 %v4730_v53, %v263_v62  ;;  %vm623_vm4 = vcmp.lt.f32.partialorder %v591_v40, -1.5707964  ;;  %2044 = vmatpush.msrb.mxu2 %v2031_v8 }
 0x106   :  { %v562_v16 = vsub.f32 3.1415927, %v4698_v54  ;;  %v750_v61 = vmul.f32 -2.5052108e-08, %v4725_v56  ;;  %v655_v49 = vsub.f32 -3.1415927, %v591_v40  ;;  %v4738_v43 = vsub.f32 %v436_v46, %v468_v22 }
 0x107   :  { %vm530_vm5 = vcmp.gt.f32.partialorder %v4698_v54, 1.5707964  ;;  %v877_v60 = vmul.f32 %v845_v23, %v4685_v55  ;;  %v311_v48 = vmul.f32 0.15915494, %v4733_v39  ;;  %v592_v63 = vsel %vm528_vm1, %v560_v12, %v4610_v42 }
 0x108   :  { %v563_v50 = vsub.f32 3.1415927, %v4700_v17  ;;  %v4748_v38 = vsub.f32 %v437_v27, %v469_v24  ;;  %v782_v13 = vadd.f32 2.7557319e-06, %v750_v61  ;;  %v4750_v51 = vsel %vm623_vm4, %v655_v49, %v591_v40  ;;  %v266_v28 = vpop.f32.mrf.mxu2 }
 0x109   :  { %v1066_v44 = vadd.f32 %v1034_v29, %v4599_v35  ;;  %v1003_v11 = vmul.f32 %v971_v9, %v4633_v2  ;;  %v940_v32 = vmul.f32 %v908_v4, %v4653_v31  ;;  %v374_v52 = vfloor.f32 %v4715_v30 }
 0x10a   :  { %v814_v45 = vmul.f32 %v782_v13, %v4725_v56  ;;  %v4759_v42 = vmul.f32 %v4750_v51, %v4750_v51  ;;  %vm624_vm6 = vcmp.lt.f32.partialorder %v592_v63, -1.5707964  ;;  %v656_v12 = vsub.f32 -3.1415927, %v592_v63 }
 0x10b   :  { %vm531_vm7 = vcmp.gt.f32.partialorder %v4700_v17, 1.5707964  ;;  %v564_v5 = vsub.f32 3.1415927, %v4738_v43  ;;  %v909_v25 = vadd.f32 0.008333333, %v877_v60  ;;  %v593_v18 = vsel %vm529_vm3, %v561_v6, %v4615_v0 }
 0x10c   :  { %v343_v35 = vadd.f32 0.5, %v311_v48  ;;  %1156 = vmatmul.f32.gmra.mxu1 %v1066_v44  ;;  %v565_v2 = vsub.f32 3.1415927, %v4748_v38  ;;  %v846_v26 = vadd.f32 -0.0001984127, %v814_v45  ;;  %v4767_v21 = vsel %vm624_vm6, %v656_v12, %v592_v63  ;;  %v2029_v12 = vld [vmem:[%s7537_s5 + $0x48] sm:$0xff] }
 0x10d   :  { %v1035_v10 = vmul.f32 %v1003_v11, %v4626_v58  ;;  %v972_v36 = vadd.f32 -0.16666667, %v940_v32  ;;  %v406_v7 = vmul.f32 6.28125, %v374_v52  ;;  %v4776_v34 = vadd.f32 %v4730_v53, %v266_v28 }
 0x10e   :  { %v878_v14 = vmul.f32 %v846_v26, %v4725_v56  ;;  %v751_v15 = vmul.f32 -2.5052108e-08, %v4759_v42  ;;  %v4782_v3 = vmul.f32 %v4767_v21, %v4767_v21  ;;  %vm625_vm8 = vcmp.lt.f32.partialorder %v593_v18, -1.5707964 }
 0x10f   :  { %v941_v37 = vmul.f32 %v909_v25, %v4685_v55  ;;  %v375_v0 = vfloor.f32 %v343_v35  ;;  %v312_v6 = vmul.f32 0.15915494, %v4776_v34  ;;  %v657_v20 = vsub.f32 -3.1415927, %v593_v18 }
 0x110   :  { %v910_v22 = vadd.f32 0.008333333, %v878_v14  ;;  %v783_v40 = vadd.f32 2.7557319e-06, %v751_v15  ;;  %v752_v46 = vmul.f32 -2.5052108e-08, %v4782_v3  ;;  %v1067_v27 = vadd.f32 %v1035_v10, %v4626_v58  ;;  %v269_v45 = vpop.f32.mrf.mxu2 }
 0x111   :  { %v1004_v24 = vmul.f32 %v972_v36, %v4653_v31  ;;  %v344_v47 = vadd.f32 0.5, %v312_v6  ;;  %v4789_v29 = vsel %vm625_vm8, %v657_v20, %v593_v18  ;;  %v594_v33 = vsel %vm530_vm5, %v562_v16, %v4698_v54 }
 0x112   :  { %v815_v9 = vmul.f32 %v783_v40, %v4759_v42  ;;  %v784_v30 = vadd.f32 2.7557319e-06, %v752_v46  ;;  %v4794_v62 = vmul.f32 %v4789_v29, %v4789_v29  ;;  %vm532_vm9 = vcmp.gt.f32.partialorder %v4738_v43, 1.5707964 }
 0x113   :  { %v470_v41 = vmul.f32 0.0019353072, %v374_v52  ;;  %v973_v58 = vadd.f32 -0.16666667, %v941_v37  ;;  %v407_v4 = vmul.f32 6.28125, %v375_v0  ;;  %v942_v31 = vmul.f32 %v910_v22, %v4725_v56 }
 0x114   :  { %1159 = vmatmul.f32.gmra.mxu1 %v1067_v27  ;;  %v847_v23 = vadd.f32 -0.0001984127, %v815_v9  ;;  %v816_v61 = vmul.f32 %v784_v30, %v4782_v3  ;;  %v753_v49 = vmul.f32 -2.5052108e-08, %v4794_v62  ;;  %v1036_v60 = vmul.f32 %v1004_v24, %v4644_v57 }
 0x115   :  { %v438_v48 = vsub.f32 %v4681_v59, %v406_v7  ;;  %v376_v63 = vfloor.f32 %v344_v47  ;;  %vm626_vm10 = vcmp.lt.f32.partialorder %v594_v33, -1.5707964  ;;  %v595_v44 = vsel %vm531_vm7, %v563_v50, %v4700_v17  ;;  %v2030_v59 = vld [vmem:[%s7537_s5 + $0x50] sm:$0xff] }
 0x116   :  { %v879_v54 = vmul.f32 %v847_v23, %v4759_v42  ;;  %v848_v16 = vadd.f32 -0.0001984127, %v816_v61  ;;  %v785_v13 = vadd.f32 2.7557319e-06, %v753_v49  ;;  %vm533_vm11 = vcmp.gt.f32.partialorder %v4748_v38, 1.5707964  ;;  %2045 = vmatpush.msrb.mxu2 %v2030_v59 }
 0x117   :  { %v1005_v11 = vmul.f32 %v973_v58, %v4685_v55  ;;  %v439_v32 = vsub.f32 %v4733_v39, %v407_v4  ;;  %v471_v52 = vmul.f32 0.0019353072, %v375_v0  ;;  %v658_v25 = vsub.f32 -3.1415927, %v594_v33 }
 0x118   :  { %v974_v35 = vadd.f32 -0.16666667, %v942_v31  ;;  %v911_v17 = vadd.f32 0.008333333, %v879_v54  ;;  %v4821_v50 = vadd.f32 %v4730_v53, %v269_v45  ;;  %v880_v55 = vmul.f32 %v848_v16, %v4782_v3  ;;  %2046 = vmatpush.msrb.mxu2 %v2029_v12 }
 0x119   :  { %v817_v39 = vmul.f32 %v785_v13, %v4794_v62  ;;  %v4826_v26 = vsel %vm626_vm10, %v658_v25, %v594_v33  ;;  %vm627_vm12 = vcmp.lt.f32.partialorder %v595_v44, -1.5707964  ;;  %v659_v28 = vsub.f32 -3.1415927, %v595_v44 }
 0x11a   :  { %v1068_v8 = vadd.f32 %v1036_v60, %v4644_v57  ;;  %v408_v18 = vmul.f32 6.28125, %v376_v63  ;;  %v943_v10 = vmul.f32 %v911_v17, %v4759_v42  ;;  %v313_v36 = vmul.f32 0.15915494, %v4821_v50 }
 0x11b   :  { %v4831_v7 = vsub.f32 %v438_v48, %v470_v41  ;;  %v912_v14 = vadd.f32 0.008333333, %v880_v55  ;;  %v849_v15 = vadd.f32 -0.0001984127, %v817_v39  ;;  %v4835_v37 = vmul.f32 %v4826_v26, %v4826_v26 }
 0x11c   :  { %1162 = vmatmul.f32.gmra.mxu1 %v1068_v8  ;;  %v1037_v0 = vmul.f32 %v1005_v11, %v4677_v19  ;;  %v1006_v6 = vmul.f32 %v974_v35, %v4725_v56  ;;  %v975_v57 = vadd.f32 -0.16666667, %v943_v10  ;;  %v4839_v20 = vsel %vm627_vm12, %v659_v28, %v595_v44 }
 0x11d   :  { %v4841_v22 = vsub.f32 %v439_v32, %v471_v52  ;;  %v881_v40 = vmul.f32 %v849_v15, %v4794_v62  ;;  %v754_v46 = vmul.f32 -2.5052108e-08, %v4835_v37  ;;  %v4847_v27 = vmul.f32 %v4839_v20, %v4839_v20  ;;  %v4885_v52 = vld [vmem:[%s7536_s4] ss:$0 sm:$0xff] }
 0x11e   :  { %v440_v24 = vsub.f32 %v4776_v34, %v408_v18  ;;  %v472_v47 = vmul.f32 0.0019353072, %v376_v63  ;;  %v345_v9 = vadd.f32 0.5, %v313_v36  ;;  %v596_v56 = vsel %vm532_vm9, %v564_v5, %v4738_v43  ;;  %v2028_v63 = vld [vmem:[%s7537_s5 + $0x40] sm:$0xff] }
 0x11f   :  { %v566_v30 = vsub.f32 3.1415927, %v4831_v7  ;;  %v944_v33 = vmul.f32 %v912_v14, %v4782_v3  ;;  %v786_v41 = vadd.f32 2.7557319e-06, %v754_v46  ;;  %v755_v58 = vmul.f32 -2.5052108e-08, %v4847_v27  ;;  %2047 = vmatpush.msrb.mxu2 %v2028_v63 }
 0x120   :  { %vm534_vm13 = vcmp.gt.f32.partialorder %v4831_v7, 1.5707964  ;;  %v1069_v4 = vadd.f32 %v1037_v0, %v4677_v19  ;;  %v1038_v34 = vmul.f32 %v1006_v6, %v4704_v1  ;;  %v1007_v31 = vmul.f32 %v975_v57, %v4759_v42  ;;  %v272_v19 = vpop.f32.mrf.mxu3  ;;  %v2027_v42 = vld [vmem:[%s7537_s5 + $0x38] sm:$0xff] }
 0x121   :  { %v913_v23 = vadd.f32 0.008333333, %v881_v40  ;;  %v818_v61 = vmul.f32 %v786_v41, %v4835_v37  ;;  %v787_v49 = vadd.f32 2.7557319e-06, %v755_v58  ;;  %vm628_vm14 = vcmp.lt.f32.partialorder %v596_v56, -1.5707964  ;;  %2048 = vmatpush.msrb.mxu2 %v2027_v42 }
 0x122   :  { %v660_v43 = vsub.f32 -3.1415927, %v596_v56  ;;  %v567_v5 = vsub.f32 3.1415927, %v4841_v22  ;;  %v4864_v60 = vsub.f32 %v440_v24, %v472_v47  ;;  %v377_v48 = vfloor.f32 %v345_v9  ;;  %v2026_v24 = vld [vmem:[%s7537_s5 + $0x30] sm:$0xff] }
 0x123   :  { %v597_v54 = vsel %vm533_vm11, %v565_v2, %v4748_v38  ;;  %v976_v16 = vadd.f32 -0.16666667, %v944_v33  ;;  %v4878_v13 = vadd.f32 %v4730_v53, %v272_v19  ;;  %v850_v44 = vadd.f32 -0.0001984127, %v818_v61  ;;  %2049 = vmatpush.msrb.mxu2 %v2026_v24 }
 0x124   :  { %v819_v11 = vmul.f32 %v787_v49, %v4847_v27  ;;  %1165 = vmatmul.f32.gmra.mxu1 %v1069_v4  ;;  %v1070_v32 = vadd.f32 %v1038_v34, %v4704_v1  ;;  %v1039_v59 = vmul.f32 %v1007_v31, %v4750_v51  ;;  %v945_v38 = vmul.f32 %v913_v23, %v4794_v62 }
 0x125   :  { %v4890_v2 = vsel %vm628_vm14, %v660_v43, %v596_v56  ;;  %v314_v45 = vmul.f32 0.15915494, %v4878_v13  ;;  %v882_v12 = vmul.f32 %v850_v44, %v4835_v37  ;;  %vm629_vm15 = vcmp.lt.f32.partialorder %v597_v54, -1.5707964 }
 0x126   :  { %v851_v25 = vadd.f32 -0.0001984127, %v819_v11  ;;  %v568_v1 = vsub.f32 3.1415927, %v4864_v60  ;;  %v409_v35 = vmul.f32 6.28125, %v377_v48  ;;  %v4897_v17 = vmul.f32 %v4890_v2, %v4890_v2 }
 0x127   :  { %v661_v55 = vsub.f32 -3.1415927, %v597_v54  ;;  %v1008_v39 = vmul.f32 %v976_v16, %v4782_v3  ;;  %v346_v28 = vadd.f32 0.5, %v314_v45  ;;  %v914_v8 = vadd.f32 0.008333333, %v882_v12 }
 0x128   :  { %v883_v18 = vmul.f32 %v851_v25, %v4847_v27  ;;  %v1071_v36 = vadd.f32 %v1039_v59, %v4750_v51  ;;  %v473_v14 = vmul.f32 0.0019353072, %v377_v48  ;;  %v756_v15 = vmul.f32 -2.5052108e-08, %v4897_v17  ;;  %v275_v47 = vpop.f32.mrf.mxu3  ;;  %v2025_v51 = vld [vmem:[%s7537_s5 + $0x28] sm:$0xff] }
 0x129   :  { %v4903_v0 = vsel %vm629_vm15, %v661_v55, %v597_v54  ;;  %v378_v57 = vfloor.f32 %v346_v28  ;;  %v977_v40 = vadd.f32 -0.16666667, %v945_v38  ;;  %v946_v46 = vmul.f32 %v914_v8, %v4835_v37  ;;  %2050 = vmatpush.msrb.mxu2 %v2025_v51 }
 0x12a   :  { %v1124_v10 = vpop.f32.mrf.mxu1  ;;  %v441_v3 = vsub.f32 %v4821_v50, %v409_v35  ;;  %v915_v9 = vadd.f32 0.008333333, %v883_v18  ;;  %v788_v56 = vadd.f32 2.7557319e-06, %v756_v15  ;;  %v4916_v33 = vmul.f32 %v4903_v0, %v4903_v0 }
 0x12b   :  { %v1125_v6 = vadd.f32 %v4885_v52, %v1124_v10  ;;  %v1040_v58 = vmul.f32 %v1008_v39, %v4767_v21  ;;  %v276_v50 = vadd.f32 %v4730_v53, %v275_v47  ;;  %v598_v4 = vsel %vm534_vm13, %v566_v30, %v4831_v7 }
 0x12c   :  { %1168 = vmatmul.f32.gmra.mxu1 %v1070_v32  ;;  %v410_v34 = vmul.f32 6.28125, %v378_v57  ;;  %v947_v31 = vmul.f32 %v915_v9, %v4847_v27  ;;  %v820_v23 = vmul.f32 %v788_v56, %v4897_v17  ;;  %v757_v61 = vmul.f32 -2.5052108e-08, %v4916_v33 }
 0x12d   :  { %v1220_v41 = vmul.f32 0.15915494, %v1125_v6  ;;  %v1009_v43 = vmul.f32 %v977_v40, %v4794_v62  ;;  %v315_v48 = vmul.f32 0.15915494, %v276_v50  ;;  %v978_v63 = vadd.f32 -0.16666667, %v946_v46 }
 0x12e   :  { %v4929_v19 = vsub.f32 %v441_v3, %v473_v14  ;;  %v979_v42 = vadd.f32 -0.16666667, %v947_v31  ;;  %v852_v54 = vadd.f32 -0.0001984127, %v820_v23  ;;  %v789_v16 = vadd.f32 2.7557319e-06, %v757_v61 }
 0x12f   :  { %v1252_v49 = vadd.f32 0.5, %v1220_v41  ;;  %v474_v30 = vmul.f32 0.0019353072, %v378_v57  ;;  %v347_v44 = vadd.f32 0.5, %v315_v48  ;;  %v662_v11 = vsub.f32 -3.1415927, %v598_v4 }
 0x130   :  { %vm535_vm0 = vcmp.gt.f32.partialorder %v4841_v22, 1.5707964  ;;  %v442_v32 = vsub.f32 %v4878_v13, %v410_v34  ;;  %v884_v59 = vmul.f32 %v852_v54, %v4897_v17  ;;  %v821_v62 = vmul.f32 %v789_v16, %v4916_v33  ;;  %v2024_v14 = vld [vmem:[%s7537_s5 + $0x20] sm:$0xff]  ;;  %v278_v15 = vpop.f32.mrf.mxu3 }
 0x131   :  { %v1284_v7 = vfloor.f32 %v1252_v49  ;;  %vm630_vm1 = vcmp.lt.f32.partialorder %v598_v4, -1.5707964  ;;  %v1072_v45 = vadd.f32 %v1040_v58, %v4767_v21  ;;  %v1041_v12 = vmul.f32 %v1009_v43, %v4789_v29  ;;  %v2023_v21 = vld [vmem:[%s7537_s5 + $0x18] sm:$0xff]  ;;  %2051 = vmatpush.msrb.mxu2 %v2024_v14 }
 0x132   :  { %v379_v25 = vfloor.f32 %v347_v44  ;;  %v1010_v55 = vmul.f32 %v978_v63, %v4835_v37  ;;  %v1011_v39 = vmul.f32 %v979_v42, %v4847_v27  ;;  %v916_v28 = vadd.f32 0.008333333, %v884_v59  ;;  %v2022_v44 = vld [vmem:[%s7537_s5 + $0x10] sm:$0xff] }
 0x133   :  { %v1316_v38 = vmul.f32 6.28125, %v1284_v7  ;;  %v1380_v35 = vmul.f32 0.0019353072, %v1284_v7  ;;  %v4946_v57 = vsel %vm630_vm1, %v662_v11, %v598_v4  ;;  %v4949_v27 = vsub.f32 %v442_v32, %v474_v30  ;;  %2052 = vmatpush.msrb.mxu2 %v2023_v21 }
 0x134   :  { %v411_v13 = vmul.f32 6.28125, %v379_v25  ;;  %v475_v10 = vmul.f32 0.0019353072, %v379_v25  ;;  %1171 = vmatmul.f32.gmra.mxu1 %v1071_v36  ;;  %v853_v40 = vadd.f32 -0.0001984127, %v821_v62  ;;  %v948_v24 = vmul.f32 %v916_v28, %v4897_v17 }
 0x135   :  { %v1348_v8 = vsub.f32 %v1125_v6, %v1316_v38  ;;  %v1127_v18 = vpop.f32.mrf.mxu1  ;;  %v4952_v6 = vadd.f32 %v4730_v53, %v278_v15  ;;  %v4957_v47 = vmul.f32 %v4946_v57, %v4946_v57  ;;  %v1042_v36 = vmul.f32 %v1010_v55, %v4826_v26  ;;  %2053 = vmatpush.msrb.mxu2 %v2022_v44 }
 0x136   :  { %v1128_v37 = vadd.f32 %v4885_v52, %v1127_v18  ;;  %v443_v3 = vsub.f32 %v276_v50, %v411_v13  ;;  %v885_v56 = vmul.f32 %v853_v40, %v4916_v33  ;;  %vm536_vm2 = vcmp.gt.f32.partialorder %v4864_v60, 1.5707964 }
 0x137   :  { %v1412_v46 = vsub.f32 %v1348_v8, %v1380_v35  ;;  %v316_v9 = vmul.f32 0.15915494, %v4952_v6  ;;  %v569_v41 = vsub.f32 3.1415927, %v4929_v19  ;;  %v1043_v50 = vmul.f32 %v1011_v39, %v4839_v20 }
 0x138   :  { %v1221_v51 = vmul.f32 0.15915494, %v1128_v37  ;;  %v4964_v58 = vsub.f32 %v443_v3, %v475_v10  ;;  %v980_v4 = vadd.f32 -0.16666667, %v948_v24  ;;  %v917_v23 = vadd.f32 0.008333333, %v885_v56  ;;  %v281_v32 = vpop.f32.mrf.mxu3 }
 0x139   :  { %v348_v31 = vadd.f32 0.5, %v316_v9  ;;  %v758_v61 = vmul.f32 -2.5052108e-08, %v4957_v47  ;;  %v1476_v49 = vsub.f32 3.1415927, %v1412_v46  ;;  %v1073_v48 = vadd.f32 %v1041_v12, %v4789_v29  ;;  %v2021_v29 = vld [vmem:[%s7537_s5 + $0x8] sm:$0xff] }
 0x13a   :  { %v1253_v34 = vadd.f32 0.5, %v1221_v51  ;;  %v570_v43 = vsub.f32 3.1415927, %v4949_v27  ;;  %v1012_v63 = vmul.f32 %v980_v4, %v4897_v17  ;;  %vm1444_vm3 = vcmp.gt.f32.partialorder %v1412_v46, 1.5707964  ;;  %2054 = vmatpush.msrb.mxu2 %v2021_v29 }
 0x13b   :  { %v4972_v54 = vadd.f32 %v1042_v36, %v4826_v26  ;;  %v380_v16 = vfloor.f32 %v348_v31  ;;  %v571_v30 = vsub.f32 3.1415927, %v4964_v58  ;;  %v4979_v11 = vadd.f32 %v1043_v50, %v4839_v20 }
 0x13c   :  { %v1285_v42 = vfloor.f32 %v1253_v34  ;;  %v790_v17 = vadd.f32 2.7557319e-06, %v758_v61  ;;  %v599_v26 = vsel %vm535_vm0, %v567_v5, %v4841_v22  ;;  %1174 = vmatmul.f32.gmra.mxu1 %v1072_v45  ;;  %v949_v20 = vmul.f32 %v917_v23, %v4916_v33  ;;  %v2020_v23 = vld [vmem:[%s7537_s5] sm:$0xff] }
 0x13d   :  { %v1130_v7 = vpop.f32.mrf.mxu1  ;;  %v412_v38 = vmul.f32 6.28125, %v380_v16  ;;  %v4992_v25 = vadd.f32 %v4730_v53, %v281_v32  ;;  %v1044_v35 = vmul.f32 %v1012_v63, %v4890_v2  ;;  %v1508_v55 = vsel %vm1444_vm3, %v1476_v49, %v1412_v46  ;;  %2055 = vmatpush.msrb.mxu2 %v2020_v23 }
 0x13e   :  { %v1317_v59 = vmul.f32 6.28125, %v1285_v42  ;;  %v1131_v62 = vadd.f32 %v4885_v52, %v1130_v7  ;;  %v1381_v12 = vmul.f32 0.0019353072, %v1285_v42  ;;  %v476_v8 = vmul.f32 0.0019353072, %v380_v16 }
 0x13f   :  { %vm1540_vm4 = vcmp.lt.f32.partialorder %v1508_v55, -1.5707964  ;;  %v444_v22 = vsub.f32 %v4952_v6, %v412_v38  ;;  %v317_v5 = vmul.f32 0.15915494, %v4992_v25  ;;  %v1572_v45 = vsub.f32 -3.1415927, %v1508_v55 }
 0x140   :  { %v1349_v39 = vsub.f32 %v1128_v37, %v1317_v59  ;;  %v1222_v28 = vmul.f32 0.15915494, %v1131_v62  ;;  %v822_v18 = vmul.f32 %v790_v17, %v4957_v47  ;;  %v981_v14 = vadd.f32 -0.16666667, %v949_v20  ;;  %v284_v61 = vpop.f32.mrf.mxu3 }
 0x141   :  { %v663_v15 = vsub.f32 -3.1415927, %v599_v26  ;;  %v349_v21 = vadd.f32 0.5, %v317_v5  ;;  %v4999_v40 = vsel %vm1540_vm4, %v1572_v45, %v1508_v55  ;;  %vm631_vm5 = vcmp.lt.f32.partialorder %v599_v26, -1.5707964 }
 0x142   :  { %v1413_v13 = vsub.f32 %v1349_v39, %v1381_v12  ;;  %v1254_v10 = vadd.f32 0.5, %v1222_v28  ;;  %v854_v46 = vadd.f32 -0.0001984127, %v822_v18  ;;  %v5002_v24 = vadd.f32 %v1044_v35, %v4890_v2 }
 0x143   :  { %v5009_v6 = vsel %vm536_vm2, %v568_v1, %v4864_v60  ;;  %v5011_v51 = vsub.f32 %v444_v22, %v476_v8  ;;  %v381_v36 = vfloor.f32 %v349_v21  ;;  %v5015_v9 = vmul.f32 %v4999_v40, %v4999_v40 }
 0x144   :  { %v1477_v37 = vsub.f32 3.1415927, %v1413_v13  ;;  %v1286_v3 = vfloor.f32 %v1254_v10  ;;  %vm1445_vm6 = vcmp.gt.f32.partialorder %v1413_v13, 1.5707964  ;;  %1177 = vmatmul.f32.gmra.mxu1 %v1073_v48  ;;  %v1013_v2 = vmul.f32 %v981_v14, %v4916_v33 }
 0x145   :  { %v1133_v50 = vpop.f32.mrf.mxu1  ;;  %v886_v4 = vmul.f32 %v854_v46, %v4957_v47  ;;  %v5019_v34 = vsel %vm631_vm5, %v663_v15, %v599_v26  ;;  %v413_v1 = vmul.f32 6.28125, %v381_v36  ;;  %v1668_v49 = vmul.f32 -2.5052108e-08, %v5015_v9 }
 0x146   :  { %v1318_v56 = vmul.f32 6.28125, %v1286_v3  ;;  %v1382_v31 = vmul.f32 0.0019353072, %v1286_v3  ;;  %v1134_v60 = vadd.f32 %v4885_v52, %v1133_v50  ;;  %v477_v48 = vmul.f32 0.0019353072, %v381_v36 }
 0x147   :  { %v285_v33 = vadd.f32 %v4730_v53, %v284_v61  ;;  %v1509_v42 = vsel %vm1445_vm6, %v1477_v37, %v1413_v13  ;;  %v445_v7 = vsub.f32 %v4992_v25, %v413_v1  ;;  %v1700_v44 = vadd.f32 2.7557319e-06, %v1668_v49 }
 0x148   :  { %v1350_v63 = vsub.f32 %v1131_v62, %v1318_v56  ;;  %v1223_v16 = vmul.f32 0.15915494, %v1134_v60  ;;  %vm1541_vm7 = vcmp.lt.f32.partialorder %v1509_v42, -1.5707964  ;;  %v1573_v17 = vsub.f32 -3.1415927, %v1509_v42 }
 0x149   :  { %v318_v29 = vmul.f32 0.15915494, %v285_v33  ;;  %v918_v26 = vadd.f32 0.008333333, %v886_v4  ;;  %v572_v38 = vsub.f32 3.1415927, %v5011_v51  ;;  %v1732_v62 = vmul.f32 %v1700_v44, %v5015_v9 }
 0x14a   :  { %v1414_v32 = vsub.f32 %v1350_v63, %v1382_v31  ;;  %v1255_v59 = vadd.f32 0.5, %v1223_v16  ;;  %v5033_v20 = vmul.f32 %v5019_v34, %v5019_v34  ;;  %v1045_v12 = vmul.f32 %v1013_v2, %v4903_v0 }
 0x14b   :  { %v350_v53 = vadd.f32 0.5, %v318_v29  ;;  %v5036_v35 = vsel %vm1541_vm7, %v1573_v17, %v1509_v42  ;;  %v950_v25 = vmul.f32 %v918_v26, %v4957_v47  ;;  %v5039_v28 = vsub.f32 %v445_v7, %v477_v48 }
 0x14c   :  { %v1478_v55 = vsub.f32 3.1415927, %v1414_v32  ;;  %v1287_v39 = vfloor.f32 %v1255_v59  ;;  %v1764_v8 = vadd.f32 -0.0001984127, %v1732_v62  ;;  %1180 = vmatmul.f32.gmra.mxu1 %v4972_v54  ;;  %v5044_v45 = vmul.f32 %v5036_v35, %v5036_v35 }
 0x14d   :  { %v1136_v22 = vpop.f32.mrf.mxu1  ;;  %v382_v5 = vfloor.f32 %v350_v53  ;;  %v982_v18 = vadd.f32 -0.16666667, %v950_v25  ;;  %vm1446_vm8 = vcmp.gt.f32.partialorder %v1414_v32, 1.5707964  ;;  %v759_v15 = vmul.f32 -2.5052108e-08, %v5033_v20 }
 0x14e   :  { %v1319_v13 = vmul.f32 6.28125, %v1287_v39  ;;  %v1137_v10 = vadd.f32 %v4885_v52, %v1136_v22  ;;  %v1796_v14 = vmul.f32 %v1764_v8, %v5015_v9  ;;  %v1383_v21 = vmul.f32 0.0019353072, %v1287_v39 }
 0x14f   :  { %v414_v46 = vmul.f32 6.28125, %v382_v5  ;;  %v1669_v37 = vmul.f32 -2.5052108e-08, %v5044_v45  ;;  %v1014_v54 = vmul.f32 %v982_v18, %v4957_v47  ;;  %v1510_v50 = vsel %vm1446_vm8, %v1478_v55, %v1414_v32 }
 0x150   :  { %v1351_v3 = vsub.f32 %v1134_v60, %v1319_v13  ;;  %v1224_v36 = vmul.f32 0.15915494, %v1137_v10  ;;  %v1828_v56 = vadd.f32 0.008333333, %v1796_v14  ;;  %v478_v4 = vmul.f32 0.0019353072, %v382_v5 }
 0x151   :  { %v446_v2 = vsub.f32 %v285_v33, %v414_v46  ;;  %v1701_v31 = vadd.f32 2.7557319e-06, %v1669_v37  ;;  %vm1542_vm9 = vcmp.lt.f32.partialorder %v1510_v50, -1.5707964  ;;  %v1574_v49 = vsub.f32 -3.1415927, %v1510_v50 }
 0x152   :  { %v1415_v1 = vsub.f32 %v1351_v3, %v1383_v21  ;;  %v1256_v23 = vadd.f32 0.5, %v1224_v36  ;;  %v1860_v61 = vmul.f32 %v1828_v56, %v5015_v9  ;;  %v573_v63 = vsub.f32 3.1415927, %v5039_v28 }
 0x153   :  { %v5054_v48 = vadd.f32 %v1045_v12, %v4903_v0  ;;  %v1733_v47 = vmul.f32 %v1701_v31, %v5044_v45  ;;  %v791_v60 = vadd.f32 2.7557319e-06, %v759_v15  ;;  %v5058_v33 = vmul.f32 %v1014_v54, %v4946_v57 }
 0x154   :  { %v1288_v42 = vfloor.f32 %v1256_v23  ;;  %v1892_v16 = vadd.f32 -0.16666667, %v1860_v61  ;;  %v5060_v7 = vsel %vm1542_vm9, %v1574_v49, %v1510_v50  ;;  %vm537_vm10 = vcmp.gt.f32.partialorder %v4929_v19, 1.5707964  ;;  %1183 = vmatmul.f32.gmra.mxu1 %v4979_v11 }
 0x155   :  { %v1479_v44 = vsub.f32 3.1415927, %v1415_v1  ;;  %v5064_v32 = vsub.f32 %v446_v2, %v478_v4  ;;  %v1765_v29 = vadd.f32 -0.0001984127, %v1733_v47  ;;  %v5068_v0 = vmul.f32 %v5060_v7, %v5060_v7  ;;  %v1139_v53 = vpop.f32.mrf.mxu1 }
 0x156   :  { %v1320_v17 = vmul.f32 6.28125, %v1288_v42  ;;  %v1384_v26 = vmul.f32 0.0019353072, %v1288_v42  ;;  %v1924_v59 = vmul.f32 %v1892_v16, %v5015_v9  ;;  %v823_v62 = vmul.f32 %v791_v60, %v5033_v20 }
 0x157   :  { %v1797_v12 = vmul.f32 %v1765_v29, %v5044_v45  ;;  %v1670_v25 = vmul.f32 -2.5052108e-08, %v5068_v0  ;;  %vm1447_vm11 = vcmp.gt.f32.partialorder %v1415_v1, 1.5707964  ;;  %vm632_vm12 = vcmp.lt.f32.partialorder %v5009_v6, -1.5707964 }
 0x158   :  { %v1352_v11 = vsub.f32 %v1137_v10, %v1320_v17  ;;  %v1140_v55 = vadd.f32 %v4885_v52, %v1139_v53  ;;  %v1956_v39 = vmul.f32 %v1924_v59, %v4999_v40  ;;  %v855_v8 = vadd.f32 -0.0001984127, %v823_v62 }
 0x159   :  { %v1829_v22 = vadd.f32 0.008333333, %v1797_v12  ;;  %v1702_v5 = vadd.f32 2.7557319e-06, %v1670_v25  ;;  %v1511_v18 = vsel %vm1447_vm11, %v1479_v44, %v1415_v1  ;;  %v664_v9 = vsub.f32 -3.1415927, %v5009_v6 }
 0x15a   :  { %v1416_v13 = vsub.f32 %v1352_v11, %v1384_v26  ;;  %v1225_v14 = vmul.f32 0.15915494, %v1140_v55  ;;  %v1988_v15 = vadd.f32 %v1956_v39, %v4999_v40  ;;  %v887_v21 = vmul.f32 %v855_v8, %v5033_v20 }
 0x15b   :  { %v1861_v46 = vmul.f32 %v1829_v22, %v5044_v45  ;;  %v1734_v10 = vmul.f32 %v1702_v5, %v5068_v0  ;;  %vm1543_vm13 = vcmp.lt.f32.partialorder %v1511_v18, -1.5707964  ;;  %v1575_v37 = vsub.f32 -3.1415927, %v1511_v18 }
 0x15c   :  { %v1480_v54 = vsub.f32 3.1415927, %v1416_v13  ;;  %v1257_v3 = vadd.f32 0.5, %v1225_v14  ;;  %2056 = vmatmul.f32.vlgmr.msrb.gmra.mxu2 %v1988_v15  ;;  %v919_v36 = vadd.f32 0.008333333, %v887_v21  ;;  %v5085_v56 = vsel %vm632_vm12, %v664_v9, %v5009_v6  ;;  %1186 = vmatmul.f32.gmra.mxu1 %v5002_v24 }
 0x15d   :  { %vm538_vm14 = vcmp.gt.f32.partialorder %v4949_v27, 1.5707964  ;;  %v1893_v40 = vadd.f32 -0.16666667, %v1861_v46  ;;  %v1766_v50 = vadd.f32 -0.0001984127, %v1734_v10  ;;  %v5089_v2 = vsel %vm1543_vm13, %v1575_v37, %v1511_v18 }
 0x15e   :  { %v5093_v4 = vmul.f32 %v5085_v56, %v5085_v56  ;;  %v1289_v31 = vfloor.f32 %v1257_v3  ;;  %v951_v1 = vmul.f32 %v919_v36, %v5033_v20  ;;  %v5098_v23 = vmul.f32 %v5089_v2, %v5089_v2 }
 0x15f   :  { %vm1448_vm15 = vcmp.gt.f32.partialorder %v1416_v13, 1.5707964  ;;  %v1925_v6 = vmul.f32 %v1893_v40, %v5044_v45  ;;  %v1798_v24 = vmul.f32 %v1766_v50, %v5068_v0  ;;  %v601_v16 = vsel %vm537_vm10, %v569_v41, %v4929_v19  ;;  %v1142_v44 = vpop.f32.mrf.mxu1 }
 0x160   :  { %v760_v61 = vmul.f32 -2.5052108e-08, %v5093_v4  ;;  %v1512_v49 = vsel %vm1448_vm15, %v1480_v54, %v1416_v13  ;;  %v1321_v47 = vmul.f32 6.28125, %v1289_v31  ;;  %v1385_v60 = vmul.f32 0.0019353072, %v1289_v31 }
 0x161   :  { %v983_v42 = vadd.f32 -0.16666667, %v951_v1  ;;  %v1957_v29 = vmul.f32 %v1925_v6, %v5036_v35  ;;  %v1830_v17 = vadd.f32 0.008333333, %v1798_v24  ;;  %v1671_v45 = vmul.f32 -2.5052108e-08, %v5098_v23 }
 0x162   :  { %v792_v26 = vadd.f32 2.7557319e-06, %v760_v61  ;;  %v1353_v59 = vsub.f32 %v1140_v55, %v1321_v47  ;;  %v1143_v62 = vadd.f32 %v4885_v52, %v1142_v44  ;;  %vm1544_vm0 = vcmp.lt.f32.partialorder %v1512_v49, -1.5707964 }
 0x163   :  { %v1015_v53 = vmul.f32 %v983_v42, %v5033_v20  ;;  %v1989_v12 = vadd.f32 %v1957_v29, %v5036_v35  ;;  %v1862_v25 = vmul.f32 %v1830_v17, %v5068_v0  ;;  %v1703_v11 = vadd.f32 2.7557319e-06, %v1671_v45 }
 0x164   :  { %v824_v19 = vmul.f32 %v792_v26, %v5093_v4  ;;  %vm539_vm1 = vcmp.gt.f32.partialorder %v4964_v58, 1.5707964  ;;  %v1417_v41 = vsub.f32 %v1353_v59, %v1385_v60  ;;  %v1226_v39 = vmul.f32 0.15915494, %v1143_v62  ;;  %1189 = vmatmul.f32.gmra.mxu1 %v5054_v48 }
 0x165   :  { %v1047_v8 = vmul.f32 %v1015_v53, %v5019_v34  ;;  %v1576_v22 = vsub.f32 -3.1415927, %v1512_v49  ;;  %2059 = vmatmul.f32.gmra.mxu2 %v1989_v12  ;;  %v1078_v20 = vadd.f32 %v5058_v33, %v4946_v57  ;;  %v1894_v55 = vadd.f32 -0.16666667, %v1862_v25 }
 0x166   :  { %v1735_v35 = vmul.f32 %v1703_v11, %v5098_v23  ;;  %v856_v5 = vadd.f32 -0.0001984127, %v824_v19  ;;  %v1481_v18 = vsub.f32 3.1415927, %v1417_v41  ;;  %v1258_v9 = vadd.f32 0.5, %v1226_v39 }
 0x167   :  { %v5122_v13 = vsel %vm1544_vm0, %v1576_v22, %v1512_v49  ;;  %vm633_vm2 = vcmp.lt.f32.partialorder %v601_v16, -1.5707964  ;;  %v1926_v14 = vmul.f32 %v1894_v55, %v5068_v0  ;;  %v1079_v33 = vadd.f32 %v1047_v8, %v5019_v34 }
 0x168   :  { %v1767_v15 = vadd.f32 -0.0001984127, %v1735_v35  ;;  %v888_v21 = vmul.f32 %v856_v5, %v5093_v4  ;;  %v5128_v48 = vmul.f32 %v5122_v13, %v5122_v13  ;;  %v1290_v57 = vfloor.f32 %v1258_v9 }
 0x169   :  { %v665_v46 = vsub.f32 -3.1415927, %v601_v16  ;;  %v602_v10 = vsel %vm538_vm14, %v570_v43, %v4949_v27  ;;  %v1958_v37 = vmul.f32 %v1926_v14, %v5060_v7  ;;  %v1145_v50 = vpop.f32.mrf.mxu1  ;;  %vm1449_vm3 = vcmp.gt.f32.partialorder %v1417_v41, 1.5707964 }
 0x16a   :  { %v1799_v0 = vmul.f32 %v1767_v15, %v5098_v23  ;;  %v920_v54 = vadd.f32 0.008333333, %v888_v21  ;;  %v1672_v3 = vmul.f32 -2.5052108e-08, %v5128_v48  ;;  %v1322_v36 = vmul.f32 6.28125, %v1290_v57 }
 0x16b   :  { %v1386_v40 = vmul.f32 0.0019353072, %v1290_v57  ;;  %v5140_v31 = vsel %vm633_vm2, %v665_v46, %v601_v16  ;;  %v1146_v34 = vadd.f32 %v4885_v52, %v1145_v50  ;;  %v1990_v1 = vadd.f32 %v1958_v37, %v5060_v7 }
 0x16c   :  { %v1831_v6 = vadd.f32 0.008333333, %v1799_v0  ;;  %v952_v27 = vmul.f32 %v920_v54, %v5093_v4  ;;  %v1354_v43 = vsub.f32 %v1143_v62, %v1322_v36  ;;  %v1704_v24 = vadd.f32 2.7557319e-06, %v1672_v3  ;;  %1192 = vmatmul.f32.gmra.mxu1 %v1078_v20 }
 0x16d   :  { %v5147_v61 = vmul.f32 %v5140_v31, %v5140_v31  ;;  %v1513_v49 = vsel %vm1449_vm3, %v1481_v18, %v1417_v41  ;;  %v1227_v47 = vmul.f32 0.15915494, %v1146_v34  ;;  %2062 = vmatmul.f32.gmra.mxu2 %v1990_v1  ;;  %v603_v59 = vsel %vm539_vm1, %v571_v30, %v4964_v58 }
 0x16e   :  { %v1863_v60 = vmul.f32 %v1831_v6, %v5098_v23  ;;  %v984_v42 = vadd.f32 -0.16666667, %v952_v27  ;;  %vm1545_vm4 = vcmp.lt.f32.partialorder %v1513_v49, -1.5707964  ;;  %v1418_v16 = vsub.f32 %v1354_v43, %v1386_v40 }
 0x16f   :  { %v1736_v7 = vmul.f32 %v1704_v24, %v5128_v48  ;;  %v761_v44 = vmul.f32 -2.5052108e-08, %v5147_v61  ;;  %v1577_v29 = vsub.f32 -3.1415927, %v1513_v49  ;;  %v1259_v17 = vadd.f32 0.5, %v1227_v47 }
 0x170   :  { %v1895_v45 = vadd.f32 -0.16666667, %v1863_v60  ;;  %v1016_v26 = vmul.f32 %v984_v42, %v5093_v4  ;;  %vm634_vm5 = vcmp.lt.f32.partialorder %v602_v10, -1.5707964  ;;  %v1482_v25 = vsub.f32 3.1415927, %v1418_v16 }
 0x171   :  { %v1768_v62 = vadd.f32 -0.0001984127, %v1736_v7  ;;  %v793_v53 = vadd.f32 2.7557319e-06, %v761_v44  ;;  %v5158_v12 = vsel %vm1545_vm4, %v1577_v29, %v1513_v49  ;;  %v1291_v11 = vfloor.f32 %v1259_v17  ;;  %v1148_v4 = vpop.f32.mrf.mxu1 }
 0x172   :  { %v1927_v19 = vmul.f32 %v1895_v45, %v5098_v23  ;;  %v5163_v41 = vmul.f32 %v5158_v12, %v5158_v12  ;;  %v666_v22 = vsub.f32 -3.1415927, %v602_v10  ;;  %vm635_vm6 = vcmp.lt.f32.partialorder %v603_v59, -1.5707964 }
 0x173   :  { %v1800_v39 = vmul.f32 %v1768_v62, %v5128_v48  ;;  %v825_v8 = vmul.f32 %v793_v53, %v5147_v61  ;;  %v1323_v58 = vmul.f32 6.28125, %v1291_v11  ;;  %v1387_v30 = vmul.f32 0.0019353072, %v1291_v11 }
 0x174   :  { %v5168_v20 = vadd.f32 %v4885_v52, %v1148_v4  ;;  %v1959_v55 = vmul.f32 %v1927_v19, %v5089_v2  ;;  %v1048_v23 = vmul.f32 %v1016_v26, %v5085_v56  ;;  %v1673_v18 = vmul.f32 -2.5052108e-08, %v5163_v41  ;;  %1195 = vmatmul.f32.gmra.mxu1 %v1079_v33 }
 0x175   :  { %v1832_v35 = vadd.f32 0.008333333, %v1800_v39  ;;  %v857_v5 = vadd.f32 -0.0001984127, %v825_v8  ;;  %v1355_v9 = vsub.f32 %v1146_v34, %v1323_v58  ;;  %v5176_v21 = vsel %vm634_vm5, %v666_v22, %v602_v10 }
 0x176   :  { %v1228_v14 = vmul.f32 0.15915494, %v5168_v20  ;;  %v1991_v15 = vadd.f32 %v1959_v55, %v5089_v2  ;;  %v1705_v37 = vadd.f32 2.7557319e-06, %v1673_v18  ;;  %v5182_v0 = vmul.f32 %v5176_v21, %v5176_v21 }
 0x177   :  { %v1864_v57 = vmul.f32 %v1832_v35, %v5128_v48  ;;  %v889_v46 = vmul.f32 %v857_v5, %v5147_v61  ;;  %v1419_v54 = vsub.f32 %v1355_v9, %v1387_v30  ;;  %vm1450_vm7 = vcmp.gt.f32.partialorder %v1418_v16, 1.5707964 }
 0x178   :  { %v1260_v3 = vadd.f32 0.5, %v1228_v14  ;;  %2065 = vmatmul.f32.gmra.mxu2 %v1991_v15  ;;  %v667_v36 = vsub.f32 -3.1415927, %v603_v59  ;;  %v1737_v2 = vmul.f32 %v1705_v37, %v5163_v41  ;;  %v762_v10 = vmul.f32 -2.5052108e-08, %v5182_v0 }
 0x179   :  { %v1896_v33 = vadd.f32 -0.16666667, %v1864_v57  ;;  %v921_v40 = vadd.f32 0.008333333, %v889_v46  ;;  %v1080_v34 = vadd.f32 %v1048_v23, %v5085_v56  ;;  %v1514_v1 = vsel %vm1450_vm7, %v1482_v25, %v1418_v16  ;;  %v1151_v27 = vpop.f32.mrf.mxu1 }
 0x17a   :  { %v1292_v50 = vfloor.f32 %v1260_v3  ;;  %v5188_v6 = vsel %vm635_vm6, %v667_v36, %v603_v59  ;;  %v1769_v49 = vadd.f32 -0.0001984127, %v1737_v2  ;;  %v794_v47 = vadd.f32 2.7557319e-06, %v762_v10 }
 0x17b   :  { %v1928_v43 = vmul.f32 %v1896_v33, %v5128_v48  ;;  %v953_v24 = vmul.f32 %v921_v40, %v5147_v61  ;;  %v1483_v60 = vsub.f32 3.1415927, %v1419_v54  ;;  %v1152_v7 = vadd.f32 %v4885_v52, %v1151_v27 }
 0x17c   :  { %v1324_v42 = vmul.f32 6.28125, %v1292_v50  ;;  %vm1546_vm8 = vcmp.lt.f32.partialorder %v1514_v1, -1.5707964  ;;  %vm540_vm9 = vcmp.gt.f32.partialorder %v5011_v51, 1.5707964  ;;  %v1801_v44 = vmul.f32 %v1769_v49, %v5163_v41  ;;  %1198 = vmatmul.f32.gmra.mxu1 %v1080_v34 }
 0x17d   :  { %v1960_v56 = vmul.f32 %v1928_v43, %v5122_v13  ;;  %v985_v16 = vadd.f32 -0.16666667, %v953_v24  ;;  %v826_v29 = vmul.f32 %v794_v47, %v5182_v0  ;;  %v1229_v17 = vmul.f32 0.15915494, %v1152_v7 }
 0x17e   :  { %v1356_v48 = vsub.f32 %v5168_v20, %v1324_v42  ;;  %v1578_v45 = vsub.f32 -3.1415927, %v1514_v1  ;;  %v5200_v26 = vmul.f32 %v5188_v6, %v5188_v6  ;;  %v1833_v53 = vadd.f32 0.008333333, %v1801_v44 }
 0x17f   :  { %v1992_v59 = vadd.f32 %v1960_v56, %v5122_v13  ;;  %v1017_v62 = vmul.f32 %v985_v16, %v5147_v61  ;;  %v858_v25 = vadd.f32 -0.0001984127, %v826_v29  ;;  %v1388_v11 = vmul.f32 0.0019353072, %v1292_v50 }
 0x180   :  { %v1261_v19 = vadd.f32 0.5, %v1229_v17  ;;  %v5205_v4 = vsel %vm1546_vm8, %v1578_v45, %v1514_v1  ;;  %v763_v39 = vmul.f32 -2.5052108e-08, %v5200_v26  ;;  %v1865_v22 = vmul.f32 %v1833_v53, %v5163_v41 }
 0x181   :  { %2068 = vmatmul.f32.gmra.mxu2 %v1992_v59  ;;  %v1049_v8 = vmul.f32 %v1017_v62, %v5140_v31  ;;  %v890_v58 = vmul.f32 %v858_v25, %v5182_v0  ;;  %v5213_v13 = vmul.f32 %v5205_v4, %v5205_v4  ;;  %v574_v61 = vsub.f32 3.1415927, %v5064_v32  ;;  %v1154_v23 = vpop.f32.mrf.mxu1 }
 0x182   :  { %v1293_v30 = vfloor.f32 %v1261_v19  ;;  %v795_v20 = vadd.f32 2.7557319e-06, %v763_v39  ;;  %vm1451_vm10 = vcmp.gt.f32.partialorder %v1419_v54, 1.5707964  ;;  %v5216_v55 = vsub.f32 %v1356_v48, %v1388_v11 }
 0x183   :  { %v1897_v35 = vadd.f32 -0.16666667, %v1865_v22  ;;  %v922_v5 = vadd.f32 0.008333333, %v890_v58  ;;  %v1674_v18 = vmul.f32 -2.5052108e-08, %v5213_v13  ;;  %v1155_v14 = vadd.f32 %v4885_v52, %v1154_v23 }
 0x184   :  { %v1325_v9 = vmul.f32 6.28125, %v1293_v30  ;;  %v1081_v15 = vadd.f32 %v1049_v8, %v5140_v31  ;;  %v827_v57 = vmul.f32 %v795_v20, %v5200_v26  ;;  %v1515_v36 = vsel %vm1451_vm10, %v1483_v60, %v1419_v54 }
 0x185   :  { %v1929_v46 = vmul.f32 %v1897_v35, %v5163_v41  ;;  %v954_v37 = vmul.f32 %v922_v5, %v5182_v0  ;;  %v1706_v3 = vadd.f32 2.7557319e-06, %v1674_v18  ;;  %vm541_vm11 = vcmp.gt.f32.partialorder %v5039_v28, 1.5707964 }
 0x186   :  { %v1357_v33 = vsub.f32 %v1152_v7, %v1325_v9  ;;  %v1230_v40 = vmul.f32 0.15915494, %v1155_v14  ;;  %1201 = vmatmul.f32.gmra.mxu1 %v1081_v15  ;;  %v859_v2 = vadd.f32 -0.0001984127, %v827_v57  ;;  %vm1547_vm12 = vcmp.lt.f32.partialorder %v1515_v36, -1.5707964 }
 0x187   :  { %v1961_v10 = vmul.f32 %v1929_v46, %v5158_v12  ;;  %v986_v50 = vadd.f32 -0.16666667, %v954_v37  ;;  %v1738_v31 = vmul.f32 %v1706_v3, %v5213_v13  ;;  %v1579_v34 = vsub.f32 -3.1415927, %v1515_v36 }
 0x188   :  { %v1389_v1 = vmul.f32 0.0019353072, %v1293_v30  ;;  %v1262_v27 = vadd.f32 0.5, %v1230_v40  ;;  %v891_v41 = vmul.f32 %v859_v2, %v5200_v26  ;;  %v604_v54 = vsel %vm540_vm9, %v572_v38, %v5011_v51 }
 0x189   :  { %v1993_v43 = vadd.f32 %v1961_v10, %v5158_v12  ;;  %v1018_v24 = vmul.f32 %v986_v50, %v5182_v0  ;;  %v1770_v49 = vadd.f32 -0.0001984127, %v1738_v31  ;;  %v5235_v47 = vsel %vm1547_vm12, %v1579_v34, %v1515_v36  ;;  %v1157_v16 = vpop.f32.mrf.mxu1 }
 0x18a   :  { %v5237_v60 = vsub.f32 %v1357_v33, %v1389_v1  ;;  %v1294_v42 = vfloor.f32 %v1262_v27  ;;  %v923_v7 = vadd.f32 0.008333333, %v891_v41  ;;  %v5241_v56 = vmul.f32 %v5235_v47, %v5235_v47 }
 0x18b   :  { %2071 = vmatmul.f32.gmra.mxu2 %v1993_v43  ;;  %v1050_v44 = vmul.f32 %v1018_v24, %v5176_v21  ;;  %v1802_v51 = vmul.f32 %v1770_v49, %v5213_v13  ;;  %vm636_vm13 = vcmp.lt.f32.partialorder %v604_v54, -1.5707964  ;;  %v668_v38 = vsub.f32 -3.1415927, %v604_v54 }
 0x18c   :  { %v1484_v12 = vsub.f32 3.1415927, %v5216_v55  ;;  %v1326_v0 = vmul.f32 6.28125, %v1294_v42  ;;  %v5247_v29 = vadd.f32 %v4885_v52, %v1157_v16  ;;  %v955_v48 = vmul.f32 %v923_v7, %v5200_v26 }
 0x18d   :  { %v1082_v17 = vadd.f32 %v1050_v44, %v5176_v21  ;;  %v1834_v45 = vadd.f32 0.008333333, %v1802_v51  ;;  %v1675_v59 = vmul.f32 -2.5052108e-08, %v5241_v56  ;;  %v5252_v62 = vsel %vm636_vm13, %v668_v38, %v604_v54 }
 0x18e   :  { %v1358_v53 = vsub.f32 %v1155_v14, %v1326_v0  ;;  %v1231_v25 = vmul.f32 0.15915494, %v5247_v29  ;;  %v987_v11 = vadd.f32 -0.16666667, %v955_v48  ;;  %v5257_v19 = vmul.f32 %v5252_v62, %v5252_v62  ;;  %v5308_v48 = vld [vmem:[%s7536_s4] ss:$0 sm:$0xff] }
 0x18f   :  { %v1485_v39 = vsub.f32 3.1415927, %v5237_v60  ;;  %1204 = vmatmul.f32.gmra.mxu1 %v1082_v17  ;;  %v1866_v8 = vmul.f32 %v1834_v45, %v5213_v13  ;;  %v1707_v22 = vadd.f32 2.7557319e-06, %v1675_v59  ;;  %vm1452_vm14 = vcmp.gt.f32.partialorder %v5216_v55, 1.5707964 }
 0x190   :  { %v1390_v21 = vmul.f32 0.0019353072, %v1294_v42  ;;  %v1263_v58 = vadd.f32 0.5, %v1231_v25  ;;  %v1019_v30 = vmul.f32 %v987_v11, %v5200_v26  ;;  %v764_v20 = vmul.f32 -2.5052108e-08, %v5257_v19 }
 0x191   :  { %vm542_vm15 = vcmp.gt.f32.partialorder %v5064_v32, 1.5707964  ;;  %v1898_v23 = vadd.f32 -0.16666667, %v1866_v8  ;;  %v1739_v35 = vmul.f32 %v1707_v22, %v5241_v56  ;;  %v1516_v5 = vsel %vm1452_vm14, %v1484_v12, %v5216_v55  ;;  %v1160_v46 = vpop.f32.mrf.mxu1 }
 0x192   :  { %v605_v18 = vsel %vm541_vm11, %v573_v63, %v5039_v28  ;;  %v5272_v9 = vsub.f32 %v1358_v53, %v1390_v21  ;;  %v1295_v14 = vfloor.f32 %v1263_v58  ;;  %v1051_v26 = vmul.f32 %v1019_v30, %v5188_v6 }
 0x193   :  { %v796_v15 = vadd.f32 2.7557319e-06, %v764_v20  ;;  %v1930_v57 = vmul.f32 %v1898_v23, %v5213_v13  ;;  %v1771_v37 = vadd.f32 -0.0001984127, %v1739_v35  ;;  %vm1548_vm0 = vcmp.lt.f32.partialorder %v1516_v5, -1.5707964 }
 0x194   :  { %v1580_v3 = vsub.f32 -3.1415927, %v1516_v5  ;;  %v1327_v36 = vmul.f32 6.28125, %v1295_v14  ;;  %v1161_v55 = vadd.f32 %v4885_v52, %v1160_v46  ;;  %v1083_v33 = vadd.f32 %v1051_v26, %v5188_v6 }
 0x195   :  { %vm637_vm1 = vcmp.lt.f32.partialorder %v605_v18, -1.5707964  ;;  %v1962_v28 = vmul.f32 %v1930_v57, %v5205_v4  ;;  %v1803_v63 = vmul.f32 %v1771_v37, %v5241_v56  ;;  %v828_v40 = vmul.f32 %v796_v15, %v5257_v19 }
 0x196   :  { %v5281_v2 = vsel %vm1548_vm0, %v1580_v3, %v1516_v5  ;;  %v1359_v13 = vsub.f32 %v5247_v29, %v1327_v36  ;;  %v1232_v10 = vmul.f32 0.15915494, %v1161_v55  ;;  %v669_v31 = vsub.f32 -3.1415927, %v605_v18 }
 0x197   :  { %v5286_v50 = vmul.f32 %v5281_v2, %v5281_v2  ;;  %v1994_v52 = vadd.f32 %v1962_v28, %v5205_v4  ;;  %1207 = vmatmul.f32.gmra.mxu1 %v1083_v33  ;;  %v1835_v6 = vadd.f32 0.008333333, %v1803_v63  ;;  %v860_v34 = vadd.f32 -0.0001984127, %v828_v40 }
 0x198   :  { %vm1453_vm2 = vcmp.gt.f32.partialorder %v5237_v60, 1.5707964  ;;  %v1391_v1 = vmul.f32 0.0019353072, %v1295_v14  ;;  %v1264_v27 = vadd.f32 0.5, %v1232_v10  ;;  %v5292_v54 = vsel %vm637_vm1, %v669_v31, %v605_v18 }
 0x199   :  { %v1676_v41 = vmul.f32 -2.5052108e-08, %v5286_v50  ;;  %2074 = vmatmul.f32.gmra.mxu2 %v1994_v52  ;;  %v1867_v43 = vmul.f32 %v1835_v6, %v5241_v56  ;;  %v892_v24 = vmul.f32 %v860_v34, %v5257_v19  ;;  %v5298_v4 = vmul.f32 %v5292_v54, %v5292_v54  ;;  %v1163_v38 = vpop.f32.mrf.mxu1 }
 0x19a   :  { %v1517_v49 = vsel %vm1453_vm2, %v1485_v39, %v5237_v60  ;;  %v1486_v42 = vsub.f32 3.1415927, %v5272_v9  ;;  %v1296_v7 = vfloor.f32 %v1264_v27  ;;  %v5302_v44 = vsub.f32 %v1359_v13, %v1391_v1 }
 0x19b   :  { %v1708_v16 = vadd.f32 2.7557319e-06, %v1676_v41  ;;  %vm1549_vm3 = vcmp.lt.f32.partialorder %v1517_v49, -1.5707964  ;;  %v1899_v51 = vadd.f32 -0.16666667, %v1867_v43  ;;  %v5311_v60 = vadd.f32 %v5308_v48, %v1163_v38 }
 0x19c   :  { %v924_v12 = vadd.f32 0.008333333, %v892_v24  ;;  %v765_v0 = vmul.f32 -2.5052108e-08, %v5298_v4  ;;  %v1328_v29 = vmul.f32 6.28125, %v1296_v7  ;;  %v606_v45 = vsel %vm542_vm15, %v574_v61, %v5064_v32 }
 0x19d   :  { %v1740_v17 = vmul.f32 %v1708_v16, %v5286_v50  ;;  %v1931_v59 = vmul.f32 %v1899_v51, %v5241_v56  ;;  %v1581_v11 = vsub.f32 -3.1415927, %v1517_v49  ;;  %v1392_v8 = vmul.f32 0.0019353072, %v1296_v7 }
 0x19e   :  { %v956_v53 = vmul.f32 %v924_v12, %v5257_v19  ;;  %v797_v25 = vadd.f32 2.7557319e-06, %v765_v0  ;;  %v1360_v39 = vsub.f32 %v1161_v55, %v1328_v29  ;;  %v1233_v22 = vmul.f32 0.15915494, %v5311_v60 }
 0x19f   :  { %v1772_v21 = vadd.f32 -0.0001984127, %v1740_v17  ;;  %v1963_v58 = vmul.f32 %v1931_v59, %v5235_v47  ;;  %v5325_v23 = vsel %vm1549_vm3, %v1581_v11, %v1517_v49  ;;  %vm638_vm4 = vcmp.lt.f32.partialorder %v606_v45, -1.5707964 }
 0x1a0   :  { %v988_v30 = vadd.f32 -0.16666667, %v956_v53  ;;  %v829_v20 = vmul.f32 %v797_v25, %v5298_v4  ;;  %v1265_v32 = vadd.f32 0.5, %v1233_v22  ;;  %v5330_v56 = vmul.f32 %v5325_v23, %v5325_v23 }
 0x1a1   :  { %v1804_v61 = vmul.f32 %v1772_v21, %v5286_v50  ;;  %v1995_v35 = vadd.f32 %v1963_v58, %v5235_v47  ;;  %v670_v14 = vsub.f32 -3.1415927, %v606_v45  ;;  %v5334_v26 = vsub.f32 %v1360_v39, %v1392_v8  ;;  %v1166_v3 = vpop.f32.mrf.mxu1 }
 0x1a2   :  { %v1020_v5 = vmul.f32 %v988_v30, %v5257_v19  ;;  %v861_v18 = vadd.f32 -0.0001984127, %v829_v20  ;;  %v1297_v15 = vfloor.f32 %v1265_v32  ;;  %v1677_v46 = vmul.f32 -2.5052108e-08, %v5330_v56 }
 0x1a3   :  { %v1836_v57 = vadd.f32 0.008333333, %v1804_v61  ;;  %2077 = vmatmul.f32.gmra.mxu2 %v1995_v35  ;;  %v5339_v55 = vsel %vm638_vm4, %v670_v14, %v606_v45  ;;  %vm1454_vm5 = vcmp.gt.f32.partialorder %v5272_v9, 1.5707964  ;;  %v1487_v47 = vsub.f32 3.1415927, %v5302_v44 }
 0x1a4   :  { %v1052_v37 = vmul.f32 %v1020_v5, %v5252_v62  ;;  %v893_v36 = vmul.f32 %v861_v18, %v5298_v4  ;;  %v1329_v19 = vmul.f32 6.28125, %v1297_v15  ;;  %v5345_v28 = vadd.f32 %v5308_v48, %v1166_v3 }
 0x1a5   :  { %v1868_v33 = vmul.f32 %v1836_v57, %v5286_v50  ;;  %v1709_v13 = vadd.f32 2.7557319e-06, %v1677_v46  ;;  %v5350_v10 = vmul.f32 %v5339_v55, %v5339_v55  ;;  %v1488_v31 = vsub.f32 3.1415927, %v5334_v26 }
 0x1a6   :  { %v1084_v63 = vadd.f32 %v1052_v37, %v5252_v62  ;;  %v925_v40 = vadd.f32 0.008333333, %v893_v36  ;;  %v1234_v6 = vmul.f32 0.15915494, %v5345_v28  ;;  %v1518_v34 = vsel %vm1454_vm5, %v1486_v42, %v5272_v9 }
 0x1a7   :  { %v1900_v52 = vadd.f32 -0.16666667, %v1868_v33  ;;  %v1741_v27 = vmul.f32 %v1709_v13, %v5330_v56  ;;  %v766_v62 = vmul.f32 -2.5052108e-08, %v5350_v10  ;;  %vm1550_vm6 = vcmp.lt.f32.partialorder %v1518_v34, -1.5707964 }
 0x1a8   :  { %1210 = vmatmul.f32.gmra.mxu1 %v1084_v63  ;;  %v957_v1 = vmul.f32 %v925_v40, %v5298_v4  ;;  %v1361_v41 = vsub.f32 %v5311_v60, %v1329_v19  ;;  %v1266_v24 = vadd.f32 0.5, %v1234_v6  ;;  %v1582_v49 = vsub.f32 -3.1415927, %v1518_v34 }
 0x1a9   :  { %v1932_v43 = vmul.f32 %v1900_v52, %v5286_v50  ;;  %v1773_v16 = vadd.f32 -0.0001984127, %v1741_v27  ;;  %v798_v51 = vadd.f32 2.7557319e-06, %v766_v62  ;;  %v1393_v38 = vmul.f32 0.0019353072, %v1297_v15  ;;  %v1169_v17 = vpop.f32.mrf.mxu1 }
 0x1aa   :  { %v989_v7 = vadd.f32 -0.16666667, %v957_v1  ;;  %v1298_v42 = vfloor.f32 %v1266_v24  ;;  %v5361_v12 = vsel %vm1550_vm6, %v1582_v49, %v1518_v34  ;;  %v5372_v25 = vadd.f32 %v5308_v48, %v1169_v17 }
 0x1ab   :  { %v1964_v9 = vmul.f32 %v1932_v43, %v5281_v2  ;;  %v1805_v29 = vmul.f32 %v1773_v16, %v5330_v56  ;;  %v830_v60 = vmul.f32 %v798_v51, %v5350_v10  ;;  %v5368_v50 = vmul.f32 %v5361_v12, %v5361_v12 }
 0x1ac   :  { %v1021_v0 = vmul.f32 %v989_v7, %v5298_v4  ;;  %v1425_v45 = vsub.f32 %v1361_v41, %v1393_v38  ;;  %v1330_v53 = vmul.f32 6.28125, %v1298_v42  ;;  %v1235_v22 = vmul.f32 0.15915494, %v5372_v25 }
 0x1ad   :  { %v1996_v59 = vadd.f32 %v1964_v9, %v5281_v2  ;;  %v1837_v39 = vadd.f32 0.008333333, %v1805_v29  ;;  %v862_v4 = vadd.f32 -0.0001984127, %v830_v60  ;;  %v1678_v8 = vmul.f32 -2.5052108e-08, %v5368_v50 }
 0x1ae   :  { %v1053_v11 = vmul.f32 %v1021_v0, %v5292_v54  ;;  %vm1455_vm7 = vcmp.gt.f32.partialorder %v5302_v44, 1.5707964  ;;  %vm1456_vm8 = vcmp.gt.f32.partialorder %v5334_v26, 1.5707964  ;;  %v1489_v20 = vsub.f32 3.1415927, %v1425_v45 }
 0x1af   :  { %2080 = vmatmul.f32.gmra.mxu2 %v1996_v59  ;;  %v1869_v2 = vmul.f32 %v1837_v39, %v5330_v56  ;;  %v894_v58 = vmul.f32 %v862_v4, %v5350_v10  ;;  %v1710_v30 = vadd.f32 2.7557319e-06, %v1678_v8  ;;  %v1267_v32 = vadd.f32 0.5, %v1235_v22 }
 0x1b0   :  { %v1085_v21 = vadd.f32 %v1053_v11, %v5292_v54  ;;  %v1519_v61 = vsel %vm1455_vm7, %v1487_v47, %v5302_v44  ;;  %v1520_v35 = vsel %vm1456_vm8, %v1488_v31, %v5334_v26  ;;  %v1362_v15 = vsub.f32 %v5345_v28, %v1330_v53 }
 0x1b1   :  { %v1901_v5 = vadd.f32 -0.16666667, %v1869_v2  ;;  %v926_v18 = vadd.f32 0.008333333, %v894_v58  ;;  %v1742_v14 = vmul.f32 %v1710_v30, %v5368_v50  ;;  %vm1551_vm9 = vcmp.lt.f32.partialorder %v1519_v61, -1.5707964  ;;  %v1172_v36 = vpop.f32.mrf.mxu1 }
 0x1b2   :  { %1213 = vmatmul.f32.gmra.mxu1 %v1085_v21  ;;  %v1299_v54 = vfloor.f32 %v1267_v32  ;;  %v1583_v57 = vsub.f32 -3.1415927, %v1519_v61  ;;  %vm1552_vm10 = vcmp.lt.f32.partialorder %v1520_v35, -1.5707964  ;;  %v1584_v44 = vsub.f32 -3.1415927, %v1520_v35 }
 0x1b3   :  { %v1933_v46 = vmul.f32 %v1901_v5, %v5330_v56  ;;  %v958_v37 = vmul.f32 %v926_v18, %v5350_v10  ;;  %v1774_v3 = vadd.f32 -0.0001984127, %v1742_v14  ;;  %v1394_v47 = vmul.f32 0.0019353072, %v1298_v42 }
 0x1b4   :  { %v1331_v26 = vmul.f32 6.28125, %v1299_v54  ;;  %v5389_v19 = vadd.f32 %v5308_v48, %v1172_v36  ;;  %v5391_v33 = vsel %vm1551_vm9, %v1583_v57, %v1519_v61  ;;  %v5401_v52 = vsel %vm1552_vm10, %v1584_v44, %v1520_v35 }
 0x1b5   :  { %v1965_v63 = vmul.f32 %v1933_v46, %v5325_v23  ;;  %v990_v28 = vadd.f32 -0.16666667, %v958_v37  ;;  %v1806_v40 = vmul.f32 %v1774_v3, %v5368_v50  ;;  %v5397_v56 = vmul.f32 %v5391_v33, %v5391_v33 }
 0x1b6   :  { %v1426_v13 = vsub.f32 %v1362_v15, %v1394_v47  ;;  %v1236_v31 = vmul.f32 0.15915494, %v5389_v19  ;;  %vm1457_vm11 = vcmp.gt.f32.partialorder %v1425_v45, 1.5707964  ;;  %v5408_v41 = vmul.f32 %v5401_v52, %v5401_v52 }
 0x1b7   :  { %v1997_v6 = vadd.f32 %v1965_v63, %v5325_v23  ;;  %v1022_v34 = vmul.f32 %v990_v28, %v5350_v10  ;;  %v1838_v1 = vadd.f32 0.008333333, %v1806_v40  ;;  %v1679_v27 = vmul.f32 -2.5052108e-08, %v5397_v56 }
 0x1b8   :  { %v1268_v62 = vadd.f32 0.5, %v1236_v31  ;;  %v1521_v43 = vsel %vm1457_vm11, %v1489_v20, %v1425_v45  ;;  %v1363_v24 = vsub.f32 %v5372_v25, %v1331_v26  ;;  %v1680_v10 = vmul.f32 -2.5052108e-08, %v5408_v41 }
 0x1b9   :  { %2083 = vmatmul.f32.gmra.mxu2 %v1997_v6  ;;  %v1054_v49 = vmul.f32 %v1022_v34, %v5339_v55  ;;  %v1870_v7 = vmul.f32 %v1838_v1, %v5368_v50  ;;  %v1711_v16 = vadd.f32 2.7557319e-06, %v1679_v27  ;;  %vm1553_vm12 = vcmp.lt.f32.partialorder %v1521_v43, -1.5707964  ;;  %v1175_v29 = vpop.f32.mrf.mxu1 }
 0x1ba   :  { %v1300_v23 = vfloor.f32 %v1268_v62  ;;  %v1585_v51 = vsub.f32 -3.1415927, %v1521_v43  ;;  %v1490_v38 = vsub.f32 3.1415927, %v1426_v13  ;;  %v1395_v17 = vmul.f32 0.0019353072, %v1299_v54 }
 0x1bb   :  { %v1086_v9 = vadd.f32 %v1054_v49, %v5339_v55  ;;  %v1902_v42 = vadd.f32 -0.16666667, %v1870_v7  ;;  %v1743_v0 = vmul.f32 %v1711_v16, %v5397_v56  ;;  %v5417_v45 = vadd.f32 %v5308_v48, %v1175_v29 }
 0x1bc   :  { %v1332_v60 = vmul.f32 6.28125, %v1300_v23  ;;  %v1712_v59 = vadd.f32 2.7557319e-06, %v1680_v10  ;;  %v5420_v11 = vsel %vm1553_vm12, %v1585_v51, %v1521_v43  ;;  %vm1458_vm13 = vcmp.gt.f32.partialorder %v1426_v13, 1.5707964 }
 0x1bd   :  { %1216 = vmatmul.f32.gmra.mxu1 %v1086_v9  ;;  %v1934_v53 = vmul.f32 %v1902_v42, %v5368_v50  ;;  %v1775_v25 = vadd.f32 -0.0001984127, %v1743_v0  ;;  %v1427_v39 = vsub.f32 %v1363_v24, %v1395_v17  ;;  %v1237_v55 = vmul.f32 0.15915494, %v5417_v45 }
 0x1be   :  { %v1744_v4 = vmul.f32 %v1712_v59, %v5408_v41  ;;  %v5426_v8 = vmul.f32 %v5420_v11, %v5420_v11  ;;  %v1522_v2 = vsel %vm1458_vm13, %v1490_v38, %v1426_v13  ;;  %v1364_v50 = vsub.f32 %v5389_v19, %v1332_v60 }
 0x1bf   :  { %v1966_v22 = vmul.f32 %v1934_v53, %v5361_v12  ;;  %v1807_v21 = vmul.f32 %v1775_v25, %v5397_v56  ;;  %v1269_v58 = vadd.f32 0.5, %v1237_v55  ;;  %vm1554_vm14 = vcmp.lt.f32.partialorder %v1522_v2, -1.5707964 }
 0x1c0   :  { %v1776_v30 = vadd.f32 -0.0001984127, %v1744_v4  ;;  %v1681_v20 = vmul.f32 -2.5052108e-08, %v5426_v8  ;;  %v1586_v35 = vsub.f32 -3.1415927, %v1522_v2 }
 0x1c1   :  { %v1998_v32 = vadd.f32 %v1966_v22, %v5361_v12  ;;  %v1839_v61 = vadd.f32 0.008333333, %v1807_v21  ;;  %v1491_v5 = vsub.f32 3.1415927, %v1427_v39  ;;  %v1396_v18 = vmul.f32 0.0019353072, %v1300_v23  ;;  %v1178_v57 = vpop.f32.mrf.mxu1 }
 0x1c2   :  { %v1301_v14 = vfloor.f32 %v1269_v58  ;;  %v1808_v15 = vmul.f32 %v1776_v30, %v5408_v41  ;;  %v1713_v46 = vadd.f32 2.7557319e-06, %v1681_v20  ;;  %v5435_v37 = vsel %vm1554_vm14, %v1586_v35, %v1522_v2 }
 0x1c3   :  { %2086 = vmatmul.f32.gmra.mxu2 %v1998_v32  ;;  %v1871_v54 = vmul.f32 %v1839_v61, %v5397_v56  ;;  %v1428_v3 = vsub.f32 %v1364_v50, %v1396_v18  ;;  %v1179_v12 = vadd.f32 %v5308_v48, %v1178_v57  ;;  %v5441_v19 = vmul.f32 %v5435_v37, %v5435_v37 }
 0x1c4   :  { %v1333_v36 = vmul.f32 6.28125, %v1301_v14  ;;  %v1840_v44 = vadd.f32 0.008333333, %v1808_v15  ;;  %v1745_v26 = vmul.f32 %v1713_v46, %v5426_v8  ;;  %vm1459_vm15 = vcmp.gt.f32.partialorder %v1427_v39, 1.5707964 }
 0x1c5   :  { %v1903_v47 = vadd.f32 -0.16666667, %v1871_v54  ;;  %v1238_v28 = vmul.f32 0.15915494, %v1179_v12  ;;  %v1523_v40 = vsel %vm1459_vm15, %v1491_v5, %v1427_v39  ;;  %v1682_v6 = vmul.f32 -2.5052108e-08, %v5441_v19 }
 0x1c6   :  { %v1872_v63 = vmul.f32 %v1840_v44, %v5408_v41  ;;  %v1777_v31 = vadd.f32 -0.0001984127, %v1745_v26  ;;  %vm1555_vm0 = vcmp.lt.f32.partialorder %v1523_v40, -1.5707964  ;;  %v1365_v34 = vsub.f32 %v5417_v45, %v1333_v36 }
 0x1c7   :  { %v1935_v13 = vmul.f32 %v1903_v47, %v5397_v56  ;;  %v1270_v27 = vadd.f32 0.5, %v1238_v28  ;;  %v1587_v62 = vsub.f32 -3.1415927, %v1523_v40  ;;  %v1492_v43 = vsub.f32 3.1415927, %v1428_v3 }
 0x1c8   :  { %v1904_v1 = vadd.f32 -0.16666667, %v1872_v63  ;;  %v1809_v49 = vmul.f32 %v1777_v31, %v5426_v8  ;;  %v1714_v7 = vadd.f32 2.7557319e-06, %v1682_v6  ;;  %vm1460_vm1 = vcmp.gt.f32.partialorder %v1428_v3, 1.5707964 }
 0x1c9   :  { %v1967_v24 = vmul.f32 %v1935_v13, %v5391_v33  ;;  %v1397_v16 = vmul.f32 0.0019353072, %v1301_v14  ;;  %v1302_v56 = vfloor.f32 %v1270_v27  ;;  %v1181_v38 = vpop.f32.mrf.mxu1  ;;  %v5453_v42 = vsel %vm1555_vm0, %v1587_v62, %v1523_v40 }
 0x1ca   :  { %v1936_v23 = vmul.f32 %v1904_v1, %v5408_v41  ;;  %v1841_v51 = vadd.f32 0.008333333, %v1809_v49  ;;  %v1746_v9 = vmul.f32 %v1714_v7, %v5441_v19  ;;  %v1182_v60 = vadd.f32 %v5308_v48, %v1181_v38 }
 0x1cb   :  { %v1999_v10 = vadd.f32 %v1967_v24, %v5391_v33  ;;  %v1429_v0 = vsub.f32 %v1365_v34, %v1397_v16  ;;  %v1334_v17 = vmul.f32 6.28125, %v1302_v56  ;;  %v5460_v33 = vmul.f32 %v5453_v42, %v5453_v42 }
 0x1cc   :  { %v1968_v29 = vmul.f32 %v1936_v23, %v5401_v52  ;;  %v1873_v45 = vmul.f32 %v1841_v51, %v5426_v8  ;;  %v1778_v41 = vadd.f32 -0.0001984127, %v1746_v9  ;;  %v1524_v59 = vsel %vm1460_vm1, %v1492_v43, %v1428_v3  ;;  %v2968_v9 = vld [vmem:[%s7539_s7 + $0x78] sm:$0xff] }
 0x1cd   :  { %2089 = vmatmul.f32.gmra.mxu2 %v1999_v10  ;;  %v1239_v53 = vmul.f32 0.15915494, %v1182_v60  ;;  %vm1556_vm2 = vcmp.lt.f32.partialorder %v1524_v59, -1.5707964  ;;  %v1683_v55 = vmul.f32 -2.5052108e-08, %v5460_v33  ;;  %v1366_v2 = vsub.f32 %v1179_v12, %v1334_v17  ;;  %2973 = vmatpush.msrb.mxu3 %v2968_v9 }
 0x1ce   :  { %v1905_v25 = vadd.f32 -0.16666667, %v1873_v45  ;;  %v1810_v39 = vmul.f32 %v1778_v41, %v5441_v19  ;;  %v1588_v4 = vsub.f32 -3.1415927, %v1524_v59  ;;  %v1493_v22 = vsub.f32 3.1415927, %v1429_v0 }
 0x1cf   :  { %v2000_v21 = vadd.f32 %v1968_v29, %v5401_v52  ;;  %v1271_v50 = vadd.f32 0.5, %v1239_v53  ;;  %v1715_v20 = vadd.f32 2.7557319e-06, %v1683_v55  ;;  %vm1461_vm3 = vcmp.gt.f32.partialorder %v1429_v0, 1.5707964  ;;  %v2966_v41 = vld [vmem:[%s7539_s7 + $0x68] sm:$0xff] }
 0x1d0   :  { %v1937_v58 = vmul.f32 %v1905_v25, %v5426_v8  ;;  %v1842_v30 = vadd.f32 0.008333333, %v1810_v39  ;;  %v5467_v32 = vsel %vm1556_vm2, %v1588_v4, %v1524_v59  ;;  %v1398_v61 = vmul.f32 0.0019353072, %v1302_v56 }
 0x1d1   :  { %v1303_v35 = vfloor.f32 %v1271_v50  ;;  %v5471_v5 = vmul.f32 %v5467_v32, %v5467_v32  ;;  %v1184_v14 = vpop.f32.mrf.mxu1  ;;  %v1747_v52 = vmul.f32 %v1715_v20, %v5460_v33  ;;  %v1525_v44 = vsel %vm1461_vm3, %v1493_v22, %v1429_v0  ;;  %v2967_v0 = vld [vmem:[%s7539_s7 + $0x70] sm:$0xff] }
 0x1d2   :  { %v1874_v18 = vmul.f32 %v1842_v30, %v5441_v19  ;;  %v1430_v15 = vsub.f32 %v1366_v2, %v1398_v61  ;;  %v5476_v8 = vadd.f32 %v5308_v48, %v1184_v14  ;;  %v1969_v46 = vmul.f32 %v1937_v58, %v5420_v11  ;;  %2974 = vmatpush.msrb.mxu3 %v2967_v0 }
 0x1d3   :  { %v1335_v54 = vmul.f32 6.28125, %v1303_v35  ;;  %v1684_v57 = vmul.f32 -2.5052108e-08, %v5471_v5  ;;  %v1779_v36 = vadd.f32 -0.0001984127, %v1747_v52 }
 0x1d4   :  { %v1906_v3 = vadd.f32 -0.16666667, %v1874_v18  ;;  %v1240_v12 = vmul.f32 0.15915494, %v5476_v8  ;;  %vm1557_vm4 = vcmp.lt.f32.partialorder %v1525_v44, -1.5707964  ;;  %v2001_v6 = vadd.f32 %v1969_v46, %v5420_v11  ;;  %2975 = vmatpush.msrb.mxu3 %v2966_v41 }
 0x1d5   :  { %2092 = vmatmul.f32.gmra.mxu2 %v2000_v21  ;;  %v1716_v47 = vadd.f32 2.7557319e-06, %v1684_v57  ;;  %v1811_v26 = vmul.f32 %v1779_v36, %v5460_v33  ;;  %v1589_v63 = vsub.f32 -3.1415927, %v1525_v44  ;;  %v1494_v28 = vsub.f32 3.1415927, %v1430_v15 }
 0x1d6   :  { %v1367_v40 = vsub.f32 %v1182_v60, %v1335_v54  ;;  %v1272_v13 = vadd.f32 0.5, %v1240_v12  ;;  %v1938_v34 = vmul.f32 %v1906_v3, %v5441_v19  ;;  %vm1462_vm5 = vcmp.gt.f32.partialorder %v1430_v15, 1.5707964  ;;  %v5499_v19 = vld [vmem:[%s7538_s6] ss:$0 sm:$0xff]  ;;  %v2964_v36 = vld [vmem:[%s7539_s7 + $0x58] sm:$0xff] }
 0x1d7   :  { %v1748_v31 = vmul.f32 %v1716_v47, %v5471_v5  ;;  %v1843_v1 = vadd.f32 0.008333333, %v1811_v26  ;;  %v5485_v27 = vsel %vm1557_vm4, %v1589_v63, %v1525_v44  ;;  %v1399_v62 = vmul.f32 0.0019353072, %v1303_v35  ;;  %v2965_v3 = vld [vmem:[%s7539_s7 + $0x60] sm:$0xff]  ;;  %v2963_v26 = vld [vmem:[%s7539_s7 + $0x50] sm:$0xff] }
 0x1d8   :  { %v1304_v43 = vfloor.f32 %v1272_v13  ;;  %v5490_v16 = vmul.f32 %v5485_v27, %v5485_v27  ;;  %v1970_v10 = vmul.f32 %v1938_v34, %v5435_v37  ;;  %v1526_v29 = vsel %vm1462_vm5, %v1494_v28, %v1430_v15  ;;  %2976 = vmatpush.msrb.mxu3 %v2965_v3  ;;  %v2961_v41 = vld [vmem:[%s7539_s7 + $0x40] sm:$0xff] }
 0x1d9   :  { %v1780_v24 = vadd.f32 -0.0001984127, %v1748_v31  ;;  %v1875_v49 = vmul.f32 %v1843_v1, %v5460_v33  ;;  %v1187_v7 = vpop.f32.mrf.mxu1  ;;  %v1431_v23 = vsub.f32 %v1367_v40, %v1399_v62  ;;  %vm1558_vm6 = vcmp.lt.f32.partialorder %v1526_v29, -1.5707964 }
 0x1da   :  { %v5493_v56 = vadd.f32 %v5308_v48, %v1187_v7  ;;  %v1685_v38 = vmul.f32 -2.5052108e-08, %v5490_v16  ;;  %v1336_v17 = vmul.f32 6.28125, %v1304_v43  ;;  %v1590_v53 = vsub.f32 -3.1415927, %v1526_v29  ;;  %2977 = vmatpush.msrb.mxu3 %v2964_v36 }
 0x1db   :  { %v1812_v11 = vmul.f32 %v1780_v24, %v5471_v5  ;;  %v1907_v51 = vadd.f32 -0.16666667, %v1875_v49  ;;  %v1495_v25 = vsub.f32 3.1415927, %v1431_v23  ;;  %v2002_v21 = vadd.f32 %v1970_v10, %v5435_v37  ;;  %v2962_v49 = vld [vmem:[%s7539_s7 + $0x48] sm:$0xff] }
 0x1dc   :  { %v1241_v60 = vmul.f32 0.15915494, %v5493_v56  ;;  %v1717_v59 = vadd.f32 2.7557319e-06, %v1685_v38  ;;  %v5521_v58 = vsel %vm1558_vm6, %v1590_v53, %v1526_v29  ;;  %vm1463_vm7 = vcmp.gt.f32.partialorder %v1431_v23, 1.5707964  ;;  %2978 = vmatpush.msrb.mxu3 %v2963_v26 }
 0x1dd   :  { %2095 = vmatmul.f32.gmra.mxu2 %v2001_v6  ;;  %v1844_v45 = vadd.f32 0.008333333, %v1812_v11  ;;  %v1939_v39 = vmul.f32 %v1907_v51, %v5460_v33  ;;  %v1368_v30 = vsub.f32 %v5476_v8, %v1336_v17  ;;  %v1400_v33 = vmul.f32 0.0019353072, %v1304_v43 }
 0x1de   :  { %v1273_v55 = vadd.f32 0.5, %v1241_v60  ;;  %v1749_v50 = vmul.f32 %v1717_v59, %v5490_v16  ;;  %v5527_v37 = vmul.f32 %v5521_v58, %v5521_v58  ;;  %v1527_v44 = vsel %vm1463_vm7, %v1495_v25, %v1431_v23  ;;  %2979 = vmatpush.msrb.mxu3 %v2962_v49  ;;  %v2960_v59 = vld [vmem:[%s7539_s7 + $0x38] sm:$0xff] }
 0x1df   :  { %v1876_v4 = vmul.f32 %v1844_v45, %v5471_v5  ;;  %v2057_v22 = vpop.f32.mrf.mxu2  ;;  %v1971_v14 = vmul.f32 %v1939_v39, %v5453_v42  ;;  %v1432_v12 = vsub.f32 %v1368_v30, %v1400_v33  ;;  %v1591_v13 = vsub.f32 -3.1415927, %v1527_v44  ;;  %v2956_v49 = vld [vmem:[%s7539_s7 + $0x18] sm:$0xff] }
 0x1e0   :  { %v5518_v2 = vadd.f32 %v5499_v19, %v2057_v22  ;;  %v1305_v20 = vfloor.f32 %v1273_v55  ;;  %v1781_v18 = vadd.f32 -0.0001984127, %v1749_v50  ;;  %v1686_v46 = vmul.f32 -2.5052108e-08, %v5527_v37  ;;  %2980 = vmatpush.msrb.mxu3 %v2961_v41 }
 0x1e1   :  { %v1190_v61 = vpop.f32.mrf.mxu1  ;;  %v1908_v15 = vadd.f32 -0.16666667, %v1876_v4  ;;  %v2003_v31 = vadd.f32 %v1971_v14, %v5453_v42  ;;  %vm1559_vm8 = vcmp.lt.f32.partialorder %v1527_v44, -1.5707964  ;;  %vm1464_vm9 = vcmp.gt.f32.partialorder %v1432_v12, 1.5707964 }
 0x1e2   :  { %v2153_v35 = vmul.f32 0.15915494, %v5518_v2  ;;  %v1337_v52 = vmul.f32 6.28125, %v1305_v20  ;;  %v5531_v54 = vadd.f32 %v5308_v48, %v1190_v61  ;;  %v1813_v57 = vmul.f32 %v1781_v18, %v5490_v16  ;;  %2981 = vmatpush.msrb.mxu3 %v2960_v59 }
 0x1e3   :  { %v1718_v40 = vadd.f32 2.7557319e-06, %v1686_v46  ;;  %v1940_v1 = vmul.f32 %v1908_v15, %v5471_v5  ;;  %v1496_v7 = vsub.f32 3.1415927, %v1432_v12  ;;  %v1401_v11 = vmul.f32 0.0019353072, %v1305_v20 }
 0x1e4   :  { %v2185_v8 = vadd.f32 0.5, %v2153_v35  ;;  %v1242_v47 = vmul.f32 0.15915494, %v5531_v54  ;;  %v1845_v28 = vadd.f32 0.008333333, %v1813_v57  ;;  %v1369_v34 = vsub.f32 %v5493_v56, %v1337_v52 }
 0x1e5   :  { %2098 = vmatmul.f32.gmra.mxu2 %v2002_v21  ;;  %v1750_v24 = vmul.f32 %v1718_v40, %v5527_v37  ;;  %v5558_v51 = vsel %vm1559_vm8, %v1591_v13, %v1527_v44  ;;  %v1972_v17 = vmul.f32 %v1940_v1, %v5467_v32  ;;  %v1528_v55 = vsel %vm1464_vm9, %v1496_v7, %v1432_v12  ;;  %v2959_v21 = vld [vmem:[%s7539_s7 + $0x30] sm:$0xff]  ;;  %v2957_v40 = vld [vmem:[%s7539_s7 + $0x20] sm:$0xff] }
 0x1e6   :  { %v2217_v63 = vfloor.f32 %v2185_v8  ;;  %v1274_v6 = vadd.f32 0.5, %v1242_v47  ;;  %v1877_v62 = vmul.f32 %v1845_v28, %v5490_v16  ;;  %v5564_v29 = vsub.f32 %v1369_v34, %v1401_v11  ;;  %2982 = vmatpush.msrb.mxu3 %v2959_v21  ;;  %v2958_v28 = vld [vmem:[%s7539_s7 + $0x28] sm:$0xff] }
 0x1e7   :  { %v1782_v5 = vadd.f32 -0.0001984127, %v1750_v24  ;;  %v5570_v45 = vmul.f32 %v5558_v51, %v5558_v51  ;;  %v2004_v61 = vadd.f32 %v1972_v17, %v5467_v32  ;;  %v1592_v52 = vsub.f32 -3.1415927, %v1528_v55 }
 0x1e8   :  { %v2060_v43 = vpop.f32.mrf.mxu2  ;;  %v1306_v23 = vfloor.f32 %v1274_v6  ;;  %v2249_v56 = vmul.f32 6.28125, %v2217_v63  ;;  %v1909_v38 = vadd.f32 -0.16666667, %v1877_v62  ;;  %v2313_v35 = vmul.f32 0.0019353072, %v2217_v63  ;;  %2983 = vmatpush.msrb.mxu3 %v2958_v28 }
 0x1e9   :  { %v5555_v42 = vadd.f32 %v5499_v19, %v2060_v43  ;;  %v1193_v10 = vpop.f32.mrf.mxu1  ;;  %v1814_v60 = vmul.f32 %v1782_v5, %v5527_v37  ;;  %v1687_v33 = vmul.f32 -2.5052108e-08, %v5570_v45  ;;  %vm1465_vm10 = vcmp.gt.f32.partialorder %v5564_v29, 1.5707964 }
 0x1ea   :  { %v5561_v9 = vadd.f32 %v5308_v48, %v1193_v10  ;;  %v1338_v53 = vmul.f32 6.28125, %v1306_v23  ;;  %v2281_v4 = vsub.f32 %v5518_v2, %v2249_v56  ;;  %v1941_v50 = vmul.f32 %v1909_v38, %v5490_v16  ;;  %2984 = vmatpush.msrb.mxu3 %v2957_v40 }
 0x1eb   :  { %v2154_v0 = vmul.f32 0.15915494, %v5555_v42  ;;  %v1846_v22 = vadd.f32 0.008333333, %v1814_v60  ;;  %vm1560_vm11 = vcmp.lt.f32.partialorder %v1528_v55, -1.5707964 }
 0x1ec   :  { %v1243_v25 = vmul.f32 0.15915494, %v5561_v9  ;;  %v1370_v2 = vsub.f32 %v5531_v54, %v1338_v53  ;;  %v5590_v16 = vsub.f32 %v2281_v4, %v2313_v35  ;;  %v1719_v32 = vadd.f32 2.7557319e-06, %v1687_v33  ;;  %2985 = vmatpush.msrb.mxu3 %v2956_v49  ;;  %v2954_v35 = vld [vmem:[%s7539_s7 + $0x8] sm:$0xff] }
 0x1ed   :  { %2101 = vmatmul.f32.gmra.mxu2 %v2003_v31  ;;  %v2186_v39 = vadd.f32 0.5, %v2154_v0  ;;  %v1878_v18 = vmul.f32 %v1846_v22, %v5527_v37  ;;  %v1402_v3 = vmul.f32 0.0019353072, %v1306_v23  ;;  %v1973_v36 = vmul.f32 %v1941_v50, %v5485_v27  ;;  %v2955_v50 = vld [vmem:[%s7539_s7 + $0x10] sm:$0xff] }
 0x1ee   :  { %v1275_v30 = vadd.f32 0.5, %v1243_v25  ;;  %v1497_v54 = vsub.f32 3.1415927, %v5564_v29  ;;  %v1751_v26 = vmul.f32 %v1719_v32, %v5570_v45  ;;  %v5602_v63 = vsel %vm1560_vm11, %v1592_v52, %v1528_v55  ;;  %2986 = vmatpush.msrb.mxu3 %v2955_v50 }
 0x1ef   :  { %v2218_v20 = vfloor.f32 %v2186_v39  ;;  %v1910_v44 = vadd.f32 -0.16666667, %v1878_v18  ;;  %v1434_v13 = vsub.f32 %v1370_v2, %v1402_v3  ;;  %v5613_v34 = vmul.f32 %v5602_v63, %v5602_v63  ;;  %v2953_v2 = vld [vmem:[%s7539_s7] sm:$0xff] }
 0x1f0   :  { %v2063_v14 = vpop.f32.mrf.mxu2  ;;  %v1307_v15 = vfloor.f32 %v1275_v30  ;;  %v2409_v1 = vsub.f32 3.1415927, %v5590_v16  ;;  %v1783_v24 = vadd.f32 -0.0001984127, %v1751_v26  ;;  %v2005_v7 = vadd.f32 %v1973_v36, %v5485_v27  ;;  %2987 = vmatpush.msrb.mxu3 %v2954_v35 }
 0x1f1   :  { %v2250_v8 = vmul.f32 6.28125, %v2218_v20  ;;  %v1196_v57 = vpop.f32.mrf.mxu1  ;;  %v5593_v46 = vadd.f32 %v5499_v19, %v2063_v14  ;;  %v1942_v23 = vmul.f32 %v1910_v44, %v5527_v37  ;;  %v1688_v56 = vmul.f32 -2.5052108e-08, %v5613_v34 }
 0x1f2   :  { %v5597_v12 = vadd.f32 %v5308_v48, %v1196_v57  ;;  %v1339_v31 = vmul.f32 6.28125, %v1307_v15  ;;  %v2314_v10 = vmul.f32 0.0019353072, %v2218_v20  ;;  %v1815_v38 = vmul.f32 %v1783_v24, %v5570_v45  ;;  %2988 = vmatpush.msrb.mxu3 %v2953_v2 }
 0x1f3   :  { %v2155_v47 = vmul.f32 0.15915494, %v5593_v46  ;;  %v2282_v62 = vsub.f32 %v5555_v42, %v2250_v8  ;;  %v1529_v42 = vsel %vm1465_vm10, %v1497_v54, %v5564_v29  ;;  %vm1466_vm12 = vcmp.gt.f32.partialorder %v1434_v13, 1.5707964 }
 0x1f4   :  { %v1244_v6 = vmul.f32 0.15915494, %v5597_v12  ;;  %v1371_v0 = vsub.f32 %v5561_v9, %v1339_v31  ;;  %v1720_v60 = vadd.f32 2.7557319e-06, %v1688_v56  ;;  %v1498_v27 = vsub.f32 3.1415927, %v1434_v13 }
 0x1f5   :  { %2104 = vmatmul.f32.gmra.mxu2 %v2004_v61  ;;  %v2187_v43 = vadd.f32 0.5, %v2155_v47  ;;  %v1403_v37 = vmul.f32 0.0019353072, %v1307_v15  ;;  %v5628_v41 = vsub.f32 %v2282_v62, %v2314_v10  ;;  %v1847_v59 = vadd.f32 0.008333333, %v1815_v38 }
 0x1f6   :  { %v1276_v11 = vadd.f32 0.5, %v1244_v6  ;;  %v1974_v39 = vmul.f32 %v1942_v23, %v5521_v58  ;;  %vm1561_vm13 = vcmp.lt.f32.partialorder %v1529_v42, -1.5707964  ;;  %vm2377_vm14 = vcmp.gt.f32.partialorder %v5590_v16, 1.5707964 }
 0x1f7   :  { %v2219_v5 = vfloor.f32 %v2187_v43  ;;  %v1879_v4 = vmul.f32 %v1847_v59, %v5570_v45  ;;  %v1752_v22 = vmul.f32 %v1720_v60, %v5613_v34  ;;  %v1593_v21 = vsub.f32 -3.1415927, %v1529_v42 }
 0x1f8   :  { %v1308_v17 = vfloor.f32 %v1276_v11  ;;  %v5643_v30 = vsub.f32 %v1371_v0, %v1403_v37  ;;  %v1530_v15 = vsel %vm1466_vm12, %v1498_v27, %v1434_v13  ;;  %v2410_v8 = vsub.f32 3.1415927, %v5628_v41 }
 0x1f9   :  { %v1199_v53 = vpop.f32.mrf.mxu1  ;;  %v2251_v9 = vmul.f32 6.28125, %v2219_v5  ;;  %v1911_v18 = vadd.f32 -0.16666667, %v1879_v4  ;;  %v1784_v14 = vadd.f32 -0.0001984127, %v1752_v22  ;;  %v5651_v52 = vsel %vm1561_vm13, %v1593_v21, %v1529_v42 }
 0x1fa   :  { %v5632_v55 = vadd.f32 %v5308_v48, %v1199_v53  ;;  %v1340_v20 = vmul.f32 6.28125, %v1308_v17  ;;  %v5660_v3 = vmul.f32 %v5651_v52, %v5651_v52  ;;  %v2006_v36 = vadd.f32 %v1974_v39, %v5521_v58 }
 0x1fb   :  { %v2066_v25 = vpop.f32.mrf.mxu2  ;;  %v2283_v44 = vsub.f32 %v5593_v46, %v2251_v9  ;;  %v1943_v54 = vmul.f32 %v1911_v18, %v5570_v45  ;;  %v1816_v47 = vmul.f32 %v1784_v14, %v5613_v34  ;;  %v2315_v28 = vmul.f32 0.0019353072, %v2219_v5 }
 0x1fc   :  { %v5635_v29 = vadd.f32 %v5499_v19, %v2066_v25  ;;  %v1245_v33 = vmul.f32 0.15915494, %v5632_v55  ;;  %v1372_v26 = vsub.f32 %v5597_v12, %v1340_v20  ;;  %vm1562_vm15 = vcmp.lt.f32.partialorder %v1530_v15, -1.5707964 }
 0x1fd   :  { %2107 = vmatmul.f32.gmra.mxu2 %v2005_v7  ;;  %v1848_v13 = vadd.f32 0.008333333, %v1816_v47  ;;  %v1689_v6 = vmul.f32 -2.5052108e-08, %v5660_v3  ;;  %v1594_v62 = vsub.f32 -3.1415927, %v1530_v15  ;;  %v1975_v46 = vmul.f32 %v1943_v54, %v5558_v51 }
 0x1fe   :  { %v2156_v61 = vmul.f32 0.15915494, %v5635_v29  ;;  %v1277_v57 = vadd.f32 0.5, %v1245_v33  ;;  %vm1467_vm0 = vcmp.gt.f32.partialorder %v5643_v30, 1.5707964  ;;  %v5670_v24 = vsub.f32 %v2283_v44, %v2315_v28 }
 0x1ff   :  { %v1404_v58 = vmul.f32 0.0019353072, %v1308_v17  ;;  %v1880_v12 = vmul.f32 %v1848_v13, %v5613_v34  ;;  %v1721_v56 = vadd.f32 2.7557319e-06, %v1689_v6  ;;  %v5682_v10 = vsel %vm1562_vm15, %v1594_v62, %v1530_v15 }
 0x200   :  { %v2188_v32 = vadd.f32 0.5, %v2156_v61  ;;  %v1309_v40 = vfloor.f32 %v1277_v57  ;;  %v5688_v0 = vmul.f32 %v5682_v10, %v5682_v10  ;;  %v2007_v17 = vadd.f32 %v1975_v46, %v5558_v51 }
 0x201   :  { %v5679_v23 = vsub.f32 %v1372_v26, %v1404_v58  ;;  %v1912_v5 = vadd.f32 -0.16666667, %v1880_v12  ;;  %v1753_v27 = vmul.f32 %v1721_v56, %v5660_v3  ;;  %v2441_v37 = vsel %vm2377_vm14, %v2409_v1, %v5590_v16 }
 0x202   :  { %v2220_v43 = vfloor.f32 %v2188_v32  ;;  %v1341_v11 = vmul.f32 6.28125, %v1309_v40  ;;  %v1690_v39 = vmul.f32 -2.5052108e-08, %v5688_v0  ;;  %v1499_v9 = vsub.f32 3.1415927, %v5643_v30 }
 0x203   :  { %v1202_v31 = vpop.f32.mrf.mxu1  ;;  %v1944_v59 = vmul.f32 %v1912_v5, %v5613_v34  ;;  %v1500_v4 = vsub.f32 3.1415927, %v5679_v23  ;;  %v2411_v51 = vsub.f32 3.1415927, %v5670_v24  ;;  %v1405_v22 = vmul.f32 0.0019353072, %v1309_v40 }
 0x204   :  { %v2069_v45 = vpop.f32.mrf.mxu2  ;;  %v5674_v49 = vadd.f32 %v5308_v48, %v1202_v31  ;;  %v2252_v60 = vmul.f32 6.28125, %v2220_v43  ;;  %v1785_v20 = vadd.f32 -0.0001984127, %v1753_v27  ;;  %v1722_v61 = vadd.f32 2.7557319e-06, %v1690_v39 }
 0x205   :  { %2110 = vmatmul.f32.gmra.mxu2 %v2006_v36  ;;  %v5677_v7 = vadd.f32 %v5499_v19, %v2069_v45  ;;  %vm2473_vm1 = vcmp.lt.f32.partialorder %v2441_v37, -1.5707964  ;;  %v2505_v16 = vsub.f32 -3.1415927, %v2441_v37  ;;  %v1373_v34 = vsub.f32 %v5632_v55, %v1341_v11 }
 0x206   :  { %v1246_v38 = vmul.f32 0.15915494, %v5674_v49  ;;  %v2284_v1 = vsub.f32 %v5635_v29, %v2252_v60  ;;  %v2316_v35 = vmul.f32 0.0019353072, %v2220_v43  ;;  %v1976_v18 = vmul.f32 %v1944_v59, %v5602_v63 }
 0x207   :  { %v2157_v42 = vmul.f32 0.15915494, %v5677_v7  ;;  %v1817_v14 = vmul.f32 %v1785_v20, %v5660_v3  ;;  %v1754_v57 = vmul.f32 %v1722_v61, %v5688_v0  ;;  %v1531_v32 = vsel %vm1467_vm0, %v1499_v9, %v5643_v30 }
 0x208   :  { %v1278_v53 = vadd.f32 0.5, %v1246_v38  ;;  %v5716_v29 = vsel %vm2473_vm1, %v2505_v16, %v2441_v37  ;;  %v5723_v28 = vsub.f32 %v1373_v34, %v1405_v22  ;;  %v5725_v40 = vsub.f32 %v2284_v1, %v2316_v35 }
 0x209   :  { %v2189_v25 = vadd.f32 0.5, %v2157_v42  ;;  %v1849_v54 = vadd.f32 0.008333333, %v1817_v14  ;;  %v1786_v26 = vadd.f32 -0.0001984127, %v1754_v57  ;;  %v2008_v30 = vadd.f32 %v1976_v18, %v5602_v63 }
 0x20a   :  { %v1310_v21 = vfloor.f32 %v1278_v53  ;;  %vm1563_vm2 = vcmp.lt.f32.partialorder %v1531_v32, -1.5707964  ;;  %vm1468_vm3 = vcmp.gt.f32.partialorder %v5679_v23, 1.5707964  ;;  %vm2378_vm4 = vcmp.gt.f32.partialorder %v5628_v41, 1.5707964 }
 0x20b   :  { %v2221_v50 = vfloor.f32 %v2189_v25  ;;  %v1881_v31 = vmul.f32 %v1849_v54, %v5660_v3  ;;  %v1818_v62 = vmul.f32 %v1786_v26, %v5688_v0  ;;  %v1501_v9 = vsub.f32 3.1415927, %v5723_v28 }
 0x20c   :  { %v1205_v33 = vpop.f32.mrf.mxu1  ;;  %v1342_v36 = vmul.f32 6.28125, %v1310_v21  ;;  %v1406_v43 = vmul.f32 0.0019353072, %v1310_v21  ;;  %v2442_v35 = vsel %vm2378_vm4, %v2410_v8, %v5628_v41  ;;  %vm1469_vm6 = vcmp.gt.f32.partialorder %v5723_v28, 1.5707964 }
 0x20d   :  { %2113 = vmatmul.f32.gmra.mxu2 %v2007_v17  ;;  %v5707_v2 = vadd.f32 %v5308_v48, %v1205_v33  ;;  %v2253_v44 = vmul.f32 6.28125, %v2221_v50  ;;  %v5721_v48 = vmul.f32 %v5716_v29, %v5716_v29  ;;  %v1913_v12 = vadd.f32 -0.16666667, %v1881_v31  ;;  %v5738_v17 = vld [vmem:[%s7536_s4] ss:$0 sm:$0xff] }
 0x20e   :  { %v2072_v15 = vpop.f32.mrf.mxu2  ;;  %v1374_v46 = vsub.f32 %v5674_v49, %v1342_v36  ;;  %v1850_v56 = vadd.f32 0.008333333, %v1818_v62  ;;  %v2317_v38 = vmul.f32 0.0019353072, %v2221_v50  ;;  %v2412_v50 = vsub.f32 3.1415927, %v5725_v40 }
 0x20f   :  { %v5714_v55 = vadd.f32 %v5499_v19, %v2072_v15  ;;  %v1247_v47 = vmul.f32 0.15915494, %v5707_v2  ;;  %v2601_v58 = vmul.f32 -2.5052108e-08, %v5721_v48  ;;  %v2285_v45 = vsub.f32 %v5677_v7, %v2253_v44 }
 0x210   :  { %v1595_v7 = vsub.f32 -3.1415927, %v1531_v32  ;;  %v1945_v60 = vmul.f32 %v1913_v12, %v5660_v3  ;;  %v1882_v59 = vmul.f32 %v1850_v56, %v5688_v0  ;;  %v5752_v22 = vsub.f32 %v1374_v46, %v1406_v43 }
 0x211   :  { %v2158_v13 = vmul.f32 0.15915494, %v5714_v55  ;;  %v1279_v6 = vadd.f32 0.5, %v1247_v47  ;;  %v2633_v42 = vadd.f32 2.7557319e-06, %v2601_v58  ;;  %v5754_v21 = vsub.f32 %v2285_v45, %v2317_v38 }
 0x212   :  { %v5749_v39 = vsel %vm1563_vm2, %v1595_v7, %v1531_v32  ;;  %v1977_v3 = vmul.f32 %v1945_v60, %v5651_v52  ;;  %v1914_v20 = vadd.f32 -0.16666667, %v1882_v59  ;;  %v1502_v32 = vsub.f32 3.1415927, %v5752_v22 }
 0x213   :  { %v1311_v11 = vfloor.f32 %v1279_v6  ;;  %v2190_v63 = vadd.f32 0.5, %v2158_v13  ;;  %v2665_v53 = vmul.f32 %v2633_v42, %v5721_v48  ;;  %v5760_v61 = vmul.f32 %v5749_v39, %v5749_v39 }
 0x214   :  { %v1208_v5 = vpop.f32.mrf.mxu1  ;;  %v2009_v16 = vadd.f32 %v1977_v3, %v5651_v52  ;;  %v1946_v14 = vmul.f32 %v1914_v20, %v5688_v0  ;;  %v2413_v52 = vsub.f32 3.1415927, %v5754_v21  ;;  %vm2474_vm5 = vcmp.lt.f32.partialorder %v2442_v35, -1.5707964 }
 0x215   :  { %2116 = vmatmul.f32.gmra.mxu2 %v2008_v30  ;;  %v5741_v49 = vadd.f32 %v5738_v17, %v1208_v5  ;;  %v1343_v27 = vmul.f32 6.28125, %v1311_v11  ;;  %v2222_v37 = vfloor.f32 %v2190_v63  ;;  %v2697_v33 = vadd.f32 -0.0001984127, %v2665_v53 }
 0x216   :  { %v1691_v57 = vmul.f32 -2.5052108e-08, %v5760_v61  ;;  %v1407_v36 = vmul.f32 0.0019353072, %v1311_v11  ;;  %v1978_v54 = vmul.f32 %v1946_v14, %v5682_v10  ;;  %v2506_v26 = vsub.f32 -3.1415927, %v2442_v35 }
 0x217   :  { %v1248_v25 = vmul.f32 0.15915494, %v5741_v49  ;;  %v1375_v34 = vsub.f32 %v5707_v2, %v1343_v27  ;;  %v2254_v18 = vmul.f32 6.28125, %v2222_v37  ;;  %v2729_v15 = vmul.f32 %v2697_v33, %v5721_v48 }
 0x218   :  { %v2318_v44 = vmul.f32 0.0019353072, %v2222_v37  ;;  %v1723_v0 = vadd.f32 2.7557319e-06, %v1691_v57  ;;  %v1532_v6 = vsel %vm1468_vm3, %v1500_v4, %v5679_v23  ;;  %v2010_v62 = vadd.f32 %v1978_v54, %v5682_v10 }
 0x219   :  { %v1280_v1 = vadd.f32 0.5, %v1248_v25  ;;  %v2761_v47 = vadd.f32 0.008333333, %v2729_v15  ;;  %v5779_v30 = vsub.f32 %v1375_v34, %v1407_v36  ;;  %v2286_v13 = vsub.f32 %v5714_v55, %v2254_v18 }
 0x21a   :  { %v1755_v46 = vmul.f32 %v1723_v0, %v5760_v61  ;;  %v5791_v43 = vsel %vm2474_vm5, %v2506_v26, %v2442_v35  ;;  %vm1564_vm7 = vcmp.lt.f32.partialorder %v1532_v6, -1.5707964  ;;  %v1596_v12 = vsub.f32 -3.1415927, %v1532_v6 }
 0x21b   :  { %v1312_v41 = vfloor.f32 %v1280_v1  ;;  %v2793_v31 = vmul.f32 %v2761_v47, %v5721_v48  ;;  %v5795_v55 = vmul.f32 %v5791_v43, %v5791_v43  ;;  %vm2379_vm8 = vcmp.gt.f32.partialorder %v5670_v24, 1.5707964 }
 0x21c   :  { %v2075_v2 = vpop.f32.mrf.mxu2  ;;  %v1787_v56 = vadd.f32 -0.0001984127, %v1755_v46  ;;  %v1503_v23 = vsub.f32 3.1415927, %v5779_v30  ;;  %v5799_v10 = vsub.f32 %v2286_v13, %v2318_v44  ;;  %v5804_v60 = vsel %vm1564_vm7, %v1596_v12, %v1532_v6 }
 0x21d   :  { %2119 = vmatmul.f32.gmra.mxu2 %v2009_v16  ;;  %v5776_v8 = vadd.f32 %v5499_v19, %v2075_v2  ;;  %v2825_v45 = vadd.f32 -0.16666667, %v2793_v31  ;;  %v1344_v11 = vmul.f32 6.28125, %v1312_v41  ;;  %v2602_v5 = vmul.f32 -2.5052108e-08, %v5795_v55 }
 0x21e   :  { %v1819_v42 = vmul.f32 %v1787_v56, %v5760_v61  ;;  %v2443_v27 = vsel %vm2379_vm8, %v2411_v51, %v5670_v24  ;;  %vm1470_vm9 = vcmp.gt.f32.partialorder %v5752_v22, 1.5707964  ;;  %v1408_v3 = vmul.f32 0.0019353072, %v1312_v41 }
 0x21f   :  { %v2159_v58 = vmul.f32 0.15915494, %v5776_v8  ;;  %v2857_v4 = vmul.f32 %v2825_v45, %v5721_v48  ;;  %v2634_v59 = vadd.f32 2.7557319e-06, %v2602_v5  ;;  %v5815_v48 = vmul.f32 %v5804_v60, %v5804_v60 }
 0x220   :  { %v1376_v25 = vsub.f32 %v5741_v49, %v1344_v11  ;;  %v1851_v33 = vadd.f32 0.008333333, %v1819_v42  ;;  %v2414_v35 = vsub.f32 3.1415927, %v5799_v10  ;;  %vm2475_vm10 = vcmp.lt.f32.partialorder %v2443_v27, -1.5707964 }
 0x221   :  { %v2191_v63 = vadd.f32 0.5, %v2159_v58  ;;  %v2889_v37 = vmul.f32 %v2857_v4, %v5716_v29  ;;  %v2666_v51 = vmul.f32 %v2634_v59, %v5795_v55  ;;  %v1692_v14 = vmul.f32 -2.5052108e-08, %v5815_v48 }
 0x222   :  { %v1883_v18 = vmul.f32 %v1851_v33, %v5760_v61  ;;  %v2507_v2 = vsub.f32 -3.1415927, %v2443_v27  ;;  %v1533_v44 = vsel %vm1469_vm6, %v1501_v9, %v5723_v28  ;;  %v5834_v54 = vsub.f32 %v1376_v25, %v1408_v3 }
 0x223   :  { %v2223_v38 = vfloor.f32 %v2191_v63  ;;  %v2921_v24 = vadd.f32 %v2889_v37, %v5716_v29  ;;  %v2698_v49 = vadd.f32 -0.0001984127, %v2666_v51  ;;  %v1724_v36 = vadd.f32 2.7557319e-06, %v1692_v14 }
 0x224   :  { %v1915_v29 = vadd.f32 -0.16666667, %v1883_v18  ;;  %v5841_v6 = vsel %vm2475_vm10, %v2507_v2, %v2443_v27  ;;  %vm1565_vm11 = vcmp.lt.f32.partialorder %v1533_v44, -1.5707964  ;;  %v1597_v45 = vsub.f32 -3.1415927, %v1533_v44 }
 0x225   :  { %v1211_v7 = vpop.f32.mrf.mxu1  ;;  %2122 = vmatmul.f32.gmra.mxu2 %v2010_v62  ;;  %v2255_v20 = vmul.f32 6.28125, %v2223_v38  ;;  %2989 = vmatmul.f32.vlgmr.msrb.gmra.mxu3 %v2921_v24  ;;  %v2730_v41 = vmul.f32 %v2698_v49, %v5795_v55  ;;  %v2319_v26 = vmul.f32 0.0019353072, %v2223_v38  ;;  %v1756_v31 = vmul.f32 %v1724_v36, %v5815_v48 }
 0x226   :  { %v5811_v53 = vadd.f32 %v5738_v17, %v1211_v7  ;;  %v2078_v16 = vpop.f32.mrf.mxu2  ;;  %v1947_v13 = vmul.f32 %v1915_v29, %v5760_v61  ;;  %v1504_v12 = vsub.f32 3.1415927, %v5834_v54  ;;  %v5859_v37 = vsel %vm1565_vm11, %v1597_v45, %v1533_v44 }
 0x227   :  { %v5823_v1 = vadd.f32 %v5499_v19, %v2078_v16  ;;  %v2287_v47 = vsub.f32 %v5776_v8, %v2255_v20  ;;  %v2762_v62 = vadd.f32 0.008333333, %v2730_v41  ;;  %v1788_v9 = vadd.f32 -0.0001984127, %v1756_v31 }
 0x228   :  { %v1249_v34 = vmul.f32 0.15915494, %v5811_v53  ;;  %v1979_v28 = vmul.f32 %v1947_v13, %v5749_v39  ;;  %v5846_v8 = vmul.f32 %v5841_v6, %v5841_v6  ;;  %v1534_v59 = vsel %vm1470_vm9, %v1502_v32, %v5752_v22 }
 0x229   :  { %v2160_v57 = vmul.f32 0.15915494, %v5823_v1  ;;  %v5849_v61 = vsub.f32 %v2287_v47, %v2319_v26  ;;  %v2794_v11 = vmul.f32 %v2762_v62, %v5795_v55  ;;  %v1820_v4 = vmul.f32 %v1788_v9, %v5815_v48 }
 0x22a   :  { %v1281_v15 = vadd.f32 0.5, %v1249_v34  ;;  %v2011_v56 = vadd.f32 %v1979_v28, %v5749_v39  ;;  %v2603_v5 = vmul.f32 -2.5052108e-08, %v5846_v8  ;;  %vm2380_vm12 = vcmp.gt.f32.partialorder %v5725_v40, 1.5707964 }
 0x22b   :  { %v2192_v58 = vadd.f32 0.5, %v2160_v57  ;;  %v2826_v42 = vadd.f32 -0.16666667, %v2794_v11  ;;  %v1852_v39 = vadd.f32 0.008333333, %v1820_v4  ;;  %v2444_v47 = vsel %vm2380_vm12, %v2412_v50, %v5725_v40 }
 0x22c   :  { %v1313_v0 = vfloor.f32 %v1281_v15  ;;  %v2635_v25 = vadd.f32 2.7557319e-06, %v2603_v5  ;;  %v2415_v33 = vsub.f32 3.1415927, %v5849_v61  ;;  %v5879_v15 = vmul.f32 %v5859_v37, %v5859_v37 }
 0x22d   :  { %v2224_v7 = vfloor.f32 %v2192_v58  ;;  %2125 = vmatmul.f32.gmra.mxu2 %v2011_v56  ;;  %v2858_v16 = vmul.f32 %v2826_v42, %v5795_v55  ;;  %v1884_v34 = vmul.f32 %v1852_v39, %v5815_v48  ;;  %vm2476_vm13 = vcmp.lt.f32.partialorder %v2444_v47, -1.5707964 }
 0x22e   :  { %v1345_v63 = vmul.f32 6.28125, %v1313_v0  ;;  %v1409_v51 = vmul.f32 0.0019353072, %v1313_v0  ;;  %v2667_v18 = vmul.f32 %v2635_v25, %v5846_v8  ;;  %v1693_v44 = vmul.f32 -2.5052108e-08, %v5879_v15 }
 0x22f   :  { %v1214_v46 = vpop.f32.mrf.mxu1  ;;  %v2890_v14 = vmul.f32 %v2858_v16, %v5791_v43  ;;  %v2256_v49 = vmul.f32 6.28125, %v2224_v7  ;;  %v1916_v55 = vadd.f32 -0.16666667, %v1884_v34  ;;  %v2320_v2 = vmul.f32 0.0019353072, %v2224_v7 }
 0x230   :  { %v5856_v38 = vadd.f32 %v5738_v17, %v1214_v46  ;;  %v1377_v24 = vsub.f32 %v5811_v53, %v1345_v63  ;;  %v2699_v57 = vadd.f32 -0.0001984127, %v2667_v18  ;;  %v1725_v62 = vadd.f32 2.7557319e-06, %v1693_v44 }
 0x231   :  { %v2922_v36 = vadd.f32 %v2890_v14, %v5791_v43  ;;  %v1948_v0 = vmul.f32 %v1916_v55, %v5815_v48  ;;  %v2508_v58 = vsub.f32 -3.1415927, %v2444_v47  ;;  %vm1471_vm14 = vcmp.gt.f32.partialorder %v5779_v30, 1.5707964 }
 0x232   :  { %v2081_v27 = vpop.f32.mrf.mxu2  ;;  %v1250_v3 = vmul.f32 0.15915494, %v5856_v38  ;;  %v5887_v41 = vsub.f32 %v1377_v24, %v1409_v51  ;;  %v2731_v26 = vmul.f32 %v2699_v57, %v5846_v8  ;;  %v2288_v43 = vsub.f32 %v5823_v1, %v2256_v49 }
 0x233   :  { %v5868_v20 = vadd.f32 %v5499_v19, %v2081_v27  ;;  %2992 = vmatmul.f32.gmra.mxu3 %v2922_v36  ;;  %v1980_v28 = vmul.f32 %v1948_v0, %v5804_v60  ;;  %v1598_v50 = vsub.f32 -3.1415927, %v1534_v59  ;;  %v1757_v48 = vmul.f32 %v1725_v62, %v5879_v15 }
 0x234   :  { %v1282_v22 = vadd.f32 0.5, %v1250_v3  ;;  %v2763_v9 = vadd.f32 0.008333333, %v2731_v26  ;;  %v5896_v45 = vsel %vm2476_vm13, %v2508_v58, %v2444_v47  ;;  %vm1566_vm15 = vcmp.lt.f32.partialorder %v1534_v59, -1.5707964 }
 0x235   :  { %v2161_v32 = vmul.f32 0.15915494, %v5868_v20  ;;  %v2012_v11 = vadd.f32 %v1980_v28, %v5804_v60  ;;  %v5902_v1 = vmul.f32 %v5896_v45, %v5896_v45  ;;  %v1789_v42 = vadd.f32 -0.0001984127, %v1757_v48 }
 0x236   :  { %v1314_v53 = vfloor.f32 %v1282_v22  ;;  %v2795_v63 = vmul.f32 %v2763_v9, %v5846_v8  ;;  %v5910_v27 = vsub.f32 %v2288_v43, %v2320_v2  ;;  %v5912_v25 = vsel %vm1566_vm15, %v1598_v50, %v1534_v59 }
 0x237   :  { %v2193_v29 = vadd.f32 0.5, %v2161_v32  ;;  %2128 = vmatmul.f32.gmra.mxu2 %v2012_v11  ;;  %v1821_v16 = vmul.f32 %v1789_v42, %v5879_v15  ;;  %v2604_v24 = vmul.f32 -2.5052108e-08, %v5902_v1  ;;  %v5923_v18 = vmul.f32 %v5912_v25, %v5912_v25 }
 0x238   :  { %v1346_v13 = vmul.f32 6.28125, %v1314_v53  ;;  %v1410_v56 = vmul.f32 0.0019353072, %v1314_v53  ;;  %v2827_v60 = vadd.f32 -0.16666667, %v2795_v63  ;;  %v1535_v26 = vsel %vm1471_vm14, %v1503_v23, %v5779_v30 }
 0x239   :  { %v2225_v31 = vfloor.f32 %v2193_v29  ;;  %vm2381_vm0 = vcmp.gt.f32.partialorder %v5754_v21, 1.5707964  ;;  %v1853_v22 = vadd.f32 0.008333333, %v1821_v16  ;;  %v2636_v32 = vadd.f32 2.7557319e-06, %v2604_v24 }
 0x23a   :  { %v1217_v40 = vpop.f32.mrf.mxu1  ;;  %v1378_v46 = vsub.f32 %v5856_v38, %v1346_v13  ;;  %v2445_v14 = vsel %vm2381_vm0, %v2413_v52, %v5754_v21  ;;  %v1694_v57 = vmul.f32 -2.5052108e-08, %v5923_v18  ;;  %vm1472_vm1 = vcmp.gt.f32.partialorder %v5834_v54, 1.5707964 }
 0x23b   :  { %v2257_v5 = vmul.f32 6.28125, %v2225_v31  ;;  %v5905_v7 = vadd.f32 %v5738_v17, %v1217_v40  ;;  %v2321_v39 = vmul.f32 0.0019353072, %v2225_v31  ;;  %v2859_v17 = vmul.f32 %v2827_v60, %v5846_v8 }
 0x23c   :  { %v2084_v4 = vpop.f32.mrf.mxu2  ;;  %v5914_v3 = vsub.f32 %v1378_v46, %v1410_v56  ;;  %v1885_v53 = vmul.f32 %v1853_v22, %v5879_v15  ;;  %v2668_v29 = vmul.f32 %v2636_v32, %v5902_v1  ;;  %vm2477_vm2 = vcmp.lt.f32.partialorder %v2445_v14, -1.5707964 }
 0x23d   :  { %v5908_v38 = vadd.f32 %v5499_v19, %v2084_v4  ;;  %v1251_v51 = vmul.f32 0.15915494, %v5905_v7  ;;  %v2289_v59 = vsub.f32 %v5868_v20, %v2257_v5  ;;  %v2891_v49 = vmul.f32 %v2859_v17, %v5841_v6 }
 0x23e   :  { %v2509_v20 = vsub.f32 -3.1415927, %v2445_v14  ;;  %v1726_v47 = vadd.f32 2.7557319e-06, %v1694_v57  ;;  %v1917_v21 = vadd.f32 -0.16666667, %v1885_v53 }
 0x23f   :  { %v2162_v34 = vmul.f32 0.15915494, %v5908_v38  ;;  %v1283_v55 = vadd.f32 0.5, %v1251_v51  ;;  %v2923_v36 = vadd.f32 %v2891_v49, %v5841_v6  ;;  %v2700_v52 = vadd.f32 -0.0001984127, %v2668_v29 }
 0x240   :  { %v5936_v0 = vsel %vm2477_vm2, %v2509_v20, %v2445_v14  ;;  %v1505_v13 = vsub.f32 3.1415927, %v5887_v41  ;;  %v2416_v31 = vsub.f32 3.1415927, %v5910_v27  ;;  %v5945_v62 = vsub.f32 %v2289_v59, %v2321_v39 }
 0x241   :  { %v2194_v8 = vadd.f32 0.5, %v2162_v34  ;;  %v1315_v2 = vfloor.f32 %v1283_v55  ;;  %2995 = vmatmul.f32.gmra.mxu3 %v2923_v36  ;;  %v1949_v43 = vmul.f32 %v1917_v21, %v5879_v15  ;;  %v2732_v28 = vmul.f32 %v2700_v52, %v5902_v1 }
 0x242   :  { %v1758_v9 = vmul.f32 %v1726_v47, %v5923_v18  ;;  %v5952_v40 = vmul.f32 %v5936_v0, %v5936_v0  ;;  %v1506_v30 = vsub.f32 3.1415927, %v5914_v3  ;;  %vm1567_vm3 = vcmp.lt.f32.partialorder %v1535_v26, -1.5707964  ;;  %v5997_v47 = vld [vmem:[%s7538_s6] ss:$0 sm:$0xff] }
 0x243   :  { %v2226_v44 = vfloor.f32 %v2194_v8  ;;  %v1347_v6 = vmul.f32 6.28125, %v1315_v2  ;;  %v1981_v46 = vmul.f32 %v1949_v43, %v5859_v37  ;;  %v2764_v48 = vadd.f32 0.008333333, %v2732_v28 }
 0x244   :  { %v1790_v11 = vadd.f32 -0.0001984127, %v1758_v9  ;;  %v2605_v15 = vmul.f32 -2.5052108e-08, %v5952_v40  ;;  %v2417_v63 = vsub.f32 3.1415927, %v5945_v62 }
 0x245   :  { %v2258_v23 = vmul.f32 6.28125, %v2226_v44  ;;  %v1379_v56 = vsub.f32 %v5905_v7, %v1347_v6  ;;  %v1599_v5 = vsub.f32 -3.1415927, %v1535_v26  ;;  %v2013_v42 = vadd.f32 %v1981_v46, %v5859_v37 }
 0x246   :  { %v2087_v58 = vpop.f32.mrf.mxu2  ;;  %v2796_v60 = vmul.f32 %v2764_v48, %v5902_v1  ;;  %v2637_v39 = vadd.f32 2.7557319e-06, %v2605_v15  ;;  %v1411_v16 = vmul.f32 0.0019353072, %v1315_v2  ;;  %v2322_v51 = vmul.f32 0.0019353072, %v2226_v44 }
 0x247   :  { %v5956_v50 = vadd.f32 %v5499_v19, %v2087_v58  ;;  %v1822_v19 = vmul.f32 %v1790_v11, %v5923_v18  ;;  %v2290_v24 = vsub.f32 %v5908_v38, %v2258_v23  ;;  %v5968_v17 = vsel %vm1567_vm3, %v1599_v5, %v1535_v26  ;;  %2131 = vmatmul.f32.gmra.mxu2 %v2013_v42 }
 0x248   :  { %v2828_v34 = vadd.f32 -0.16666667, %v2796_v60  ;;  %v2669_v59 = vmul.f32 %v2637_v39, %v5952_v40  ;;  %v5971_v32 = vsub.f32 %v1379_v56, %v1411_v16  ;;  %v5975_v37 = vmul.f32 %v5968_v17, %v5968_v17 }
 0x249   :  { %v2163_v4 = vmul.f32 0.15915494, %v5956_v50  ;;  %v1854_v7 = vadd.f32 0.008333333, %v1822_v19  ;;  %vm2382_vm4 = vcmp.gt.f32.partialorder %v5799_v10, 1.5707964  ;;  %v1536_v38 = vsel %vm1472_vm1, %v1504_v12, %v5834_v54 }
 0x24a   :  { %vm1473_vm5 = vcmp.gt.f32.partialorder %v5887_v41, 1.5707964  ;;  %v2860_v14 = vmul.f32 %v2828_v34, %v5902_v1  ;;  %v2701_v55 = vadd.f32 -0.0001984127, %v2669_v59  ;;  %v5986_v57 = vsub.f32 %v2290_v24, %v2322_v51 }
 0x24b   :  { %v2195_v22 = vadd.f32 0.5, %v2163_v4  ;;  %v1886_v49 = vmul.f32 %v1854_v7, %v5923_v18  ;;  %v1695_v53 = vmul.f32 -2.5052108e-08, %v5975_v37  ;;  %v2446_v29 = vsel %vm2382_vm4, %v2414_v35, %v5799_v10 }
 0x24c   :  { %v1600_v36 = vsub.f32 -3.1415927, %v1536_v38  ;;  %v2892_v54 = vmul.f32 %v2860_v14, %v5896_v45  ;;  %v2733_v2 = vmul.f32 %v2701_v55, %v5952_v40  ;;  %vm1568_vm6 = vcmp.lt.f32.partialorder %v1536_v38, -1.5707964 }
 0x24d   :  { %v2227_v8 = vfloor.f32 %v2195_v22  ;;  %v1918_v12 = vadd.f32 -0.16666667, %v1886_v49  ;;  %v1727_v44 = vadd.f32 2.7557319e-06, %v1695_v53  ;;  %vm2383_vm7 = vcmp.gt.f32.partialorder %v5849_v61, 1.5707964 }
 0x24e   :  { %v2924_v10 = vadd.f32 %v2892_v54, %v5896_v45  ;;  %v2765_v52 = vadd.f32 0.008333333, %v2733_v2  ;;  %vm2478_vm8 = vcmp.lt.f32.partialorder %v2446_v29, -1.5707964  ;;  %v2510_v6 = vsub.f32 -3.1415927, %v2446_v29 }
 0x24f   :  { %v2259_v1 = vmul.f32 6.28125, %v2227_v8  ;;  %v1950_v35 = vmul.f32 %v1918_v12, %v5923_v18  ;;  %v1759_v26 = vmul.f32 %v1727_v44, %v5975_v37  ;;  %v6007_v43 = vsel %vm1568_vm6, %v1600_v36, %v1536_v38 }
 0x250   :  { %v2090_v20 = vpop.f32.mrf.mxu2  ;;  %2998 = vmatmul.f32.gmra.mxu3 %v2924_v10  ;;  %v1507_v28 = vsub.f32 3.1415927, %v5971_v32  ;;  %v2797_v23 = vmul.f32 %v2765_v52, %v5952_v40  ;;  %v6014_v45 = vmul.f32 %v6007_v43, %v6007_v43  ;;  %v6016_v46 = vsel %vm2478_vm8, %v2510_v6, %v2446_v29 }
 0x251   :  { %v6000_v21 = vadd.f32 %v5997_v47, %v2090_v20  ;;  %v1982_v9 = vmul.f32 %v1950_v35, %v5912_v25  ;;  %v1791_v18 = vadd.f32 -0.0001984127, %v1759_v26  ;;  %v2447_v11 = vsel %vm2383_vm7, %v2415_v33, %v5849_v61 }
 0x252   :  { %v2418_v15 = vsub.f32 3.1415927, %v5986_v57  ;;  %v2829_v4 = vadd.f32 -0.16666667, %v2797_v23  ;;  %v6027_v5 = vmul.f32 %v6016_v46, %v6016_v46  ;;  %v2291_v42 = vsub.f32 %v5956_v50, %v2259_v1 }
 0x253   :  { %v2164_v58 = vmul.f32 0.15915494, %v6000_v21  ;;  %v2014_v56 = vadd.f32 %v1982_v9, %v5912_v25  ;;  %v1823_v60 = vmul.f32 %v1791_v18, %v5975_v37  ;;  %v1696_v19 = vmul.f32 -2.5052108e-08, %v6014_v45 }
 0x254   :  { %vm2479_vm9 = vcmp.lt.f32.partialorder %v2447_v11, -1.5707964  ;;  %vm1474_vm10 = vcmp.gt.f32.partialorder %v5914_v3, 1.5707964  ;;  %v2861_v61 = vmul.f32 %v2829_v4, %v5952_v40  ;;  %v2606_v33 = vmul.f32 -2.5052108e-08, %v6027_v5 }
 0x255   :  { %v2196_v48 = vadd.f32 0.5, %v2164_v58  ;;  %2134 = vmatmul.f32.gmra.mxu2 %v2014_v56  ;;  %v2511_v25 = vsub.f32 -3.1415927, %v2447_v11  ;;  %v2323_v24 = vmul.f32 0.0019353072, %v2227_v8  ;;  %v1537_v34 = vsel %vm1473_vm5, %v1505_v13, %v5887_v41 }
 0x256   :  { %v1855_v51 = vadd.f32 0.008333333, %v1823_v60  ;;  %v2893_v7 = vmul.f32 %v2861_v61, %v5936_v0  ;;  %v2638_v59 = vadd.f32 2.7557319e-06, %v2606_v33  ;;  %v1728_v22 = vadd.f32 2.7557319e-06, %v1696_v19 }
 0x257   :  { %v2228_v50 = vfloor.f32 %v2196_v48  ;;  %v6044_v40 = vsel %vm2479_vm9, %v2511_v25, %v2447_v11  ;;  %v6046_v38 = vsub.f32 %v2291_v42, %v2323_v24  ;;  %vm1569_vm11 = vcmp.lt.f32.partialorder %v1537_v34, -1.5707964 }
 0x258   :  { %v2093_v39 = vpop.f32.mrf.mxu2  ;;  %v1887_v14 = vmul.f32 %v1855_v51, %v5975_v37  ;;  %v6051_v49 = vmul.f32 %v6044_v40, %v6044_v40  ;;  %v2925_v8 = vadd.f32 %v2893_v7, %v5936_v0  ;;  %v2670_v41 = vmul.f32 %v2638_v59, %v6027_v5 }
 0x259   :  { %v6036_v16 = vadd.f32 %v5997_v47, %v2093_v39  ;;  %v1760_v13 = vmul.f32 %v1728_v22, %v6014_v45  ;;  %v2260_v29 = vmul.f32 6.28125, %v2228_v50  ;;  %v1601_v2 = vsub.f32 -3.1415927, %v1537_v34 }
 0x25a   :  { %v1919_v53 = vadd.f32 -0.16666667, %v1887_v14  ;;  %v2607_v20 = vmul.f32 -2.5052108e-08, %v6051_v49  ;;  %3001 = vmatmul.f32.gmra.mxu3 %v2925_v8  ;;  %v2702_v54 = vadd.f32 -0.0001984127, %v2670_v41 }
 0x25b   :  { %v2165_v55 = vmul.f32 0.15915494, %v6036_v16  ;;  %v1792_v12 = vadd.f32 -0.0001984127, %v1760_v13  ;;  %v2419_v1 = vsub.f32 3.1415927, %v6046_v38  ;;  %v6064_v26 = vsel %vm1569_vm11, %v1601_v2, %v1537_v34 }
 0x25c   :  { %v1951_v44 = vmul.f32 %v1919_v53, %v5975_v37  ;;  %v2324_v0 = vmul.f32 0.0019353072, %v2228_v50  ;;  %v2639_v10 = vadd.f32 2.7557319e-06, %v2607_v20  ;;  %v2734_v35 = vmul.f32 %v2702_v54, %v6027_v5 }
 0x25d   :  { %v6058_v36 = vadd.f32 0.5, %v2165_v55  ;;  %v1824_v52 = vmul.f32 %v1792_v12, %v6014_v45  ;;  %vm2384_vm12 = vcmp.gt.f32.partialorder %v5910_v27, 1.5707964  ;;  %v2292_v9 = vsub.f32 %v6000_v21, %v2260_v29 }
 0x25e   :  { %v1983_v58 = vmul.f32 %v1951_v44, %v5968_v17  ;;  %v2671_v23 = vmul.f32 %v2639_v10, %v6051_v49  ;;  %v2766_v37 = vadd.f32 0.008333333, %v2734_v35  ;;  %v6073_v11 = vmul.f32 %v6064_v26, %v6064_v26 }
 0x25f   :  { %v2229_v18 = vfloor.f32 %v6058_v36  ;;  %v1856_v48 = vadd.f32 0.008333333, %v1824_v52  ;;  %v2448_v56 = vsel %vm2384_vm12, %v2416_v31, %v5910_v27  ;;  %v1538_v21 = vsel %vm1474_vm10, %v1506_v30, %v5914_v3 }
 0x260   :  { %v2096_v6 = vpop.f32.mrf.mxu2  ;;  %v2015_v4 = vadd.f32 %v1983_v58, %v5968_v17  ;;  %v2703_v42 = vadd.f32 -0.0001984127, %v2671_v23  ;;  %vm2480_vm13 = vcmp.lt.f32.partialorder %v2448_v56, -1.5707964  ;;  %v2798_v60 = vmul.f32 %v2766_v37, %v6027_v5 }
 0x261   :  { %v1888_v19 = vmul.f32 %v1856_v48, %v6014_v45  ;;  %v1697_v39 = vmul.f32 -2.5052108e-08, %v6073_v11  ;;  %v2512_v61 = vsub.f32 -3.1415927, %v2448_v56  ;;  %v6087_v33 = vsub.f32 %v2292_v9, %v2324_v0 }
 0x262   :  { %2137 = vmatmul.f32.gmra.mxu2 %v2015_v4  ;;  %v2735_v27 = vmul.f32 %v2703_v42, %v6051_v49  ;;  %v2261_v31 = vmul.f32 6.28125, %v2229_v18  ;;  %v6091_v17 = vadd.f32 %v5997_v47, %v2096_v6  ;;  %vm1475_vm14 = vcmp.gt.f32.partialorder %v5971_v32, 1.5707964 }
 0x263   :  { %v2830_v25 = vadd.f32 -0.16666667, %v2798_v60  ;;  %v1920_v3 = vadd.f32 -0.16666667, %v1888_v19  ;;  %v1729_v30 = vadd.f32 2.7557319e-06, %v1697_v39  ;;  %v6094_v24 = vsel %vm2480_vm13, %v2512_v61, %v2448_v56 }
 0x264   :  { %v2767_v51 = vadd.f32 0.008333333, %v2735_v27  ;;  %v6098_v50 = vmul.f32 %v6094_v24, %v6094_v24  ;;  %v2166_v34 = vmul.f32 0.15915494, %v6091_v17  ;;  %vm1570_vm15 = vcmp.lt.f32.partialorder %v1538_v21, -1.5707964 }
 0x265   :  { %v2862_v7 = vmul.f32 %v2830_v25, %v6027_v5  ;;  %v1952_v59 = vmul.f32 %v1920_v3, %v6014_v45  ;;  %v1761_v22 = vmul.f32 %v1729_v30, %v6073_v11  ;;  %v1602_v14 = vsub.f32 -3.1415927, %v1538_v21 }
 0x266   :  { %v2799_v55 = vmul.f32 %v2767_v51, %v6051_v49  ;;  %v2608_v8 = vmul.f32 -2.5052108e-08, %v6098_v50  ;;  %v2198_v41 = vadd.f32 0.5, %v2166_v34  ;;  %vm2385_vm0 = vcmp.gt.f32.partialorder %v5945_v62, 1.5707964 }
 0x267   :  { %v2894_v13 = vmul.f32 %v2862_v7, %v6016_v46  ;;  %v1984_v53 = vmul.f32 %v1952_v59, %v6007_v43  ;;  %v1793_v29 = vadd.f32 -0.0001984127, %v1761_v22  ;;  %v6109_v20 = vsel %vm1570_vm15, %v1602_v14, %v1538_v21 }
 0x268   :  { %v2099_v5 = vpop.f32.mrf.mxu2  ;;  %v2831_v36 = vadd.f32 -0.16666667, %v2799_v55  ;;  %v2640_v45 = vadd.f32 2.7557319e-06, %v2608_v8  ;;  %v2230_v54 = vfloor.f32 %v2198_v41  ;;  %v6113_v12 = vmul.f32 %v6109_v20, %v6109_v20 }
 0x269   :  { %v2926_v2 = vadd.f32 %v2894_v13, %v6016_v46  ;;  %v2016_v44 = vadd.f32 %v1984_v53, %v6007_v43  ;;  %v1825_v0 = vmul.f32 %v1793_v29, %v6073_v11  ;;  %v2449_v10 = vsel %vm2385_vm0, %v2417_v63, %v5945_v62 }
 0x26a   :  { %v2420_v35 = vsub.f32 3.1415927, %v6087_v33  ;;  %v2863_v52 = vmul.f32 %v2831_v36, %v6051_v49  ;;  %v2672_v6 = vmul.f32 %v2640_v45, %v6098_v50  ;;  %v2262_v58 = vmul.f32 6.28125, %v2230_v54 }
 0x26b   :  { %3004 = vmatmul.f32.gmra.mxu3 %v2926_v2  ;;  %2140 = vmatmul.f32.gmra.mxu2 %v2016_v44  ;;  %v1857_v9 = vadd.f32 0.008333333, %v1825_v0  ;;  %v1698_v46 = vmul.f32 -2.5052108e-08, %v6113_v12  ;;  %vm2481_vm1 = vcmp.lt.f32.partialorder %v2449_v10, -1.5707964  ;;  %v6126_v43 = vadd.f32 %v5997_v47, %v2099_v5 }
 0x26c   :  { %v2895_v23 = vmul.f32 %v2863_v52, %v6044_v40  ;;  %v2293_v62 = vsub.f32 %v6036_v16, %v2261_v31  ;;  %v2704_v63 = vadd.f32 -0.0001984127, %v2672_v6  ;;  %v2513_v37 = vsub.f32 -3.1415927, %v2449_v10 }
 0x26d   :  { %v2325_v48 = vmul.f32 0.0019353072, %v2229_v18  ;;  %v1889_v49 = vmul.f32 %v1857_v9, %v6073_v11  ;;  %v1730_v56 = vadd.f32 2.7557319e-06, %v1698_v46  ;;  %v2167_v4 = vmul.f32 0.15915494, %v6126_v43 }
 0x26e   :  { %v2736_v42 = vmul.f32 %v2704_v63, %v6098_v50  ;;  %v2294_v21 = vsub.f32 %v6091_v17, %v2262_v58  ;;  %v6134_v60 = vsel %vm2481_vm1, %v2513_v37, %v2449_v10  ;;  %v1539_v16 = vsel %vm1475_vm14, %v1507_v28, %v5971_v32 }
 0x26f   :  { %v2927_v19 = vadd.f32 %v2895_v23, %v6044_v40  ;;  %v1921_v18 = vadd.f32 -0.16666667, %v1889_v49  ;;  %v1762_v39 = vmul.f32 %v1730_v56, %v6113_v12  ;;  %v6145_v61 = vmul.f32 %v6134_v60, %v6134_v60 }
 0x270   :  { %v6147_v27 = vsub.f32 %v2293_v62, %v2325_v48  ;;  %v2768_v31 = vadd.f32 0.008333333, %v2736_v42  ;;  %v2326_v17 = vmul.f32 0.0019353072, %v2230_v54  ;;  %v2199_v25 = vadd.f32 0.5, %v2167_v4  ;;  %v2102_v32 = vpop.f32.mrf.mxu2 }
 0x271   :  { %v1953_v3 = vmul.f32 %v1921_v18, %v6073_v11  ;;  %v1794_v30 = vadd.f32 -0.0001984127, %v1762_v39  ;;  %v2609_v51 = vmul.f32 -2.5052108e-08, %v6145_v61  ;;  %vm1571_vm2 = vcmp.lt.f32.partialorder %v1539_v16, -1.5707964 }
 0x272   :  { %v2800_v28 = vmul.f32 %v2768_v31, %v6098_v50  ;;  %v6152_v40 = vsub.f32 %v2294_v21, %v2326_v17  ;;  %v1603_v34 = vsub.f32 -3.1415927, %v1539_v16  ;;  %vm2386_vm3 = vcmp.gt.f32.partialorder %v5986_v57, 1.5707964 }
 0x273   :  { %3007 = vmatmul.f32.gmra.mxu3 %v2927_v19  ;;  %v1985_v7 = vmul.f32 %v1953_v3, %v6064_v26  ;;  %v1826_v59 = vmul.f32 %v1794_v30, %v6113_v12  ;;  %v2641_v22 = vadd.f32 2.7557319e-06, %v2609_v51  ;;  %v6158_v11 = vadd.f32 %v5997_v47, %v2102_v32 }
 0x274   :  { %v2421_v14 = vsub.f32 3.1415927, %v6147_v27  ;;  %v2832_v55 = vadd.f32 -0.16666667, %v2800_v28  ;;  %v6161_v8 = vsel %vm1571_vm2, %v1603_v34, %v1539_v16  ;;  %v2450_v41 = vsel %vm2386_vm3, %v2418_v15, %v5986_v57 }
 0x275   :  { %v2017_v13 = vadd.f32 %v1985_v7, %v6064_v26  ;;  %v1858_v53 = vadd.f32 0.008333333, %v1826_v59  ;;  %v2673_v29 = vmul.f32 %v2641_v22, %v6145_v61  ;;  %v2231_v5 = vfloor.f32 %v2199_v25 }
 0x276   :  { %v2864_v36 = vmul.f32 %v2832_v55, %v6098_v50  ;;  %v6171_v45 = vmul.f32 %v6161_v8, %v6161_v8  ;;  %vm2482_vm4 = vcmp.lt.f32.partialorder %v2450_v41, -1.5707964  ;;  %v2514_v54 = vsub.f32 -3.1415927, %v2450_v41 }
 0x277   :  { %2143 = vmatmul.f32.gmra.mxu2 %v2017_v13  ;;  %v2422_v2 = vsub.f32 3.1415927, %v6152_v40  ;;  %v1890_v44 = vmul.f32 %v1858_v53, %v6113_v12  ;;  %v2705_v57 = vadd.f32 -0.0001984127, %v2673_v29  ;;  %v2168_v15 = vmul.f32 0.15915494, %v6158_v11 }
 0x278   :  { %v2896_v26 = vmul.f32 %v2864_v36, %v6094_v24  ;;  %v1699_v0 = vmul.f32 -2.5052108e-08, %v6171_v45  ;;  %v6178_v10 = vsel %vm2482_vm4, %v2514_v54, %v2450_v41  ;;  %vm2387_vm5 = vcmp.gt.f32.partialorder %v6046_v38, 1.5707964  ;;  %v2105_v9 = vpop.f32.mrf.mxu2 }
 0x279   :  { %v1922_v50 = vadd.f32 -0.16666667, %v1890_v44  ;;  %v2737_v52 = vmul.f32 %v2705_v57, %v6145_v61  ;;  %v2263_v6 = vmul.f32 6.28125, %v2231_v5  ;;  %v6184_v58 = vmul.f32 %v6178_v10, %v6178_v10 }
 0x27a   :  { %v2928_v46 = vadd.f32 %v2896_v26, %v6094_v24  ;;  %v1731_v23 = vadd.f32 2.7557319e-06, %v1699_v0  ;;  %v2200_v62 = vadd.f32 0.5, %v2168_v15  ;;  %v2451_v63 = vsel %vm2387_vm5, %v2419_v1, %v6046_v38 }
 0x27b   :  { %v1954_v37 = vmul.f32 %v1922_v50, %v6113_v12  ;;  %v2769_v48 = vadd.f32 0.008333333, %v2737_v52  ;;  %v2610_v49 = vmul.f32 -2.5052108e-08, %v6184_v58  ;;  %vm2483_vm6 = vcmp.lt.f32.partialorder %v2451_v63, -1.5707964 }
 0x27c   :  { %3010 = vmatmul.f32.gmra.mxu3 %v2928_v46  ;;  %v1763_v56 = vmul.f32 %v1731_v23, %v6171_v45  ;;  %v2232_v4 = vfloor.f32 %v2200_v62  ;;  %v2515_v42 = vsub.f32 -3.1415927, %v2451_v63  ;;  %v6194_v21 = vadd.f32 %v5997_v47, %v2105_v9 }
 0x27d   :  { %v1986_v24 = vmul.f32 %v1954_v37, %v6109_v20  ;;  %v2801_v16 = vmul.f32 %v2769_v48, %v6145_v61  ;;  %v2642_v19 = vadd.f32 2.7557319e-06, %v2610_v49  ;;  %vm2388_vm7 = vcmp.gt.f32.partialorder %v6087_v33, 1.5707964 }
 0x27e   :  { %v2295_v38 = vsub.f32 %v6126_v43, %v2263_v6  ;;  %v2327_v1 = vmul.f32 0.0019353072, %v2231_v5  ;;  %v1795_v12 = vadd.f32 -0.0001984127, %v1763_v56  ;;  %v6200_v18 = vsel %vm2483_vm6, %v2515_v42, %v2451_v63 }
 0x27f   :  { %v2018_v39 = vadd.f32 %v1986_v24, %v6109_v20  ;;  %v2833_v31 = vadd.f32 -0.16666667, %v2801_v16  ;;  %v2674_v17 = vmul.f32 %v2642_v19, %v6184_v58  ;;  %v6206_v25 = vmul.f32 %v6200_v18, %v6200_v18 }
 0x280   :  { %v1827_v3 = vmul.f32 %v1795_v12, %v6171_v45  ;;  %v2264_v30 = vmul.f32 6.28125, %v2232_v4  ;;  %v2169_v51 = vmul.f32 0.15915494, %v6194_v21  ;;  %v2452_v43 = vsel %vm2388_vm7, %v2420_v35, %v6087_v33  ;;  %v2108_v34 = vpop.f32.mrf.mxu2 }
 0x281   :  { %2146 = vmatmul.f32.gmra.mxu2 %v2018_v39  ;;  %v2865_v32 = vmul.f32 %v2833_v31, %v6145_v61  ;;  %v2706_v20 = vadd.f32 -0.0001984127, %v2674_v17  ;;  %v2611_v28 = vmul.f32 -2.5052108e-08, %v6206_v25  ;;  %vm2484_vm8 = vcmp.lt.f32.partialorder %v2452_v43, -1.5707964 }
 0x282   :  { %v6215_v7 = vsub.f32 %v2295_v38, %v2327_v1  ;;  %v1859_v59 = vadd.f32 0.008333333, %v1827_v3  ;;  %v2201_v22 = vadd.f32 0.5, %v2169_v51  ;;  %v2516_v55 = vsub.f32 -3.1415927, %v2452_v43 }
 0x283   :  { %v2897_v41 = vmul.f32 %v2865_v32, %v6134_v60  ;;  %v2738_v13 = vmul.f32 %v2706_v20, %v6184_v58  ;;  %v2643_v53 = vadd.f32 2.7557319e-06, %v2611_v28  ;;  %v6220_v33 = vadd.f32 %v5997_v47, %v2108_v34 }
 0x284   :  { %v1891_v35 = vmul.f32 %v1859_v59, %v6171_v45  ;;  %v2296_v61 = vsub.f32 %v6158_v11, %v2264_v30  ;;  %v2233_v29 = vfloor.f32 %v2201_v22  ;;  %v6224_v5 = vsel %vm2484_vm8, %v2516_v55, %v2452_v43 }
 0x285   :  { %v2929_v36 = vadd.f32 %v2897_v41, %v6134_v60  ;;  %v2770_v54 = vadd.f32 0.008333333, %v2738_v13  ;;  %v2675_v44 = vmul.f32 %v2643_v53, %v6206_v25  ;;  %v6230_v57 = vmul.f32 %v6224_v5, %v6224_v5 }
 0x286   :  { %v2423_v15 = vsub.f32 3.1415927, %v6215_v7  ;;  %v1923_v26 = vadd.f32 -0.16666667, %v1891_v35  ;;  %v2328_v0 = vmul.f32 0.0019353072, %v2232_v4 }
 0x287   :  { %3013 = vmatmul.f32.gmra.mxu3 %v2929_v36  ;;  %v2802_v50 = vmul.f32 %v2770_v54, %v6184_v58  ;;  %v2707_v11 = vadd.f32 -0.0001984127, %v2675_v44  ;;  %v2612_v52 = vmul.f32 -2.5052108e-08, %v6230_v57  ;;  %v2170_v6 = vmul.f32 0.15915494, %v6220_v33 }
 0x288   :  { %v1955_v60 = vmul.f32 %v1923_v26, %v6171_v45  ;;  %v6237_v9 = vsub.f32 %v2296_v61, %v2328_v0  ;;  %v2265_v46 = vmul.f32 6.28125, %v2233_v29  ;;  %vm2389_vm9 = vcmp.gt.f32.partialorder %v6147_v27, 1.5707964  ;;  %v2111_v48 = vpop.f32.mrf.mxu2 }
 0x289   :  { %v2834_v23 = vadd.f32 -0.16666667, %v2802_v50  ;;  %v2739_v62 = vmul.f32 %v2707_v11, %v6206_v25  ;;  %v2644_v63 = vadd.f32 2.7557319e-06, %v2612_v52  ;;  %v2202_v37 = vadd.f32 0.5, %v2170_v6 }
 0x28a   :  { %v1987_v49 = vmul.f32 %v1955_v60, %v6161_v8  ;;  %v2453_v56 = vsel %vm2389_vm9, %v2421_v14, %v6147_v27  ;;  %v6246_v4 = vadd.f32 %v5997_v47, %v2111_v48  ;;  %vm2390_vm10 = vcmp.gt.f32.partialorder %v6152_v40, 1.5707964  ;;  %v3901_v48 = vld [vmem:[%s7541_s9 + $0x78] sm:$0xff] }
 0x28b   :  { %v2866_v45 = vmul.f32 %v2834_v23, %v6184_v58  ;;  %v2771_v42 = vadd.f32 0.008333333, %v2739_v62  ;;  %v2676_v24 = vmul.f32 %v2644_v63, %v6230_v57  ;;  %v2234_v16 = vfloor.f32 %v2202_v37  ;;  %3906 = vmatpush.msrb.mxu0 %v3901_v48  ;;  %4091 = vmatpush.msra.mxu3 %v3901_v48  ;;  %v6366_v48 = vld [vmem:[%s7540_s8] ss:$0 sm:$0xff] }
 0x28c   :  { %v2019_v19 = vadd.f32 %v1987_v49, %v6161_v8  ;;  %v2424_v38 = vsub.f32 3.1415927, %v6237_v9  ;;  %vm2485_vm11 = vcmp.lt.f32.partialorder %v2453_v56, -1.5707964  ;;  %v2517_v1 = vsub.f32 -3.1415927, %v2453_v56 }
 0x28d   :  { %v2898_v12 = vmul.f32 %v2866_v45, %v6178_v10  ;;  %v2803_v27 = vmul.f32 %v2771_v42, %v6206_v25  ;;  %v2297_v14 = vsub.f32 %v6194_v21, %v2265_v46  ;;  %v2708_v39 = vadd.f32 -0.0001984127, %v2676_v24 }
 0x28e   :  { %2149 = vmatmul.f32.gmra.mxu2 %v2019_v19  ;;  %v2329_v31 = vmul.f32 0.0019353072, %v2233_v29  ;;  %v6256_v58 = vsel %vm2485_vm11, %v2517_v1, %v2453_v56  ;;  %v2171_v17 = vmul.f32 0.15915494, %v6246_v4  ;;  %v2454_v8 = vsel %vm2390_vm10, %v2422_v2, %v6152_v40 }
 0x28f   :  { %v2930_v3 = vadd.f32 %v2898_v12, %v6178_v10  ;;  %v2835_v30 = vadd.f32 -0.16666667, %v2803_v27  ;;  %v2740_v51 = vmul.f32 %v2708_v39, %v6230_v57  ;;  %v2266_v43 = vmul.f32 6.28125, %v2234_v16 }
 0x290   :  { %v6268_v21 = vmul.f32 %v6256_v58, %v6256_v58  ;;  %v2203_v32 = vadd.f32 0.5, %v2171_v17  ;;  %vm2486_vm12 = vcmp.lt.f32.partialorder %v2454_v8, -1.5707964  ;;  %v2518_v20 = vsub.f32 -3.1415927, %v2454_v8  ;;  %v2114_v40 = vpop.f32.mrf.mxu2 }
 0x291   :  { %3016 = vmatmul.f32.gmra.mxu3 %v2930_v3  ;;  %v2867_v28 = vmul.f32 %v2835_v30, %v6206_v25  ;;  %v6271_v34 = vsub.f32 %v2297_v14, %v2329_v31  ;;  %v2772_v59 = vadd.f32 0.008333333, %v2740_v51  ;;  %vm2391_vm13 = vcmp.gt.f32.partialorder %v6215_v7, 1.5707964 }
 0x292   :  { %v2613_v2 = vmul.f32 -2.5052108e-08, %v6268_v21  ;;  %v2235_v10 = vfloor.f32 %v2203_v32  ;;  %v6275_v22 = vsel %vm2486_vm12, %v2518_v20, %v2454_v8  ;;  %v6278_v55 = vadd.f32 %v5997_v47, %v2114_v40 }
 0x293   :  { %v2899_v41 = vmul.f32 %v2867_v28, %v6200_v18  ;;  %v2804_v13 = vmul.f32 %v2772_v59, %v6230_v57  ;;  %v2330_v53 = vmul.f32 0.0019353072, %v2234_v16  ;;  %v6284_v25 = vmul.f32 %v6275_v22, %v6275_v22 }
 0x294   :  { %v2298_v35 = vsub.f32 %v6220_v33, %v2266_v43  ;;  %v2645_v61 = vadd.f32 2.7557319e-06, %v2613_v2  ;;  %v2267_v29 = vmul.f32 6.28125, %v2235_v10  ;;  %v2455_v36 = vsel %vm2391_vm13, %v2423_v15, %v6215_v7 }
 0x295   :  { %v2931_v54 = vadd.f32 %v2899_v41, %v6200_v18  ;;  %v2836_v44 = vadd.f32 -0.16666667, %v2804_v13  ;;  %v2614_v26 = vmul.f32 -2.5052108e-08, %v6284_v25  ;;  %v2172_v0 = vmul.f32 0.15915494, %v6278_v55 }
 0x296   :  { %v2677_v50 = vmul.f32 %v2645_v61, %v6268_v21  ;;  %v2299_v11 = vsub.f32 %v6246_v4, %v2267_v29  ;;  %vm2487_vm14 = vcmp.lt.f32.partialorder %v2455_v36, -1.5707964  ;;  %v2519_v52 = vsub.f32 -3.1415927, %v2455_v36 }
 0x297   :  { %v2868_v33 = vmul.f32 %v2836_v44, %v6230_v57  ;;  %v2646_v6 = vadd.f32 2.7557319e-06, %v2614_v26  ;;  %v2204_v60 = vadd.f32 0.5, %v2172_v0  ;;  %vm2392_vm15 = vcmp.gt.f32.partialorder %v6237_v9, 1.5707964 }
 0x298   :  { %v2709_v7 = vadd.f32 -0.0001984127, %v2677_v50  ;;  %v2331_v15 = vmul.f32 0.0019353072, %v2235_v10  ;;  %v6297_v18 = vsel %vm2487_vm14, %v2519_v52, %v2455_v36  ;;  %v2456_v46 = vsel %vm2392_vm15, %v2424_v38, %v6237_v9  ;;  %v2117_v57 = vpop.f32.mrf.mxu2 }
 0x299   :  { %3019 = vmatmul.f32.gmra.mxu3 %v2931_v54  ;;  %v2900_v23 = vmul.f32 %v2868_v33, %v6224_v5  ;;  %v2678_v62 = vmul.f32 %v2646_v6, %v6284_v25  ;;  %v2236_v63 = vfloor.f32 %v2204_v60  ;;  %v6304_v37 = vmul.f32 %v6297_v18, %v6297_v18 }
 0x29a   :  { %v2425_v49 = vsub.f32 3.1415927, %v6271_v34  ;;  %v2741_v56 = vmul.f32 %v2709_v7, %v6268_v21  ;;  %v6312_v9 = vadd.f32 %v5997_v47, %v2117_v57  ;;  %v2362_v4 = vsub.f32 %v2298_v35, %v2330_v53 }
 0x29b   :  { %v6314_v45 = vsub.f32 %v2299_v11, %v2331_v15  ;;  %v2710_v42 = vadd.f32 -0.0001984127, %v2678_v62  ;;  %vm2488_vm0 = vcmp.lt.f32.partialorder %v2456_v46, -1.5707964  ;;  %v2932_v24 = vadd.f32 %v2900_v23, %v6224_v5 }
 0x29c   :  { %v2773_v16 = vadd.f32 0.008333333, %v2741_v56  ;;  %v2615_v19 = vmul.f32 -2.5052108e-08, %v6304_v37  ;;  %v2173_v38 = vmul.f32 0.15915494, %v6312_v9 }
 0x29d   :  { %v2742_v1 = vmul.f32 %v2710_v42, %v6284_v25  ;;  %v2268_v12 = vmul.f32 6.28125, %v2236_v63  ;;  %v2520_v27 = vsub.f32 -3.1415927, %v2456_v46  ;;  %vm2393_vm1 = vcmp.gt.f32.partialorder %v6271_v34, 1.5707964  ;;  %v3898_v56 = vld [vmem:[%s7541_s9 + $0x60] sm:$0xff] }
 0x29e   :  { %v2805_v14 = vmul.f32 %v2773_v16, %v6268_v21  ;;  %v2647_v39 = vadd.f32 2.7557319e-06, %v2615_v19  ;;  %v2205_v31 = vadd.f32 0.5, %v2173_v38  ;;  %v2457_v5 = vsel %vm2393_vm1, %v2425_v49, %v6271_v34  ;;  %v3900_v34 = vld [vmem:[%s7541_s9 + $0x70] sm:$0xff] }
 0x29f   :  { %v2774_v17 = vadd.f32 0.008333333, %v2742_v1  ;;  %v6322_v8 = vsel %vm2488_vm0, %v2520_v27, %v2456_v46  ;;  %v2426_v32 = vsub.f32 3.1415927, %v2362_v4  ;;  %v2427_v20 = vsub.f32 3.1415927, %v6314_v45  ;;  %3907 = vmatpush.msrb.mxu0 %v3900_v34  ;;  %4092 = vmatpush.msra.mxu3 %v3900_v34 }
 0x2a0   :  { %v2837_v3 = vadd.f32 -0.16666667, %v2805_v14  ;;  %v2679_v30 = vmul.f32 %v2647_v39, %v6304_v37  ;;  %v2237_v51 = vfloor.f32 %v2205_v31  ;;  %v6328_v43 = vmul.f32 %v6322_v8, %v6322_v8  ;;  %v2120_v40 = vpop.f32.mrf.mxu2 }
 0x2a1   :  { %3022 = vmatmul.f32.gmra.mxu3 %v2932_v24  ;;  %v2806_v28 = vmul.f32 %v2774_v17, %v6284_v25  ;;  %v2300_v59 = vsub.f32 %v6278_v55, %v2268_v12  ;;  %vm2489_vm2 = vcmp.lt.f32.partialorder %v2457_v5, -1.5707964  ;;  %v6339_v35 = vadd.f32 %v5997_v47, %v2120_v40 }
 0x2a2   :  { %v2869_v2 = vmul.f32 %v2837_v3, %v6268_v21  ;;  %v2711_v10 = vadd.f32 -0.0001984127, %v2679_v30  ;;  %v2269_v41 = vmul.f32 6.28125, %v2237_v51  ;;  %v2616_v53 = vmul.f32 -2.5052108e-08, %v6328_v43 }
 0x2a3   :  { %v2838_v13 = vadd.f32 -0.16666667, %v2806_v28  ;;  %v2521_v61 = vsub.f32 -3.1415927, %v2457_v5  ;;  %v2332_v29 = vmul.f32 0.0019353072, %v2236_v63 }
 0x2a4   :  { %v2901_v55 = vmul.f32 %v2869_v2, %v6256_v58  ;;  %v2743_v36 = vmul.f32 %v2711_v10, %v6304_v37  ;;  %vm2394_vm3 = vcmp.gt.f32.partialorder %v2362_v4, 1.5707964  ;;  %v2648_v54 = vadd.f32 2.7557319e-06, %v2616_v53  ;;  %v3899_v63 = vld [vmem:[%s7541_s9 + $0x68] sm:$0xff] }
 0x2a5   :  { %v2870_v21 = vmul.f32 %v2838_v13, %v6284_v25  ;;  %v2174_v44 = vmul.f32 0.15915494, %v6339_v35  ;;  %v6345_v26 = vsel %vm2489_vm2, %v2521_v61, %v2457_v5  ;;  %v2301_v11 = vsub.f32 %v6312_v9, %v2269_v41  ;;  %3908 = vmatpush.msrb.mxu0 %v3899_v63  ;;  %4093 = vmatpush.msra.mxu3 %v3899_v63 }
 0x2a6   :  { %v2933_v0 = vadd.f32 %v2901_v55, %v6256_v58  ;;  %v2775_v50 = vadd.f32 0.008333333, %v2743_v36  ;;  %v6351_v52 = vmul.f32 %v6345_v26, %v6345_v26  ;;  %v6353_v33 = vsub.f32 %v2300_v59, %v2332_v29  ;;  %v3897_v29 = vld [vmem:[%s7541_s9 + $0x58] sm:$0xff] }
 0x2a7   :  { %v2333_v6 = vmul.f32 0.0019353072, %v2237_v51  ;;  %v2680_v60 = vmul.f32 %v2648_v54, %v6328_v43  ;;  %v2206_v25 = vadd.f32 0.5, %v2174_v44  ;;  %v2902_v7 = vmul.f32 %v2870_v21, %v6275_v22  ;;  %3909 = vmatpush.msrb.mxu0 %v3898_v56  ;;  %4094 = vmatpush.msra.mxu3 %v3898_v56 }
 0x2a8   :  { %v2807_v15 = vmul.f32 %v2775_v50, %v6304_v37  ;;  %v2617_v46 = vmul.f32 -2.5052108e-08, %v6351_v52  ;;  %v2458_v58 = vsel %vm2394_vm3, %v2426_v32, %v2362_v4  ;;  %v2123_v57 = vpop.f32.mrf.mxu2  ;;  %v2990_v49 = vpop.f32.mrf.mxu3  ;;  %vm2396_vm4 = vcmp.gt.f32.partialorder %v6353_v33, 1.5707964 }
 0x2a9   :  { %3025 = vmatmul.f32.gmra.mxu3 %v2933_v0  ;;  %v2712_v23 = vadd.f32 -0.0001984127, %v2680_v60  ;;  %v2238_v62 = vfloor.f32 %v2206_v25  ;;  %v6371_v4 = vsub.f32 %v2301_v11, %v2333_v6  ;;  %v2124_v24 = vadd.f32 %v5997_v47, %v2123_v57  ;;  %3910 = vmatpush.msrb.mxu0 %v3897_v29 }
 0x2aa   :  { %v2839_v9 = vadd.f32 -0.16666667, %v2807_v15  ;;  %v2649_v42 = vadd.f32 2.7557319e-06, %v2617_v46  ;;  %v6377_v38 = vadd.f32 %v6366_v48, %v2990_v49  ;;  %vm2490_vm5 = vcmp.lt.f32.partialorder %v2458_v58, -1.5707964  ;;  %4095 = vmatpush.msra.mxu3 %v3897_v29 }
 0x2ab   :  { %v2744_v16 = vmul.f32 %v2712_v23, %v6328_v43  ;;  %v2270_v19 = vmul.f32 6.28125, %v2238_v62  ;;  %v2934_v1 = vadd.f32 %v2902_v7, %v6275_v22  ;;  %v2175_v27 = vmul.f32 0.15915494, %v2124_v24  ;;  %v3894_v29 = vld [vmem:[%s7541_s9 + $0x40] sm:$0xff] }
 0x2ac   :  { %v2681_v12 = vmul.f32 %v2649_v42, %v6351_v52  ;;  %v2522_v14 = vsub.f32 -3.1415927, %v2458_v58  ;;  %v2871_v39 = vmul.f32 %v2839_v9, %v6304_v37  ;;  %v3086_v5 = vmul.f32 0.15915494, %v6377_v38 }
 0x2ad   :  { %v2776_v31 = vadd.f32 0.008333333, %v2744_v16  ;;  %v2302_v17 = vsub.f32 %v6339_v35, %v2270_v19  ;;  %v2207_v30 = vadd.f32 0.5, %v2175_v27  ;;  %vm2395_vm6 = vcmp.gt.f32.partialorder %v6314_v45, 1.5707964 }
 0x2ae   :  { %v2713_v3 = vadd.f32 -0.0001984127, %v2681_v12  ;;  %v6384_v51 = vsel %vm2490_vm5, %v2522_v14, %v2458_v58  ;;  %v2428_v22 = vsub.f32 3.1415927, %v6353_v33  ;;  %v3118_v28 = vadd.f32 0.5, %v3086_v5 }
 0x2af   :  { %v2808_v32 = vmul.f32 %v2776_v31, %v6328_v43  ;;  %v6391_v59 = vmul.f32 %v6384_v51, %v6384_v51  ;;  %vm2397_vm7 = vcmp.gt.f32.partialorder %v6371_v4, 1.5707964  ;;  %v2334_v37 = vmul.f32 0.0019353072, %v2238_v62 }
 0x2b0   :  { %v2745_v40 = vmul.f32 %v2713_v3, %v6351_v52  ;;  %v2239_v34 = vfloor.f32 %v2207_v30  ;;  %v2903_v2 = vmul.f32 %v2871_v39, %v6297_v18  ;;  %v3150_v41 = vfloor.f32 %v3118_v28  ;;  %v2126_v13 = vpop.f32.mrf.mxu2 }
 0x2b1   :  { %3028 = vmatmul.f32.gmra.mxu3 %v2934_v1  ;;  %v2840_v10 = vadd.f32 -0.16666667, %v2808_v32  ;;  %v2459_v53 = vsel %vm2395_vm6, %v2427_v20, %v6314_v45  ;;  %v6399_v35 = vsub.f32 %v2302_v17, %v2334_v37  ;;  %v6405_v36 = vadd.f32 %v5997_v47, %v2126_v13  ;;  %v3896_v45 = vld [vmem:[%s7541_s9 + $0x50] sm:$0xff]  ;;  %v3895_v1 = vld [vmem:[%s7541_s9 + $0x48] sm:$0xff] }
 0x2b2   :  { %v2777_v61 = vadd.f32 0.008333333, %v2745_v40  ;;  %v2271_v55 = vmul.f32 6.28125, %v2239_v34  ;;  %v2335_v54 = vmul.f32 0.0019353072, %v2239_v34  ;;  %v3182_v44 = vmul.f32 6.28125, %v3150_v41  ;;  %3911 = vmatpush.msrb.mxu0 %v3896_v45  ;;  %4096 = vmatpush.msra.mxu3 %v3896_v45 }
 0x2b3   :  { %v2872_v21 = vmul.f32 %v2840_v10, %v6328_v43  ;;  %v2618_v0 = vmul.f32 -2.5052108e-08, %v6391_v59  ;;  %v2176_v11 = vmul.f32 0.15915494, %v6405_v36  ;;  %vm2491_vm8 = vcmp.lt.f32.partialorder %v2459_v53, -1.5707964 }
 0x2b4   :  { %v2809_v20 = vmul.f32 %v2777_v61, %v6351_v52  ;;  %v2303_v50 = vsub.f32 %v2124_v24, %v2271_v55  ;;  %v2935_v6 = vadd.f32 %v2903_v2, %v6297_v18  ;;  %v2523_v25 = vsub.f32 -3.1415927, %v2459_v53  ;;  %3912 = vmatpush.msrb.mxu0 %v3895_v1  ;;  %4097 = vmatpush.msra.mxu3 %v3895_v1 }
 0x2b5   :  { %v2904_v43 = vmul.f32 %v2872_v21, %v6322_v8  ;;  %v2650_v60 = vadd.f32 2.7557319e-06, %v2618_v0  ;;  %v3214_v15 = vsub.f32 %v6377_v38, %v3182_v44  ;;  %v2208_v46 = vadd.f32 0.5, %v2176_v11  ;;  %v3893_v11 = vld [vmem:[%s7541_s9 + $0x38] sm:$0xff] }
 0x2b6   :  { %v6416_v7 = vsub.f32 %v2303_v50, %v2335_v54  ;;  %v2460_v58 = vsel %vm2396_vm4, %v2428_v22, %v6353_v33  ;;  %v2429_v23 = vsub.f32 3.1415927, %v6371_v4  ;;  %vm2398_vm9 = vcmp.gt.f32.partialorder %v6399_v35, 1.5707964  ;;  %v2993_v9 = vpop.f32.mrf.mxu3  ;;  %3913 = vmatpush.msrb.mxu0 %v3894_v29  ;;  %4098 = vmatpush.msra.mxu3 %v3894_v29 }
 0x2b7   :  { %v2682_v18 = vmul.f32 %v2650_v60, %v6391_v59  ;;  %v6425_v62 = vsel %vm2491_vm8, %v2523_v25, %v2459_v53  ;;  %v2430_v63 = vsub.f32 3.1415927, %v6399_v35  ;;  %v2841_v57 = vadd.f32 -0.16666667, %v2809_v20 }
 0x2b8   :  { %v3246_v49 = vmul.f32 0.0019353072, %v3150_v41  ;;  %v2240_v56 = vfloor.f32 %v2208_v46  ;;  %v2936_v42 = vadd.f32 %v2904_v43, %v6322_v8  ;;  %v6430_v33 = vadd.f32 %v6366_v48, %v2993_v9  ;;  %3914 = vmatpush.msrb.mxu0 %v3893_v11  ;;  %4099 = vmatpush.msra.mxu3 %v3893_v11 }
 0x2b9   :  { %3031 = vmatmul.f32.gmra.mxu3 %v2935_v6  ;;  %v2714_v24 = vadd.f32 -0.0001984127, %v2682_v18  ;;  %vm2492_vm10 = vcmp.lt.f32.partialorder %v2460_v58, -1.5707964  ;;  %vm2399_vm11 = vcmp.gt.f32.partialorder %v6416_v7, 1.5707964  ;;  %v6437_v38 = vmul.f32 %v6425_v62, %v6425_v62 }
 0x2ba   :  { %v6433_v16 = vsub.f32 %v3214_v15, %v3246_v49  ;;  %v2272_v19 = vmul.f32 6.28125, %v2240_v56  ;;  %v3087_v12 = vmul.f32 0.15915494, %v6430_v33  ;;  %v2524_v27 = vsub.f32 -3.1415927, %v2460_v58  ;;  %v2129_v30 = vpop.f32.mrf.mxu2 }
 0x2bb   :  { %v2746_v8 = vmul.f32 %v2714_v24, %v6391_v59  ;;  %v2461_v14 = vsel %vm2397_vm7, %v2429_v23, %v6371_v4  ;;  %v2873_v39 = vmul.f32 %v2841_v57, %v6351_v52  ;;  %v2431_v31 = vsub.f32 3.1415927, %v6416_v7 }
 0x2bc   :  { %v2619_v17 = vmul.f32 -2.5052108e-08, %v6437_v38  ;;  %vm2493_vm12 = vcmp.lt.f32.partialorder %v2461_v14, -1.5707964  ;;  %v3119_v3 = vadd.f32 0.5, %v3087_v12  ;;  %v6451_v22 = vsel %vm2492_vm10, %v2524_v27, %v2460_v58 }
 0x2bd   :  { %v2778_v5 = vadd.f32 0.008333333, %v2746_v8  ;;  %v2525_v32 = vsub.f32 -3.1415927, %v2461_v14  ;;  %v2304_v28 = vsub.f32 %v6405_v36, %v2272_v19  ;;  %v6455_v4 = vadd.f32 %v5997_v47, %v2129_v30 }
 0x2be   :  { %v2651_v37 = vadd.f32 2.7557319e-06, %v2619_v17  ;;  %v6459_v52 = vmul.f32 %v6451_v22, %v6451_v22  ;;  %v3342_v40 = vsub.f32 3.1415927, %v6433_v16  ;;  %v3151_v2 = vfloor.f32 %v3119_v3  ;;  %v3892_v3 = vld [vmem:[%s7541_s9 + $0x30] sm:$0xff] }
 0x2bf   :  { %v2810_v34 = vmul.f32 %v2778_v5, %v6391_v59  ;;  %v6463_v10 = vsel %vm2493_vm12, %v2525_v32, %v2461_v14  ;;  %v2905_v41 = vmul.f32 %v2873_v39, %v6345_v26  ;;  %v2336_v13 = vmul.f32 0.0019353072, %v2240_v56  ;;  %3915 = vmatpush.msrb.mxu0 %v3892_v3  ;;  %4100 = vmatpush.msra.mxu3 %v3892_v3 }
 0x2c0   :  { %v2683_v53 = vmul.f32 %v2651_v37, %v6437_v38  ;;  %v2177_v61 = vmul.f32 0.15915494, %v6455_v4  ;;  %vm3310_vm13 = vcmp.gt.f32.partialorder %v6433_v16, 1.5707964  ;;  %v3183_v55 = vmul.f32 6.28125, %v3151_v2 }
 0x2c1   :  { %3034 = vmatmul.f32.gmra.mxu3 %v2936_v42  ;;  %v2842_v47 = vadd.f32 -0.16666667, %v2810_v34  ;;  %v6474_v36 = vmul.f32 %v6463_v10, %v6463_v10  ;;  %v2462_v21 = vsel %vm2398_vm9, %v2430_v63, %v6399_v35  ;;  %v6479_v54 = vsub.f32 %v2304_v28, %v2336_v13  ;;  %v6531_v13 = vld [vmem:[%s7538_s6] ss:$0 sm:$0xff] }
 0x2c2   :  { %v2715_v44 = vadd.f32 -0.0001984127, %v2683_v53  ;;  %v2209_v0 = vadd.f32 0.5, %v2177_v61  ;;  %v2620_v45 = vmul.f32 -2.5052108e-08, %v6459_v52  ;;  %v3215_v50 = vsub.f32 %v6430_v33, %v3183_v55  ;;  %v3891_v53 = vld [vmem:[%s7541_s9 + $0x28] sm:$0xff] }
 0x2c3   :  { %v2874_v20 = vmul.f32 %v2842_v47, %v6391_v59  ;;  %v2621_v6 = vmul.f32 -2.5052108e-08, %v6474_v36  ;;  %v2463_v35 = vsel %vm2399_vm11, %v2431_v31, %v6416_v7  ;;  %v2526_v15 = vsub.f32 -3.1415927, %v2462_v21  ;;  %v3890_v61 = vld [vmem:[%s7541_s9 + $0x20] sm:$0xff]  ;;  %3916 = vmatpush.msrb.mxu0 %v3891_v53  ;;  %4101 = vmatpush.msra.mxu3 %v3891_v53 }
 0x2c4   :  { %v2747_v43 = vmul.f32 %v2715_v44, %v6437_v38  ;;  %v2241_v60 = vfloor.f32 %v2209_v0  ;;  %v2652_v25 = vadd.f32 2.7557319e-06, %v2620_v45  ;;  %v2937_v59 = vadd.f32 %v2905_v41, %v6345_v26  ;;  %v2996_v58 = vpop.f32.mrf.mxu3 }
 0x2c5   :  { %v3247_v46 = vmul.f32 0.0019353072, %v3151_v2  ;;  %v2653_v23 = vadd.f32 2.7557319e-06, %v2621_v6  ;;  %vm2494_vm14 = vcmp.lt.f32.partialorder %v2462_v21, -1.5707964  ;;  %v2906_v18 = vmul.f32 %v2874_v20, %v6384_v51  ;;  %3917 = vmatpush.msrb.mxu0 %v3890_v61  ;;  %4102 = vmatpush.msra.mxu3 %v3890_v61 }
 0x2c6   :  { %v2432_v63 = vsub.f32 3.1415927, %v6479_v54  ;;  %v2779_v57 = vadd.f32 0.008333333, %v2747_v43  ;;  %v6496_v7 = vadd.f32 %v6366_v48, %v2996_v58  ;;  %v2684_v56 = vmul.f32 %v2652_v25, %v6459_v52  ;;  %v3889_v25 = vld [vmem:[%s7541_s9 + $0x18] sm:$0xff] }
 0x2c7   :  { %v6498_v49 = vsub.f32 %v3215_v50, %v3247_v46  ;;  %v2685_v9 = vmul.f32 %v2653_v23, %v6474_v36  ;;  %vm2495_vm15 = vcmp.lt.f32.partialorder %v2463_v35, -1.5707964  ;;  %vm2400_vm0 = vcmp.gt.f32.partialorder %v6479_v54, 1.5707964  ;;  %3918 = vmatpush.msrb.mxu0 %v3889_v25  ;;  %4103 = vmatpush.msra.mxu3 %v3889_v25 }
 0x2c8   :  { %v2811_v26 = vmul.f32 %v2779_v57, %v6437_v38  ;;  %v2273_v42 = vmul.f32 6.28125, %v2241_v60  ;;  %v3088_v24 = vmul.f32 0.15915494, %v6496_v7  ;;  %v6505_v33 = vsel %vm2494_vm14, %v2526_v15, %v2462_v21  ;;  %v3888_v57 = vld [vmem:[%s7541_s9 + $0x10] sm:$0xff] }
 0x2c9   :  { %3037 = vmatmul.f32.gmra.mxu3 %v2937_v59  ;;  %v2716_v19 = vadd.f32 -0.0001984127, %v2684_v56  ;;  %v2717_v1 = vadd.f32 -0.0001984127, %v2685_v9  ;;  %v6509_v8 = vmul.f32 %v6505_v33, %v6505_v33  ;;  %v2527_v12 = vsub.f32 -3.1415927, %v2463_v35  ;;  %3919 = vmatpush.msrb.mxu0 %v3888_v57 }
 0x2ca   :  { %v2938_v27 = vadd.f32 %v2906_v18, %v6384_v51  ;;  %v2843_v14 = vadd.f32 -0.16666667, %v2811_v26  ;;  %v2337_v39 = vmul.f32 0.0019353072, %v2241_v60  ;;  %v3120_v31 = vadd.f32 0.5, %v3088_v24  ;;  %v2132_v34 = vpop.f32.mrf.mxu2  ;;  %4104 = vmatpush.msra.mxu3 %v3888_v57 }
 0x2cb   :  { %v2748_v17 = vmul.f32 %v2716_v19, %v6459_v52  ;;  %v2749_v5 = vmul.f32 %v2717_v1, %v6474_v36  ;;  %v2622_v30 = vmul.f32 -2.5052108e-08, %v6509_v8  ;;  %v6519_v32 = vsel %vm2495_vm15, %v2527_v12, %v2463_v35 }
 0x2cc   :  { %v2875_v28 = vmul.f32 %v2843_v14, %v6437_v38  ;;  %v2305_v51 = vsub.f32 %v6455_v4, %v2273_v42  ;;  %v3152_v37 = vfloor.f32 %v3120_v31  ;;  %v3374_v2 = vsel %vm3310_vm13, %v3342_v40, %v6433_v16 }
 0x2cd   :  { %v2780_v41 = vadd.f32 0.008333333, %v2748_v17  ;;  %v6534_v38 = vadd.f32 %v6531_v13, %v2132_v34  ;;  %v2781_v4 = vadd.f32 0.008333333, %v2749_v5  ;;  %v6544_v16 = vmul.f32 %v6519_v32, %v6519_v32 }
 0x2ce   :  { %v3343_v40 = vsub.f32 3.1415927, %v6498_v49  ;;  %v2907_v47 = vmul.f32 %v2875_v28, %v6425_v62  ;;  %v3184_v55 = vmul.f32 6.28125, %v3152_v37  ;;  %v2654_v29 = vadd.f32 2.7557319e-06, %v2622_v30 }
 0x2cf   :  { %v2812_v21 = vmul.f32 %v2780_v41, %v6459_v52  ;;  %v2178_v44 = vmul.f32 0.15915494, %v6534_v38  ;;  %v2813_v0 = vmul.f32 %v2781_v4, %v6474_v36  ;;  %v2623_v45 = vmul.f32 -2.5052108e-08, %v6544_v16 }
 0x2d0   :  { %v6552_v20 = vsub.f32 %v2305_v51, %v2337_v39  ;;  %v3248_v50 = vmul.f32 0.0019353072, %v3152_v37  ;;  %v2686_v11 = vmul.f32 %v2654_v29, %v6509_v8  ;;  %vm3406_vm1 = vcmp.lt.f32.partialorder %v3374_v2, -1.5707964 }
 0x2d1   :  { %3040 = vmatmul.f32.gmra.mxu3 %v2938_v27  ;;  %v3216_v6 = vsub.f32 %v6496_v7, %v3184_v55  ;;  %v2844_v35 = vadd.f32 -0.16666667, %v2812_v21  ;;  %v2210_v43 = vadd.f32 0.5, %v2178_v44  ;;  %v2845_v60 = vadd.f32 -0.16666667, %v2813_v0 }
 0x2d2   :  { %v2718_v15 = vadd.f32 -0.0001984127, %v2686_v11  ;;  %v2655_v59 = vadd.f32 2.7557319e-06, %v2623_v45  ;;  %v3438_v46 = vsub.f32 -3.1415927, %v3374_v2  ;;  %v2939_v58 = vadd.f32 %v2907_v47, %v6425_v62 }
 0x2d3   :  { %v2876_v23 = vmul.f32 %v2844_v35, %v6459_v52  ;;  %v2242_v18 = vfloor.f32 %v2210_v43  ;;  %v2464_v7 = vsel %vm2400_vm0, %v2432_v63, %v6479_v54  ;;  %v2433_v56 = vsub.f32 3.1415927, %v6552_v20  ;;  %v2999_v9 = vpop.f32.mrf.mxu3  ;;  %v3887_v54 = vld [vmem:[%s7541_s9 + $0x8] sm:$0xff] }
 0x2d4   :  { %v2750_v26 = vmul.f32 %v2718_v15, %v6509_v8  ;;  %v2687_v62 = vmul.f32 %v2655_v59, %v6544_v16  ;;  %v6573_v52 = vsel %vm3406_vm1, %v3438_v46, %v3374_v2  ;;  %v6575_v42 = vsub.f32 %v3216_v6, %v3248_v50  ;;  %3920 = vmatpush.msrb.mxu0 %v3887_v54 }
 0x2d5   :  { %v2274_v24 = vmul.f32 6.28125, %v2242_v18  ;;  %v3000_v19 = vadd.f32 %v6366_v48, %v2999_v9  ;;  %v2877_v1 = vmul.f32 %v2845_v60, %v6474_v36  ;;  %v6584_v27 = vmul.f32 %v6573_v52, %v6573_v52  ;;  %4105 = vmatpush.msra.mxu3 %v3887_v54  ;;  %v3886_v36 = vld [vmem:[%s7541_s9] sm:$0xff] }
 0x2d6   :  { %v2782_v63 = vadd.f32 0.008333333, %v2750_v26  ;;  %v2719_v12 = vadd.f32 -0.0001984127, %v2687_v62  ;;  %vm2496_vm2 = vcmp.lt.f32.partialorder %v2464_v7, -1.5707964  ;;  %v2908_v14 = vmul.f32 %v2876_v23, %v6451_v22  ;;  %3921 = vmatpush.msrb.mxu0 %v3886_v36 }
 0x2d7   :  { %v2306_v39 = vsub.f32 %v6534_v38, %v2274_v24  ;;  %v3089_v31 = vmul.f32 0.15915494, %v3000_v19  ;;  %v2528_v17 = vsub.f32 -3.1415927, %v2464_v7  ;;  %v2338_v5 = vmul.f32 0.0019353072, %v2242_v18  ;;  %4106 = vmatpush.msra.mxu3 %v3886_v36 }
 0x2d8   :  { %v2135_v3 = vpop.f32.mrf.mxu2  ;;  %v2814_v30 = vmul.f32 %v2782_v63, %v6509_v8  ;;  %v2751_v28 = vmul.f32 %v2719_v12, %v6544_v16  ;;  %v3534_v51 = vmul.f32 -2.5052108e-08, %v6584_v27  ;;  %v2909_v34 = vmul.f32 %v2877_v1, %v6463_v10 }
 0x2d9   :  { %3043 = vmatmul.f32.gmra.mxu3 %v2939_v58  ;;  %v3121_v37 = vadd.f32 0.5, %v3089_v31  ;;  %v6596_v2 = vadd.f32 %v6531_v13, %v2135_v3  ;;  %v6599_v41 = vsel %vm2496_vm2, %v2528_v17, %v2464_v7  ;;  %vm2401_vm3 = vcmp.gt.f32.partialorder %v6552_v20, 1.5707964 }
 0x2da   :  { %v2846_v38 = vadd.f32 -0.16666667, %v2814_v30  ;;  %v2783_v4 = vadd.f32 0.008333333, %v2751_v28  ;;  %v3566_v53 = vadd.f32 2.7557319e-06, %v3534_v51  ;;  %v6604_v61 = vmul.f32 %v6599_v41, %v6599_v41 }
 0x2db   :  { %v2940_v47 = vadd.f32 %v2908_v14, %v6451_v22  ;;  %v6607_v55 = vsub.f32 %v2306_v39, %v2338_v5  ;;  %v3153_v29 = vfloor.f32 %v3121_v37  ;;  %v2179_v21 = vmul.f32 0.15915494, %v6596_v2 }
 0x2dc   :  { %v2878_v44 = vmul.f32 %v2846_v38, %v6509_v8  ;;  %v2815_v0 = vmul.f32 %v2783_v4, %v6544_v16  ;;  %v3598_v45 = vmul.f32 %v3566_v53, %v6584_v27  ;;  %v2624_v50 = vmul.f32 -2.5052108e-08, %v6604_v61 }
 0x2dd   :  { %v3185_v11 = vmul.f32 6.28125, %v3153_v29  ;;  %v3249_v6 = vmul.f32 0.0019353072, %v3153_v29  ;;  %v2211_v35 = vadd.f32 0.5, %v2179_v21  ;;  %vm3311_vm4 = vcmp.gt.f32.partialorder %v6498_v49, 1.5707964  ;;  %v3002_v43 = vpop.f32.mrf.mxu3 }
 0x2de   :  { %v2847_v22 = vadd.f32 -0.16666667, %v2815_v0  ;;  %v3630_v60 = vadd.f32 -0.0001984127, %v3598_v45  ;;  %v2656_v25 = vadd.f32 2.7557319e-06, %v2624_v50  ;;  %v3003_v46 = vadd.f32 %v6366_v48, %v3002_v43 }
 0x2df   :  { %v3217_v15 = vsub.f32 %v3000_v19, %v3185_v11  ;;  %v2243_v59 = vfloor.f32 %v2211_v35  ;;  %v3375_v8 = vsel %vm3311_vm4, %v3343_v40, %v6498_v49  ;;  %v2910_v58 = vmul.f32 %v2878_v44, %v6505_v33 }
 0x2e0   :  { %v2879_v23 = vmul.f32 %v2847_v22, %v6544_v16  ;;  %v3662_v18 = vmul.f32 %v3630_v60, %v6584_v27  ;;  %v2688_v57 = vmul.f32 %v2656_v25, %v6604_v61  ;;  %v3344_v7 = vsub.f32 3.1415927, %v6575_v42 }
 0x2e1   :  { %3046 = vmatmul.f32.gmra.mxu3 %v2940_v47  ;;  %vm2402_vm5 = vcmp.gt.f32.partialorder %v6607_v55, 1.5707964  ;;  %v2941_v9 = vadd.f32 %v2909_v34, %v6463_v10  ;;  %v3090_v26 = vmul.f32 0.15915494, %v3003_v46  ;;  %v6626_v62 = vsub.f32 %v3217_v15, %v3249_v6 }
 0x2e2   :  { %v3694_v24 = vadd.f32 0.008333333, %v3662_v18  ;;  %v2720_v49 = vadd.f32 -0.0001984127, %v2688_v57  ;;  %vm3407_vm6 = vcmp.lt.f32.partialorder %v3375_v8, -1.5707964  ;;  %v2911_v16 = vmul.f32 %v2879_v23, %v6519_v32 }
 0x2e3   :  { %v2275_v40 = vmul.f32 6.28125, %v2243_v59  ;;  %v3122_v19 = vadd.f32 0.5, %v3090_v26  ;;  %v3439_v1 = vsub.f32 -3.1415927, %v3375_v8  ;;  %v2434_v54 = vsub.f32 3.1415927, %v6607_v55 }
 0x2e4   :  { %v2942_v63 = vadd.f32 %v2910_v58, %v6505_v33  ;;  %v3726_v12 = vmul.f32 %v3694_v24, %v6584_v27  ;;  %v2752_v14 = vmul.f32 %v2720_v49, %v6604_v61  ;;  %v2339_v10 = vmul.f32 0.0019353072, %v2243_v59 }
 0x2e5   :  { %v3154_v39 = vfloor.f32 %v3122_v19  ;;  %v2138_v31 = vpop.f32.mrf.mxu2  ;;  %v6633_v36 = vsel %vm3407_vm6, %v3439_v1, %v3375_v8  ;;  %v2465_v17 = vsel %vm2401_vm3, %v2433_v56, %v6552_v20  ;;  %v3345_v28 = vsub.f32 3.1415927, %v6626_v62 }
 0x2e6   :  { %v2139_v5 = vadd.f32 %v6531_v13, %v2138_v31  ;;  %v3758_v3 = vadd.f32 -0.16666667, %v3726_v12  ;;  %v2784_v30 = vadd.f32 0.008333333, %v2752_v14  ;;  %v6643_v33 = vmul.f32 %v6633_v36, %v6633_v36 }
 0x2e7   :  { %v2307_v51 = vsub.f32 %v6596_v2, %v2275_v40  ;;  %v3186_v37 = vmul.f32 6.28125, %v3154_v39  ;;  %v6648_v34 = vadd.f32 %v2911_v16, %v6519_v32  ;;  %vm2497_vm7 = vcmp.lt.f32.partialorder %v2465_v17, -1.5707964 }
 0x2e8   :  { %v2180_v38 = vmul.f32 0.15915494, %v2139_v5  ;;  %v3790_v4 = vmul.f32 %v3758_v3, %v6584_v27  ;;  %v2816_v20 = vmul.f32 %v2784_v30, %v6604_v61  ;;  %v3535_v53 = vmul.f32 -2.5052108e-08, %v6643_v33 }
 0x2e9   :  { %3049 = vmatmul.f32.gmra.mxu3 %v2941_v9  ;;  %v3218_v56 = vsub.f32 %v3003_v46, %v3186_v37  ;;  %v2529_v47 = vsub.f32 -3.1415927, %v2465_v17  ;;  %vm3312_vm8 = vcmp.gt.f32.partialorder %v6575_v42, 1.5707964  ;;  %v3250_v44 = vmul.f32 0.0019353072, %v3154_v39 }
 0x2ea   :  { %v2212_v29 = vadd.f32 0.5, %v2180_v38  ;;  %v3822_v2 = vmul.f32 %v3790_v4, %v6573_v52  ;;  %v2848_v21 = vadd.f32 -0.16666667, %v2816_v20  ;;  %v3376_v32 = vsel %vm3312_vm8, %v3344_v7, %v6575_v42 }
 0x2eb   :  { %v3567_v0 = vadd.f32 2.7557319e-06, %v3535_v53  ;;  %v6656_v45 = vsel %vm2497_vm7, %v2529_v47, %v2465_v17  ;;  %v2466_v27 = vsel %vm2402_vm5, %v2434_v54, %v6607_v55  ;;  %vm3408_vm9 = vcmp.lt.f32.partialorder %v3376_v32, -1.5707964 }
 0x2ec   :  { %v2244_v50 = vfloor.f32 %v2212_v29  ;;  %v3854_v11 = vadd.f32 %v3822_v2, %v6573_v52  ;;  %v6664_v6 = vmul.f32 %v6656_v45, %v6656_v45  ;;  %v6666_v35 = vsub.f32 %v2307_v51, %v2339_v10 }
 0x2ed   :  { %v6668_v43 = vsub.f32 %v3218_v56, %v3250_v44  ;;  %v3599_v42 = vmul.f32 %v3567_v0, %v6643_v33  ;;  %v3440_v22 = vsub.f32 -3.1415927, %v3376_v32  ;;  %v2880_v55 = vmul.f32 %v2848_v21, %v6604_v61 }
 0x2ee   :  { %v2276_v60 = vmul.f32 6.28125, %v2244_v50  ;;  %v3005_v25 = vpop.f32.mrf.mxu3  ;;  %3922 = vmatmul.f32.vlgmr.msrb.gmra.mxu0 %v3854_v11  ;;  %v2141_v15 = vpop.f32.mrf.mxu2  ;;  %v2625_v52 = vmul.f32 -2.5052108e-08, %v6664_v6  ;;  %vm2498_vm10 = vcmp.lt.f32.partialorder %v2466_v27, -1.5707964 }
 0x2ef   :  { %v3006_v59 = vadd.f32 %v6366_v48, %v3005_v25  ;;  %v6675_v46 = vadd.f32 %v6531_v13, %v2141_v15  ;;  %v3631_v8 = vadd.f32 -0.0001984127, %v3599_v42  ;;  %v6677_v58 = vsel %vm3408_vm9, %v3440_v22, %v3376_v32 }
 0x2f0   :  { %v2308_v23 = vsub.f32 %v2139_v5, %v2276_v60  ;;  %v2340_v18 = vmul.f32 0.0019353072, %v2244_v50  ;;  %v2657_v57 = vadd.f32 2.7557319e-06, %v2625_v52  ;;  %v6681_v7 = vmul.f32 %v6677_v58, %v6677_v58 }
 0x2f1   :  { %3052 = vmatmul.f32.gmra.mxu3 %v2942_v63  ;;  %v3091_v61 = vmul.f32 0.15915494, %v3006_v59  ;;  %v2181_v9 = vmul.f32 0.15915494, %v6675_v46  ;;  %v3663_v26 = vmul.f32 %v3631_v8, %v6643_v33  ;;  %v2530_v24 = vsub.f32 -3.1415927, %v2466_v27 }
 0x2f2   :  { %v6685_v49 = vsub.f32 %v2308_v23, %v2340_v18  ;;  %v2912_v40 = vmul.f32 %v2880_v55, %v6599_v41  ;;  %v2689_v19 = vmul.f32 %v2657_v57, %v6664_v6  ;;  %v3536_v16 = vmul.f32 -2.5052108e-08, %v6681_v7 }
 0x2f3   :  { %v3123_v1 = vadd.f32 0.5, %v3091_v61  ;;  %v2213_v54 = vadd.f32 0.5, %v2181_v9  ;;  %v3695_v12 = vadd.f32 0.008333333, %v3663_v26  ;;  %v6691_v14 = vsel %vm2498_vm10, %v2530_v24, %v2466_v27 }
 0x2f4   :  { %vm2403_vm11 = vcmp.gt.f32.partialorder %v6666_v35, 1.5707964  ;;  %v2435_v63 = vsub.f32 3.1415927, %v6666_v35  ;;  %v2721_v10 = vadd.f32 -0.0001984127, %v2689_v19  ;;  %v6697_v39 = vmul.f32 %v6691_v14, %v6691_v14 }
 0x2f5   :  { %v3155_v31 = vfloor.f32 %v3123_v1  ;;  %v2245_v17 = vfloor.f32 %v2213_v54  ;;  %v3727_v5 = vmul.f32 %v3695_v12, %v6643_v33  ;;  %v3568_v3 = vadd.f32 2.7557319e-06, %v3536_v16 }
 0x2f6   :  { %v3346_v30 = vsub.f32 3.1415927, %v6668_v43  ;;  %v3008_v51 = vpop.f32.mrf.mxu3  ;;  %v2753_v37 = vmul.f32 %v2721_v10, %v6664_v6  ;;  %v2626_v38 = vmul.f32 -2.5052108e-08, %v6697_v39  ;;  %vm3313_vm12 = vcmp.gt.f32.partialorder %v6626_v62, 1.5707964 }
 0x2f7   :  { %v2436_v4 = vsub.f32 3.1415927, %v6685_v49  ;;  %v3187_v20 = vmul.f32 6.28125, %v3155_v31  ;;  %v2277_v56 = vmul.f32 6.28125, %v2245_v17  ;;  %v2944_v53 = vadd.f32 %v2912_v40, %v6599_v41 }
 0x2f8   :  { %v3009_v47 = vadd.f32 %v6366_v48, %v3008_v51  ;;  %v3759_v29 = vadd.f32 -0.16666667, %v3727_v5  ;;  %v2785_v2 = vadd.f32 0.008333333, %v2753_v37  ;;  %v3600_v21 = vmul.f32 %v3568_v3, %v6681_v7 }
 0x2f9   :  { %v3219_v32 = vsub.f32 %v3006_v59, %v3187_v20  ;;  %v3251_v44 = vmul.f32 0.0019353072, %v3155_v31  ;;  %3055 = vmatmul.f32.gmra.mxu3 %v6648_v34  ;;  %v2658_v0 = vadd.f32 2.7557319e-06, %v2626_v38  ;;  %v3377_v27 = vsel %vm3313_vm12, %v3345_v28, %v6626_v62 }
 0x2fa   :  { %v3092_v50 = vmul.f32 0.15915494, %v3009_v47  ;;  %v3791_v11 = vmul.f32 %v3759_v29, %v6643_v33  ;;  %v2144_v42 = vpop.f32.mrf.mxu2  ;;  %v2817_v41 = vmul.f32 %v2785_v2, %v6664_v6  ;;  %v3632_v22 = vadd.f32 -0.0001984127, %v3600_v21 }
 0x2fb   :  { %v6714_v60 = vsub.f32 %v3219_v32, %v3251_v44  ;;  %v2309_v25 = vsub.f32 %v6675_v46, %v2277_v56  ;;  %v2145_v15 = vadd.f32 %v6531_v13, %v2144_v42  ;;  %v2690_v34 = vmul.f32 %v2658_v0, %v6697_v39 }
 0x2fc   :  { %v3124_v55 = vadd.f32 0.5, %v3092_v50  ;;  %v3823_v52 = vmul.f32 %v3791_v11, %v6633_v36  ;;  %v2849_v59 = vadd.f32 -0.16666667, %v2817_v41  ;;  %v3664_v62 = vmul.f32 %v3632_v22, %v6681_v7 }
 0x2fd   :  { %vm2404_vm13 = vcmp.gt.f32.partialorder %v6685_v49, 1.5707964  ;;  %v3347_v33 = vsub.f32 3.1415927, %v6714_v60  ;;  %v2341_v28 = vmul.f32 0.0019353072, %v2245_v17  ;;  %v2467_v46 = vsel %vm2403_vm11, %v2435_v63, %v6666_v35 }
 0x2fe   :  { %vm3409_vm14 = vcmp.lt.f32.partialorder %v3377_v27, -1.5707964  ;;  %v3156_v8 = vfloor.f32 %v3124_v55  ;;  %v3855_v23 = vadd.f32 %v3823_v52, %v6633_v36  ;;  %v2182_v18 = vmul.f32 0.15915494, %v2145_v15 }
 0x2ff   :  { %v2881_v57 = vmul.f32 %v2849_v59, %v6664_v6  ;;  %v6728_v61 = vsub.f32 %v2309_v25, %v2341_v28  ;;  %v3011_v9 = vpop.f32.mrf.mxu3  ;;  %v3696_v26 = vadd.f32 0.008333333, %v3664_v62  ;;  %v2722_v24 = vadd.f32 -0.0001984127, %v2690_v34 }
 0x300   :  { %v3441_v40 = vsub.f32 -3.1415927, %v3377_v27  ;;  %v3188_v19 = vmul.f32 6.28125, %v3156_v8  ;;  %v3252_v16 = vmul.f32 0.0019353072, %v3156_v8  ;;  %3925 = vmatmul.f32.gmra.mxu0 %v3855_v23  ;;  %v2214_v1 = vadd.f32 0.5, %v2182_v18 }
 0x301   :  { %v3012_v54 = vadd.f32 %v6366_v48, %v3011_v9  ;;  %3058 = vmatmul.f32.gmra.mxu3 %v2944_v53  ;;  %v2913_v35 = vmul.f32 %v2881_v57, %v6656_v45  ;;  %v3728_v36 = vmul.f32 %v3696_v26, %v6681_v7  ;;  %v2754_v12 = vmul.f32 %v2722_v24, %v6697_v39 }
 0x302   :  { %v6735_v6 = vsel %vm3409_vm14, %v3441_v40, %v3377_v27  ;;  %v3220_v63 = vsub.f32 %v3009_v47, %v3188_v19  ;;  %v2246_v10 = vfloor.f32 %v2214_v1  ;;  %v2437_v5 = vsub.f32 3.1415927, %v6728_v61 }
 0x303   :  { %v3093_v31 = vmul.f32 0.15915494, %v3012_v54  ;;  %v6739_v17 = vmul.f32 %v6735_v6, %v6735_v6  ;;  %v2945_v3 = vadd.f32 %v2913_v35, %v6656_v45  ;;  %v3760_v51 = vadd.f32 -0.16666667, %v3728_v36 }
 0x304   :  { %v2786_v37 = vadd.f32 0.008333333, %v2754_v12  ;;  %v6743_v38 = vsub.f32 %v3220_v63, %v3252_v16  ;;  %v2278_v20 = vmul.f32 6.28125, %v2246_v10  ;;  %v2147_v53 = vpop.f32.mrf.mxu2  ;;  %vm2499_vm15 = vcmp.lt.f32.partialorder %v2467_v46, -1.5707964 }
 0x305   :  { %v3125_v56 = vadd.f32 0.5, %v3093_v31  ;;  %v3792_v47 = vmul.f32 %v3760_v51, %v6681_v7  ;;  %v2148_v29 = vadd.f32 %v6531_v13, %v2147_v53  ;;  %v3537_v21 = vmul.f32 -2.5052108e-08, %v6739_v17 }
 0x306   :  { %v2818_v2 = vmul.f32 %v2786_v37, %v6697_v39  ;;  %v2310_v32 = vsub.f32 %v2145_v15, %v2278_v20  ;;  %v2342_v44 = vmul.f32 0.0019353072, %v2246_v10  ;;  %v2531_v45 = vsub.f32 -3.1415927, %v2467_v46 }
 0x307   :  { %v3157_v0 = vfloor.f32 %v3125_v56  ;;  %v3824_v27 = vmul.f32 %v3792_v47, %v6677_v58  ;;  %v2183_v50 = vmul.f32 0.15915494, %v2148_v29  ;;  %v3569_v42 = vadd.f32 2.7557319e-06, %v3537_v21 }
 0x308   :  { %v2850_v11 = vadd.f32 -0.16666667, %v2818_v2  ;;  %v6750_v41 = vsub.f32 %v2310_v32, %v2342_v44  ;;  %v6752_v25 = vsel %vm2499_vm15, %v2531_v45, %v2467_v46  ;;  %v2468_v7 = vsel %vm2404_vm13, %v2436_v4, %v6685_v49 }
 0x309   :  { %v3189_v22 = vmul.f32 6.28125, %v3157_v0  ;;  %3061 = vmatmul.f32.gmra.mxu3 %v2945_v3  ;;  %v3856_v15 = vadd.f32 %v3824_v27, %v6677_v58  ;;  %v2215_v34 = vadd.f32 0.5, %v2183_v50  ;;  %v3601_v52 = vmul.f32 %v3569_v42, %v6739_v17 }
 0x30a   :  { %v2882_v55 = vmul.f32 %v2850_v11, %v6697_v39  ;;  %v3348_v59 = vsub.f32 3.1415927, %v6743_v38  ;;  %v3253_v28 = vmul.f32 0.0019353072, %v3157_v0  ;;  %v3014_v46 = vpop.f32.mrf.mxu3  ;;  %v6765_v8 = vmul.f32 %v6752_v25, %v6752_v25 }
 0x30b   :  { %v3221_v62 = vsub.f32 %v3012_v54, %v3189_v22  ;;  %3928 = vmatmul.f32.gmra.mxu0 %v3856_v15  ;;  %v2247_v23 = vfloor.f32 %v2215_v34  ;;  %v6768_v49 = vadd.f32 %v6366_v48, %v3014_v46  ;;  %v3633_v4 = vadd.f32 -0.0001984127, %v3601_v52 }
 0x30c   :  { %v2914_v58 = vmul.f32 %v2882_v55, %v6691_v14  ;;  %v2438_v39 = vsub.f32 3.1415927, %v6750_v41  ;;  %v2627_v18 = vmul.f32 -2.5052108e-08, %v6765_v8  ;;  %vm3314_vm0 = vcmp.gt.f32.partialorder %v6668_v43, 1.5707964 }
 0x30d   :  { %v6774_v57 = vsub.f32 %v3221_v62, %v3253_v28  ;;  %v2279_v9 = vmul.f32 6.28125, %v2247_v23  ;;  %v3094_v26 = vmul.f32 0.15915494, %v6768_v49  ;;  %v3665_v40 = vmul.f32 %v3633_v4, %v6739_v17 }
 0x30e   :  { %v2946_v24 = vadd.f32 %v2914_v58, %v6691_v14  ;;  %v2659_v19 = vadd.f32 2.7557319e-06, %v2627_v18  ;;  %v3378_v16 = vsel %vm3314_vm0, %v3346_v30, %v6668_v43  ;;  %vm2500_vm1 = vcmp.lt.f32.partialorder %v2468_v7, -1.5707964 }
 0x30f   :  { %v2311_v1 = vsub.f32 %v2148_v29, %v2279_v9  ;;  %v3126_v54 = vadd.f32 0.5, %v3094_v26  ;;  %vm3410_vm2 = vcmp.lt.f32.partialorder %v3378_v16, -1.5707964  ;;  %v3442_v35 = vsub.f32 -3.1415927, %v3378_v16 }
 0x310   :  { %v3697_v36 = vadd.f32 0.008333333, %v3665_v40  ;;  %v2691_v12 = vmul.f32 %v2659_v19, %v6765_v8  ;;  %v2532_v63 = vsub.f32 -3.1415927, %v2468_v7  ;;  %vm3315_vm3 = vcmp.gt.f32.partialorder %v6714_v60, 1.5707964 }
 0x311   :  { %v3349_v14 = vsub.f32 3.1415927, %v6774_v57  ;;  %v2343_v10 = vmul.f32 0.0019353072, %v2247_v23  ;;  %v3158_v31 = vfloor.f32 %v3126_v54  ;;  %3064 = vmatmul.f32.gmra.mxu3 %v2946_v24  ;;  %v2150_v3 = vpop.f32.mrf.mxu2  ;;  %v6785_v51 = vsel %vm3410_vm2, %v3442_v35, %v3378_v16  ;;  %v6833_v35 = vld [vmem:[%s7540_s8] ss:$0 sm:$0xff] }
 0x312   :  { %vm2405_vm4 = vcmp.gt.f32.partialorder %v6728_v61, 1.5707964  ;;  %v3729_v43 = vmul.f32 %v3697_v36, %v6739_v17  ;;  %v2151_v30 = vadd.f32 %v6531_v13, %v2150_v3  ;;  %v2723_v37 = vadd.f32 -0.0001984127, %v2691_v12 }
 0x313   :  { %v6792_v20 = vmul.f32 %v6785_v51, %v6785_v51  ;;  %v6794_v56 = vsub.f32 %v2311_v1, %v2343_v10  ;;  %v3190_v53 = vmul.f32 6.28125, %v3158_v31  ;;  %v6797_v47 = vsel %vm2500_vm1, %v2532_v63, %v2468_v7 }
 0x314   :  { %v3379_v29 = vsel %vm3315_vm3, %v3347_v33, %v6714_v60  ;;  %v3254_v2 = vmul.f32 0.0019353072, %v3158_v31  ;;  %v3761_v21 = vadd.f32 -0.16666667, %v3729_v43  ;;  %v2184_v32 = vmul.f32 0.15915494, %v2151_v30  ;;  %v3017_v44 = vpop.f32.mrf.mxu3 }
 0x315   :  { %v2755_v13 = vmul.f32 %v2723_v37, %v6765_v8  ;;  %v3222_v0 = vsub.f32 %v6768_v49, %v3190_v53  ;;  %v3018_v45 = vadd.f32 %v6366_v48, %v3017_v44  ;;  %v3538_v27 = vmul.f32 -2.5052108e-08, %v6792_v20 }
 0x316   :  { %v6808_v50 = vmul.f32 %v6797_v47, %v6797_v47  ;;  %v3793_v11 = vmul.f32 %v3761_v21, %v6739_v17  ;;  %v2216_v42 = vadd.f32 0.5, %v2184_v32  ;;  %vm3411_vm5 = vcmp.lt.f32.partialorder %v3379_v29, -1.5707964 }
 0x317   :  { %v2787_v60 = vadd.f32 0.008333333, %v2755_v13  ;;  %vm2406_vm6 = vcmp.gt.f32.partialorder %v6750_v41, 1.5707964  ;;  %v3095_v33 = vmul.f32 0.15915494, %v3018_v45  ;;  %v6817_v46 = vsub.f32 %v3222_v0, %v3254_v2 }
 0x318   :  { %v3570_v22 = vadd.f32 2.7557319e-06, %v3538_v27  ;;  %v2628_v7 = vmul.f32 -2.5052108e-08, %v6808_v50  ;;  %v3825_v15 = vmul.f32 %v3793_v11, %v6735_v6  ;;  %v2248_v48 = vfloor.f32 %v2216_v42 }
 0x319   :  { %v2819_v34 = vmul.f32 %v2787_v60, %v6765_v8  ;;  %v3443_v55 = vsub.f32 -3.1415927, %v3379_v29  ;;  %v2439_v52 = vsub.f32 3.1415927, %v6794_v56  ;;  %v3127_v62 = vadd.f32 0.5, %v3095_v33 }
 0x31a   :  { %v3602_v17 = vmul.f32 %v3570_v22, %v6792_v20  ;;  %v2660_v28 = vadd.f32 2.7557319e-06, %v2628_v7  ;;  %v3857_v23 = vadd.f32 %v3825_v15, %v6735_v6  ;;  %v2280_v49 = vmul.f32 6.28125, %v2248_v48 }
 0x31b   :  { %v2851_v58 = vadd.f32 -0.16666667, %v2819_v34  ;;  %v3159_v4 = vfloor.f32 %v3127_v62  ;;  %v6822_v26 = vsel %vm3411_vm5, %v3443_v55, %v3379_v29  ;;  %v2344_v40 = vmul.f32 0.0019353072, %v2248_v48 }
 0x31c   :  { %v3634_v18 = vadd.f32 -0.0001984127, %v3602_v17  ;;  %v2692_v9 = vmul.f32 %v2660_v28, %v6808_v50  ;;  %3931 = vmatmul.f32.gmra.mxu0 %v3857_v23  ;;  %v2312_v24 = vsub.f32 %v2151_v30, %v2280_v49  ;;  %v3020_v16 = vpop.f32.mrf.mxu3  ;;  %v6827_v1 = vmul.f32 %v6822_v26, %v6822_v26 }
 0x31d   :  { %v2883_v19 = vmul.f32 %v2851_v58, %v6765_v8  ;;  %v3191_v6 = vmul.f32 6.28125, %v3159_v4  ;;  %v3021_v36 = vadd.f32 %v6833_v35, %v3020_v16  ;;  %v2469_v8 = vsel %vm2405_vm4, %v2437_v5, %v6728_v61 }
 0x31e   :  { %v3666_v54 = vmul.f32 %v3634_v18, %v6792_v20  ;;  %v6841_v12 = vsub.f32 %v2312_v24, %v2344_v40  ;;  %v2724_v10 = vadd.f32 -0.0001984127, %v2692_v9  ;;  %v3539_v31 = vmul.f32 -2.5052108e-08, %v6827_v1 }
 0x31f   :  { %v2915_v63 = vmul.f32 %v2883_v19, %v6752_v25  ;;  %v3350_v3 = vsub.f32 3.1415927, %v6817_v46  ;;  %v3223_v43 = vsub.f32 %v3018_v45, %v3191_v6  ;;  %v3096_v37 = vmul.f32 0.15915494, %v3021_v36 }
 0x320   :  { %v3698_v30 = vadd.f32 0.008333333, %v3666_v54  ;;  %v3255_v53 = vmul.f32 0.0019353072, %v3159_v4  ;;  %v2756_v2 = vmul.f32 %v2724_v10, %v6808_v50  ;;  %vm2501_vm7 = vcmp.lt.f32.partialorder %v2469_v8, -1.5707964 }
 0x321   :  { %v2947_v29 = vadd.f32 %v2915_v63, %v6752_v25  ;;  %v2440_v61 = vsub.f32 3.1415927, %v6841_v12  ;;  %v3128_v21 = vadd.f32 0.5, %v3096_v37  ;;  %v3571_v32 = vadd.f32 2.7557319e-06, %v3539_v31 }
 0x322   :  { %v3730_v5 = vmul.f32 %v3698_v30, %v6792_v20  ;;  %v2788_v44 = vadd.f32 0.008333333, %v2756_v2  ;;  %v2533_v13 = vsub.f32 -3.1415927, %v2469_v8  ;;  %vm3316_vm8 = vcmp.gt.f32.partialorder %v6743_v38, 1.5707964 }
 0x323   :  { %3067 = vmatmul.f32.gmra.mxu3 %v2947_v29  ;;  %v2470_v25 = vsel %vm2406_vm6, %v2438_v39, %v6750_v41  ;;  %vm2407_vm9 = vcmp.gt.f32.partialorder %v6794_v56, 1.5707964  ;;  %v6857_v0 = vsub.f32 %v3223_v43, %v3255_v53  ;;  %v3160_v27 = vfloor.f32 %v3128_v21 }
 0x324   :  { %v3762_v45 = vadd.f32 -0.16666667, %v3730_v5  ;;  %v3603_v11 = vmul.f32 %v3571_v32, %v6827_v1  ;;  %v2820_v42 = vmul.f32 %v2788_v44, %v6808_v50  ;;  %v3023_v60 = vpop.f32.mrf.mxu3  ;;  %v6862_v33 = vsel %vm2501_vm7, %v2533_v13, %v2469_v8 }
 0x325   :  { %v3380_v22 = vsel %vm3316_vm8, %v3348_v59, %v6743_v38  ;;  %vm2502_vm10 = vcmp.lt.f32.partialorder %v2470_v25, -1.5707964  ;;  %v3192_v39 = vmul.f32 6.28125, %v3160_v27  ;;  %v3256_v7 = vmul.f32 0.0019353072, %v3160_v27 }
 0x326   :  { %v3794_v41 = vmul.f32 %v3762_v45, %v6792_v20  ;;  %v3635_v15 = vadd.f32 -0.0001984127, %v3603_v11  ;;  %v2852_v48 = vadd.f32 -0.16666667, %v2820_v42  ;;  %v3024_v34 = vadd.f32 %v6833_v35, %v3023_v60 }
 0x327   :  { %v6871_v55 = vmul.f32 %v6862_v33, %v6862_v33  ;;  %vm3412_vm11 = vcmp.lt.f32.partialorder %v3380_v22, -1.5707964  ;;  %v3224_v17 = vsub.f32 %v3021_v36, %v3192_v39  ;;  %v3444_v38 = vsub.f32 -3.1415927, %v3380_v22 }
 0x328   :  { %v3826_v62 = vmul.f32 %v3794_v41, %v6785_v51  ;;  %v3667_v28 = vmul.f32 %v3635_v15, %v6827_v1  ;;  %v2884_v59 = vmul.f32 %v2852_v48, %v6808_v50  ;;  %v3097_v20 = vmul.f32 0.15915494, %v3024_v34 }
 0x329   :  { %v2629_v23 = vmul.f32 -2.5052108e-08, %v6871_v55  ;;  %v2534_v49 = vsub.f32 -3.1415927, %v2470_v25  ;;  %v6878_v4 = vsub.f32 %v3224_v17, %v3256_v7  ;;  %v6880_v9 = vsel %vm3412_vm11, %v3444_v38, %v3380_v22 }
 0x32a   :  { %v3858_v58 = vadd.f32 %v3826_v62, %v6785_v51  ;;  %v3699_v18 = vadd.f32 0.008333333, %v3667_v28  ;;  %v2916_v24 = vmul.f32 %v2884_v59, %v6797_v47  ;;  %v3129_v40 = vadd.f32 0.5, %v3097_v20 }
 0x32b   :  { %v2661_v19 = vadd.f32 2.7557319e-06, %v2629_v23  ;;  %v6885_v16 = vmul.f32 %v6880_v9, %v6880_v9  ;;  %v3351_v50 = vsub.f32 3.1415927, %v6857_v0  ;;  %v6890_v51 = vsel %vm2502_vm10, %v2534_v49, %v2470_v25 }
 0x32c   :  { %3934 = vmatmul.f32.gmra.mxu0 %v3858_v58  ;;  %v3731_v6 = vmul.f32 %v3699_v18, %v6827_v1  ;;  %vm3317_vm12 = vcmp.gt.f32.partialorder %v6774_v57, 1.5707964  ;;  %v2948_v54 = vadd.f32 %v2916_v24, %v6797_v47  ;;  %v3161_v36 = vfloor.f32 %v3129_v40  ;;  %v3026_v10 = vpop.f32.mrf.mxu3 }
 0x32d   :  { %v2693_v8 = vmul.f32 %v2661_v19, %v6871_v55  ;;  %v3540_v63 = vmul.f32 -2.5052108e-08, %v6885_v16  ;;  %v3027_v43 = vadd.f32 %v6833_v35, %v3026_v10  ;;  %v6899_v30 = vmul.f32 %v6890_v51, %v6890_v51 }
 0x32e   :  { %v3763_v31 = vadd.f32 -0.16666667, %v3731_v6  ;;  %v3381_v37 = vsel %vm3317_vm12, %v3349_v14, %v6774_v57  ;;  %v3352_v53 = vsub.f32 3.1415927, %v6878_v4  ;;  %3070 = vmatmul.f32.gmra.mxu3 %v2948_v54  ;;  %v3193_v47 = vmul.f32 6.28125, %v3161_v36 }
 0x32f   :  { %v2725_v29 = vadd.f32 -0.0001984127, %v2693_v8  ;;  %v2471_v2 = vsel %vm2407_vm9, %v2439_v52, %v6794_v56  ;;  %v3572_v21 = vadd.f32 2.7557319e-06, %v3540_v63  ;;  %v3098_v32 = vmul.f32 0.15915494, %v3027_v43 }
 0x330   :  { %v3795_v5 = vmul.f32 %v3763_v31, %v6827_v1  ;;  %v2630_v44 = vmul.f32 -2.5052108e-08, %v6899_v30  ;;  %v3225_v13 = vsub.f32 %v3024_v34, %v3193_v47  ;;  %vm3413_vm13 = vcmp.lt.f32.partialorder %v3381_v37, -1.5707964 }
 0x331   :  { %v2757_v57 = vmul.f32 %v2725_v29, %v6871_v55  ;;  %v3445_v14 = vsub.f32 -3.1415927, %v3381_v37  ;;  %v3604_v45 = vmul.f32 %v3572_v21, %v6885_v16  ;;  %v3130_v27 = vadd.f32 0.5, %v3098_v32 }
 0x332   :  { %v3827_v25 = vmul.f32 %v3795_v5, %v6822_v26  ;;  %v2662_v11 = vadd.f32 2.7557319e-06, %v2630_v44  ;;  %v3257_v42 = vmul.f32 0.0019353072, %v3161_v36  ;;  %vm2503_vm14 = vcmp.lt.f32.partialorder %v2471_v2, -1.5707964 }
 0x333   :  { %v2789_v60 = vadd.f32 0.008333333, %v2757_v57  ;;  %v6915_v56 = vsel %vm3413_vm13, %v3445_v14, %v3381_v37  ;;  %v3636_v1 = vadd.f32 -0.0001984127, %v3604_v45  ;;  %v3162_v22 = vfloor.f32 %v3130_v27 }
 0x334   :  { %v3859_v52 = vadd.f32 %v3827_v25, %v6822_v26  ;;  %v2694_v41 = vmul.f32 %v2662_v11, %v6899_v30  ;;  %v6919_v39 = vsub.f32 %v3225_v13, %v3257_v42  ;;  %v6924_v15 = vmul.f32 %v6915_v56, %v6915_v56  ;;  %v3029_v48 = vpop.f32.mrf.mxu3 }
 0x335   :  { %v2821_v7 = vmul.f32 %v2789_v60, %v6871_v55  ;;  %v2535_v34 = vsub.f32 -3.1415927, %v2471_v2  ;;  %v3668_v62 = vmul.f32 %v3636_v1, %v6885_v16  ;;  %v3194_v17 = vmul.f32 6.28125, %v3162_v22 }
 0x336   :  { %3937 = vmatmul.f32.gmra.mxu0 %v3859_v52  ;;  %v3258_v28 = vmul.f32 0.0019353072, %v3162_v22  ;;  %v2726_v26 = vadd.f32 -0.0001984127, %v2694_v41  ;;  %vm2408_vm15 = vcmp.gt.f32.partialorder %v6841_v12, 1.5707964  ;;  %v3030_v20 = vadd.f32 %v6833_v35, %v3029_v48 }
 0x337   :  { %v2853_v38 = vadd.f32 -0.16666667, %v2821_v7  ;;  %v3541_v59 = vmul.f32 -2.5052108e-08, %v6924_v15  ;;  %v6931_v23 = vsel %vm2503_vm14, %v2535_v34, %v2471_v2  ;;  %v3700_v49 = vadd.f32 0.008333333, %v3668_v62 }
 0x338   :  { %v3226_v58 = vsub.f32 %v3027_v43, %v3194_v17  ;;  %v2758_v18 = vmul.f32 %v2726_v26, %v6899_v30  ;;  %v6936_v24 = vmul.f32 %v6931_v23, %v6931_v23  ;;  %v3099_v6 = vmul.f32 0.15915494, %v3030_v20 }
 0x339   :  { %v2885_v40 = vmul.f32 %v2853_v38, %v6871_v55  ;;  %v3573_v19 = vadd.f32 2.7557319e-06, %v3541_v59  ;;  %vm3318_vm0 = vcmp.gt.f32.partialorder %v6817_v46, 1.5707964  ;;  %v3732_v54 = vmul.f32 %v3700_v49, %v6885_v16 }
 0x33a   :  { %v6941_v36 = vsub.f32 %v3226_v58, %v3258_v28  ;;  %v2790_v8 = vadd.f32 0.008333333, %v2758_v18  ;;  %v2631_v63 = vmul.f32 -2.5052108e-08, %v6936_v24  ;;  %v3131_v43 = vadd.f32 0.5, %v3099_v6 }
 0x33b   :  { %v2917_v10 = vmul.f32 %v2885_v40, %v6862_v33  ;;  %v3605_v31 = vmul.f32 %v3573_v19, %v6924_v15  ;;  %v3382_v55 = vsel %vm3318_vm0, %v3350_v3, %v6817_v46  ;;  %v3353_v37 = vsub.f32 3.1415927, %v6919_v39 }
 0x33c   :  { %v3764_v47 = vadd.f32 -0.16666667, %v3732_v54  ;;  %v2822_v29 = vmul.f32 %v2790_v8, %v6899_v30  ;;  %v2663_v2 = vadd.f32 2.7557319e-06, %v2631_v63  ;;  %v3163_v32 = vfloor.f32 %v3131_v43  ;;  %v3032_v44 = vpop.f32.mrf.mxu3 }
 0x33d   :  { %v2949_v5 = vadd.f32 %v2917_v10, %v6862_v33  ;;  %v3637_v21 = vadd.f32 -0.0001984127, %v3605_v31  ;;  %vm3414_vm1 = vcmp.lt.f32.partialorder %v3382_v55, -1.5707964  ;;  %v3446_v25 = vsub.f32 -3.1415927, %v3382_v55 }
 0x33e   :  { %v3796_v13 = vmul.f32 %v3764_v47, %v6885_v16  ;;  %v2854_v57 = vadd.f32 -0.16666667, %v2822_v29  ;;  %v2695_v14 = vmul.f32 %v2663_v2, %v6936_v24  ;;  %v3354_v46 = vsub.f32 3.1415927, %v6941_v36 }
 0x33f   :  { %3073 = vmatmul.f32.gmra.mxu3 %v2949_v5  ;;  %v3669_v3 = vmul.f32 %v3637_v21, %v6924_v15  ;;  %v3195_v45 = vmul.f32 6.28125, %v3163_v32  ;;  %v3033_v27 = vadd.f32 %v6833_v35, %v3032_v44  ;;  %v6959_v60 = vsel %vm3414_vm1, %v3446_v25, %v3382_v55 }
 0x340   :  { %v3828_v33 = vmul.f32 %v3796_v13, %v6880_v9  ;;  %v2886_v11 = vmul.f32 %v2854_v57, %v6899_v30  ;;  %v2727_v42 = vadd.f32 -0.0001984127, %v2695_v14  ;;  %v6963_v1 = vmul.f32 %v6959_v60, %v6959_v60 }
 0x341   :  { %v3701_v16 = vadd.f32 0.008333333, %v3669_v3  ;;  %v3227_v52 = vsub.f32 %v3030_v20, %v3195_v45  ;;  %v3100_v22 = vmul.f32 0.15915494, %v3033_v27  ;;  %v2472_v30 = vsel %vm2408_vm15, %v2440_v61, %v6841_v12 }
 0x342   :  { %v3860_v41 = vadd.f32 %v3828_v33, %v6880_v9  ;;  %v2918_v7 = vmul.f32 %v2886_v11, %v6890_v51  ;;  %v2759_v48 = vmul.f32 %v2727_v42, %v6936_v24  ;;  %v3259_v62 = vmul.f32 0.0019353072, %v3163_v32 }
 0x343   :  { %v3733_v34 = vmul.f32 %v3701_v16, %v6924_v15  ;;  %v3542_v17 = vmul.f32 -2.5052108e-08, %v6963_v1  ;;  %v3132_v28 = vadd.f32 0.5, %v3100_v22  ;;  %vm2504_vm2 = vcmp.lt.f32.partialorder %v2472_v30, -1.5707964 }
 0x344   :  { %3940 = vmatmul.f32.gmra.mxu0 %v3860_v41  ;;  %v2950_v26 = vadd.f32 %v2918_v7, %v6890_v51  ;;  %v2791_v9 = vadd.f32 0.008333333, %v2759_v48  ;;  %v2536_v38 = vsub.f32 -3.1415927, %v2472_v30  ;;  %v6976_v20 = vsub.f32 %v3227_v52, %v3259_v62  ;;  %v3035_v18 = vpop.f32.mrf.mxu3 }
 0x345   :  { %v3765_v59 = vadd.f32 -0.16666667, %v3733_v34  ;;  %v3574_v49 = vadd.f32 2.7557319e-06, %v3542_v17  ;;  %v3164_v58 = vfloor.f32 %v3132_v28  ;;  %vm3319_vm3 = vcmp.gt.f32.partialorder %v6857_v0, 1.5707964 }
 0x346   :  { %v2823_v12 = vmul.f32 %v2791_v9, %v6936_v24  ;;  %v6979_v61 = vsel %vm2504_vm2, %v2536_v38, %v2472_v30  ;;  %v3036_v40 = vadd.f32 %v6833_v35, %v3035_v18  ;;  %v3383_v10 = vsel %vm3319_vm3, %v3351_v50, %v6857_v0 }
 0x347   :  { %3076 = vmatmul.f32.gmra.mxu3 %v2950_v26  ;;  %v3797_v51 = vmul.f32 %v3765_v59, %v6924_v15  ;;  %v3606_v19 = vmul.f32 %v3574_v49, %v6963_v1  ;;  %v3196_v6 = vmul.f32 6.28125, %v3164_v58  ;;  %v3260_v54 = vmul.f32 0.0019353072, %v3164_v58 }
 0x348   :  { %v2855_v8 = vadd.f32 -0.16666667, %v2823_v12  ;;  %v6987_v63 = vmul.f32 %v6979_v61, %v6979_v61  ;;  %v3101_v31 = vmul.f32 0.15915494, %v3036_v40  ;;  %vm3415_vm4 = vcmp.lt.f32.partialorder %v3383_v10, -1.5707964 }
 0x349   :  { %v3829_v43 = vmul.f32 %v3797_v51, %v6915_v56  ;;  %v3638_v55 = vadd.f32 -0.0001984127, %v3606_v19  ;;  %v3228_v47 = vsub.f32 %v3033_v27, %v3196_v6  ;;  %v3447_v2 = vsub.f32 -3.1415927, %v3383_v10 }
 0x34a   :  { %v2887_v15 = vmul.f32 %v2855_v8, %v6936_v24  ;;  %v2632_v29 = vmul.f32 -2.5052108e-08, %v6987_v63  ;;  %v3133_v5 = vadd.f32 0.5, %v3101_v31  ;;  %vm3320_vm5 = vcmp.gt.f32.partialorder %v6878_v4, 1.5707964 }
 0x34b   :  { %v3861_v21 = vadd.f32 %v3829_v43, %v6915_v56  ;;  %v3670_v32 = vmul.f32 %v3638_v55, %v6963_v1  ;;  %v3292_v44 = vsub.f32 %v3228_v47, %v3260_v54  ;;  %v6999_v13 = vsel %vm3415_vm4, %v3447_v2, %v3383_v10 }
 0x34c   :  { %v2919_v0 = vmul.f32 %v2887_v15, %v6931_v23  ;;  %v2664_v50 = vadd.f32 2.7557319e-06, %v2632_v29  ;;  %v3165_v57 = vfloor.f32 %v3133_v5  ;;  %v3355_v24 = vsub.f32 3.1415927, %v6976_v20  ;;  %v3038_v56 = vpop.f32.mrf.mxu3 }
 0x34d   :  { %3943 = vmatmul.f32.gmra.mxu0 %v3861_v21  ;;  %v3702_v14 = vadd.f32 0.008333333, %v3670_v32  ;;  %vm3324_vm6 = vcmp.gt.f32.partialorder %v3292_v44, 1.5707964  ;;  %v7004_v25 = vmul.f32 %v6999_v13, %v6999_v13  ;;  %v3356_v45 = vsub.f32 3.1415927, %v3292_v44 }
 0x34e   :  { %v2951_v3 = vadd.f32 %v2919_v0, %v6931_v23  ;;  %v2696_v27 = vmul.f32 %v2664_v50, %v6987_v63  ;;  %v3197_v33 = vmul.f32 6.28125, %v3165_v57  ;;  %v3384_v16 = vsel %vm3320_vm5, %v3352_v53, %v6878_v4 }
 0x34f   :  { %v3734_v11 = vmul.f32 %v3702_v14, %v6963_v1  ;;  %v3543_v42 = vmul.f32 -2.5052108e-08, %v7004_v25  ;;  %v3039_v52 = vadd.f32 %v6833_v35, %v3038_v56  ;;  %vm3416_vm7 = vcmp.lt.f32.partialorder %v3384_v16, -1.5707964 }
 0x350   :  { %3079 = vmatmul.f32.gmra.mxu3 %v2951_v3  ;;  %v2728_v22 = vadd.f32 -0.0001984127, %v2696_v27  ;;  %v3229_v41 = vsub.f32 %v3036_v40, %v3197_v33  ;;  %v3448_v23 = vsub.f32 -3.1415927, %v3384_v16  ;;  %v3261_v62 = vmul.f32 0.0019353072, %v3165_v57 }
 0x351   :  { %v3766_v7 = vadd.f32 -0.16666667, %v3734_v11  ;;  %v3575_v48 = vadd.f32 2.7557319e-06, %v3543_v42  ;;  %v3102_v30 = vmul.f32 0.15915494, %v3039_v52  ;;  %v7032_v49 = vsel %vm3324_vm6, %v3356_v45, %v3292_v44 }
 0x352   :  { %v2760_v34 = vmul.f32 %v2728_v22, %v6987_v63  ;;  %v7017_v17 = vsel %vm3416_vm7, %v3448_v23, %v3384_v16  ;;  %vm3321_vm8 = vcmp.gt.f32.partialorder %v6919_v39, 1.5707964  ;;  %v7026_v38 = vsub.f32 %v3229_v41, %v3261_v62 }
 0x353   :  { %v3798_v28 = vmul.f32 %v3766_v7, %v6963_v1  ;;  %v3607_v4 = vmul.f32 %v3575_v48, %v7004_v25  ;;  %v7024_v53 = vmul.f32 %v7017_v17, %v7017_v17  ;;  %v3134_v26 = vadd.f32 0.5, %v3102_v30 }
 0x354   :  { %v2792_v9 = vadd.f32 0.008333333, %v2760_v34  ;;  %v3385_v59 = vsel %vm3321_vm8, %v3353_v37, %v6919_v39  ;;  %v3041_v40 = vpop.f32.mrf.mxu3  ;;  %vm3322_vm10 = vcmp.gt.f32.partialorder %v6941_v36, 1.5707964  ;;  %vm3323_vm11 = vcmp.gt.f32.partialorder %v6976_v20, 1.5707964 }
 0x355   :  { %v3830_v58 = vmul.f32 %v3798_v28, %v6959_v60  ;;  %v3639_v1 = vadd.f32 -0.0001984127, %v3607_v4  ;;  %v3544_v18 = vmul.f32 -2.5052108e-08, %v7024_v53  ;;  %v3166_v12 = vfloor.f32 %v3134_v26 }
 0x356   :  { %v2824_v51 = vmul.f32 %v2792_v9, %v6987_v63  ;;  %vm3417_vm9 = vcmp.lt.f32.partialorder %v3385_v59, -1.5707964  ;;  %v3449_v19 = vsub.f32 -3.1415927, %v3385_v59  ;;  %v3042_v6 = vadd.f32 %v6833_v35, %v3041_v40 }
 0x357   :  { %v3862_v54 = vadd.f32 %v3830_v58, %v6959_v60  ;;  %v3671_v39 = vmul.f32 %v3639_v1, %v7004_v25  ;;  %v3576_v37 = vadd.f32 2.7557319e-06, %v3544_v18  ;;  %v3198_v8 = vmul.f32 6.28125, %v3166_v12 }
 0x358   :  { %v2856_v10 = vadd.f32 -0.16666667, %v2824_v51  ;;  %v3262_v31 = vmul.f32 0.0019353072, %v3166_v12  ;;  %v7040_v43 = vsel %vm3417_vm9, %v3449_v19, %v3385_v59  ;;  %v3103_v55 = vmul.f32 0.15915494, %v3042_v6 }
 0x359   :  { %3946 = vmatmul.f32.gmra.mxu0 %v3862_v54  ;;  %v3703_v47 = vadd.f32 0.008333333, %v3671_v39  ;;  %v3608_v15 = vmul.f32 %v3576_v37, %v7024_v53  ;;  %v3230_v29 = vsub.f32 %v3039_v52, %v3198_v8  ;;  %v7045_v2 = vmul.f32 %v7040_v43, %v7040_v43 }
 0x35a   :  { %v2888_v60 = vmul.f32 %v2856_v10, %v6987_v63  ;;  %v3135_v5 = vadd.f32 0.5, %v3103_v55  ;;  %vm3325_vm12 = vcmp.gt.f32.partialorder %v7026_v38, 1.5707964  ;;  %v3386_v63 = vsel %vm3322_vm10, %v3354_v46, %v6941_v36 }
 0x35b   :  { %v3735_v21 = vmul.f32 %v3703_v47, %v7004_v25  ;;  %v3640_v32 = vadd.f32 -0.0001984127, %v3608_v15  ;;  %v3545_v44 = vmul.f32 -2.5052108e-08, %v7045_v2  ;;  %v7054_v50 = vsub.f32 %v3230_v29, %v3262_v31 }
 0x35c   :  { %v2920_v0 = vmul.f32 %v2888_v60, %v6979_v61  ;;  %v3167_v57 = vfloor.f32 %v3135_v5  ;;  %v3357_v56 = vsub.f32 3.1415927, %v7026_v38  ;;  %v3044_v45 = vpop.f32.mrf.mxu3  ;;  %v3387_v27 = vsel %vm3323_vm11, %v3355_v24, %v6976_v20 }
 0x35d   :  { %v3767_v14 = vadd.f32 -0.16666667, %v3735_v21  ;;  %v3672_v3 = vmul.f32 %v3640_v32, %v7024_v53  ;;  %v3577_v11 = vadd.f32 2.7557319e-06, %v3545_v44  ;;  %vm3418_vm13 = vcmp.lt.f32.partialorder %v3386_v63, -1.5707964 }
 0x35e   :  { %v2952_v33 = vadd.f32 %v2920_v0, %v6979_v61  ;;  %v3199_v42 = vmul.f32 6.28125, %v3167_v57  ;;  %v3263_v16 = vmul.f32 0.0019353072, %v3167_v57  ;;  %v3450_v36 = vsub.f32 -3.1415927, %v3386_v63 }
 0x35f   :  { %v3799_v52 = vmul.f32 %v3767_v14, %v7004_v25  ;;  %v3704_v22 = vadd.f32 0.008333333, %v3672_v3  ;;  %vm3326_vm14 = vcmp.gt.f32.partialorder %v7054_v50, 1.5707964  ;;  %v3609_v46 = vmul.f32 %v3577_v11, %v7045_v2 }
 0x360   :  { %3082 = vmatmul.f32.gmra.mxu3 %v2952_v33  ;;  %v3231_v41 = vsub.f32 %v3042_v6, %v3199_v42  ;;  %v3045_v23 = vadd.f32 %v6833_v35, %v3044_v45  ;;  %vm3419_vm15 = vcmp.lt.f32.partialorder %v3387_v27, -1.5707964  ;;  %v7071_v24 = vsel %vm3418_vm13, %v3450_v36, %v3386_v63 }
 0x361   :  { %v3831_v20 = vmul.f32 %v3799_v52, %v6999_v13  ;;  %v3736_v61 = vmul.f32 %v3704_v22, %v7024_v53  ;;  %v3451_v7 = vsub.f32 -3.1415927, %v3387_v27  ;;  %v3641_v25 = vadd.f32 -0.0001984127, %v3609_v46 }
 0x362   :  { %v7073_v48 = vsub.f32 %v3231_v41, %v3263_v16  ;;  %v7077_v30 = vmul.f32 %v7071_v24, %v7071_v24  ;;  %v3104_v34 = vmul.f32 0.15915494, %v3045_v23  ;;  %v3358_v4 = vsub.f32 3.1415927, %v7054_v50 }
 0x363   :  { %v3863_v62 = vadd.f32 %v3831_v20, %v6999_v13  ;;  %v3768_v28 = vadd.f32 -0.16666667, %v3736_v61  ;;  %v7081_v26 = vsel %vm3419_vm15, %v3451_v7, %v3387_v27  ;;  %v3673_v9 = vmul.f32 %v3641_v25, %v7045_v2 }
 0x364   :  { %v3359_v59 = vsub.f32 3.1415927, %v7073_v48  ;;  %v3546_v58 = vmul.f32 -2.5052108e-08, %v7077_v30  ;;  %vm3420_vm0 = vcmp.lt.f32.partialorder %v7032_v49, -1.5707964  ;;  %v7090_v13 = vmul.f32 %v7081_v26, %v7081_v26  ;;  %v3047_v12 = vpop.f32.mrf.mxu3 }
 0x365   :  { %3949 = vmatmul.f32.gmra.mxu0 %v3863_v62  ;;  %v3800_v1 = vmul.f32 %v3768_v28, %v7024_v53  ;;  %v3136_v18 = vadd.f32 0.5, %v3104_v34  ;;  %v3452_v40 = vsub.f32 -3.1415927, %v7032_v49  ;;  %v3705_v51 = vadd.f32 0.008333333, %v3673_v9 }
 0x366   :  { %v3578_v19 = vadd.f32 2.7557319e-06, %v3546_v58  ;;  %v3048_v6 = vadd.f32 %v6833_v35, %v3047_v12  ;;  %v3389_v54 = vsel %vm3325_vm12, %v3357_v56, %v7026_v38  ;;  %v3547_v53 = vmul.f32 -2.5052108e-08, %v7090_v13 }
 0x367   :  { %v3832_v39 = vmul.f32 %v3800_v1, %v7017_v17  ;;  %v3168_v37 = vfloor.f32 %v3136_v18  ;;  %v7100_v8 = vsel %vm3420_vm0, %v3452_v40, %v7032_v49  ;;  %v3737_v10 = vmul.f32 %v3705_v51, %v7045_v2 }
 0x368   :  { %v3610_v31 = vmul.f32 %v3578_v19, %v7077_v30  ;;  %v3105_v55 = vmul.f32 0.15915494, %v3048_v6  ;;  %v7106_v47 = vmul.f32 %v7100_v8, %v7100_v8  ;;  %vm3327_vm1 = vcmp.gt.f32.partialorder %v7073_v48, 1.5707964 }
 0x369   :  { %v3864_v15 = vadd.f32 %v3832_v39, %v7017_v17  ;;  %v3200_v38 = vmul.f32 6.28125, %v3168_v37  ;;  %v3264_v29 = vmul.f32 0.0019353072, %v3168_v37  ;;  %v3579_v60 = vadd.f32 2.7557319e-06, %v3547_v53 }
 0x36a   :  { %v3769_v5 = vadd.f32 -0.16666667, %v3737_v10  ;;  %v3642_v21 = vadd.f32 -0.0001984127, %v3610_v31  ;;  %v3137_v49 = vadd.f32 0.5, %v3105_v55  ;;  %v3390_v57 = vsel %vm3326_vm14, %v3358_v4, %v7054_v50 }
 0x36b   :  { %v3232_v32 = vsub.f32 %v3045_v23, %v3200_v38  ;;  %v3611_v44 = vmul.f32 %v3579_v60, %v7090_v13  ;;  %v3548_v0 = vmul.f32 -2.5052108e-08, %v7106_v47  ;;  %vm3421_vm2 = vcmp.lt.f32.partialorder %v3389_v54, -1.5707964 }
 0x36c   :  { %v3801_v63 = vmul.f32 %v3769_v5, %v7045_v2  ;;  %v3674_v17 = vmul.f32 %v3642_v21, %v7077_v30  ;;  %v3169_v14 = vfloor.f32 %v3137_v49  ;;  %v3050_v45 = vpop.f32.mrf.mxu3  ;;  %v3453_v27 = vsub.f32 -3.1415927, %v3389_v54 }
 0x36d   :  { %3952 = vmatmul.f32.gmra.mxu0 %v3864_v15  ;;  %v3643_v56 = vadd.f32 -0.0001984127, %v3611_v44  ;;  %v3580_v3 = vadd.f32 2.7557319e-06, %v3548_v0  ;;  %v3296_v42 = vsub.f32 %v3232_v32, %v3264_v29  ;;  %vm3422_vm3 = vcmp.lt.f32.partialorder %v3390_v57, -1.5707964 }
 0x36e   :  { %v3833_v33 = vmul.f32 %v3801_v63, %v7040_v43  ;;  %v3706_v11 = vadd.f32 0.008333333, %v3674_v17  ;;  %v3201_v16 = vmul.f32 6.28125, %v3169_v14  ;;  %v3265_v22 = vmul.f32 0.0019353072, %v3169_v14 }
 0x36f   :  { %v3675_v52 = vmul.f32 %v3643_v56, %v7090_v13  ;;  %v3612_v50 = vmul.f32 %v3580_v3, %v7106_v47  ;;  %v3051_v41 = vadd.f32 %v6833_v35, %v3050_v45  ;;  %v7124_v61 = vsel %vm3421_vm2, %v3453_v27, %v3389_v54  ;;  %v3923_v54 = vpop.f32.mrf.mxu0 }
 0x370   :  { %v3865_v2 = vadd.f32 %v3833_v33, %v7040_v43  ;;  %v3738_v36 = vmul.f32 %v3706_v11, %v7077_v30  ;;  %v3233_v46 = vsub.f32 %v3048_v6, %v3201_v16  ;;  %v16_v7 = vstv %s7542_s10 }
 0x371   :  { %v3707_v23 = vadd.f32 0.008333333, %v3675_v52  ;;  %v3644_v20 = vadd.f32 -0.0001984127, %v3612_v50  ;;  %v3106_v62 = vmul.f32 0.15915494, %v3051_v41  ;;  %v7133_v43 = vmul.f32 %v7124_v61, %v7124_v61 }
 0x372   :  { %v3770_v25 = vadd.f32 -0.16666667, %v3738_v36  ;;  %v7129_v34 = vsub.f32 %v3233_v46, %v3265_v22  ;;  %17 = vst [vmem:[#allocation2] sm:$0x1] %v16_v7  ;;  %vm3328_vm4 = vcmp.gt.f32.partialorder %v3296_v42, 1.5707964  ;;  %v3391_v12 = vsel %vm3327_vm1, %v3359_v59, %v7073_v48 }
 0x373   :  { %v3739_v28 = vmul.f32 %v3707_v23, %v7090_v13  ;;  %v3676_v4 = vmul.f32 %v3644_v20, %v7106_v47  ;;  %v3454_v9 = vsub.f32 -3.1415927, %v3390_v57  ;;  %v3360_v1 = vsub.f32 3.1415927, %v3296_v42 }
 0x374   :  { %v3802_v58 = vmul.f32 %v3770_v25, %v7077_v30  ;;  %v3138_v18 = vadd.f32 0.5, %v3106_v62  ;;  %v3549_v19 = vmul.f32 -2.5052108e-08, %v7133_v43  ;;  %v3053_v6 = vpop.f32.mrf.mxu3  ;;  %v3361_v37 = vsub.f32 3.1415927, %v7129_v34 }
 0x375   :  { %3955 = vmatmul.f32.gmra.mxu0 %v3865_v2  ;;  %v3771_v40 = vadd.f32 -0.16666667, %v3739_v28  ;;  %v3708_v51 = vadd.f32 0.008333333, %v3676_v4  ;;  %v7145_v39 = vsel %vm3422_vm3, %v3454_v9, %v3390_v57  ;;  %v3054_v10 = vadd.f32 %v6833_v35, %v3053_v6 }
 0x376   :  { %v3834_v30 = vmul.f32 %v3802_v58, %v7071_v24  ;;  %v3170_v53 = vfloor.f32 %v3138_v18  ;;  %v3581_v59 = vadd.f32 2.7557319e-06, %v3549_v19  ;;  %v7154_v55 = vmul.f32 %v7145_v39, %v7145_v39 }
 0x377   :  { %v3803_v31 = vmul.f32 %v3771_v40, %v7090_v13  ;;  %v3740_v48 = vmul.f32 %v3708_v51, %v7106_v47  ;;  %vm3329_vm5 = vcmp.gt.f32.partialorder %v7129_v34, 1.5707964  ;;  %v3107_v29 = vmul.f32 0.15915494, %v3054_v10 }
 0x378   :  { %v3202_v15 = vmul.f32 6.28125, %v3170_v53  ;;  %v3266_v38 = vmul.f32 0.0019353072, %v3170_v53  ;;  %vm4019_vm6 = vcmask 7168   ;;  %v3866_v60 = vadd.f32 %v3834_v30, %v7071_v24 }
 0x379   :  { %v3835_v5 = vmul.f32 %v3803_v31, %v7081_v26  ;;  %v3772_v21 = vadd.f32 -0.16666667, %v3740_v48  ;;  %v3613_v13 = vmul.f32 %v3581_v59, %v7133_v43  ;;  %v7160_v49 = vld [vmem:[#allocation2] ss:$0 sm:$0xff]  ;;  %v3139_v44 = vadd.f32 0.5, %v3107_v29 }
 0x37a   :  { %v3234_v32 = vsub.f32 %v3051_v41, %v3202_v15  ;;  %v3550_v0 = vmul.f32 -2.5052108e-08, %v7154_v55  ;;  %v3392_v57 = vsel %vm3328_vm4, %v3360_v1, %v3296_v42  ;;  %v3924_v14 = vadd.f32 %v7160_v49, %v3923_v54 }
 0x37b   :  { %v3804_v63 = vmul.f32 %v3772_v21, %v7106_v47  ;;  %v3645_v17 = vadd.f32 -0.0001984127, %v3613_v13  ;;  %vm3423_vm7 = vcmp.lt.f32.partialorder %v3391_v12, -1.5707964  ;;  %v3171_v56 = vfloor.f32 %v3139_v44 }
 0x37c   :  { %v3298_v24 = vsub.f32 %v3234_v32, %v3266_v38  ;;  %v3582_v3 = vadd.f32 2.7557319e-06, %v3550_v0  ;;  %v3455_v45 = vsub.f32 -3.1415927, %v3391_v12  ;;  %v3867_v27 = vadd.f32 %v3835_v5, %v7081_v26  ;;  %4020 = vst.msk [vmem:[%s7543_s11] sm:$0xff] %vm4019_vm6, %v3924_v14  ;;  %v3056_v47 = vpop.f32.mrf.mxu3 }
 0x37d   :  { %3958 = vmatmul.f32.gmra.mxu0 %v3866_v60  ;;  %v3836_v33 = vmul.f32 %v3804_v63, %v7100_v8  ;;  %v3677_v11 = vmul.f32 %v3645_v17, %v7133_v43  ;;  %v3456_v42 = vsub.f32 -3.1415927, %v3392_v57  ;;  %v3203_v16 = vmul.f32 6.28125, %v3171_v56  ;;  %v3926_v22 = vpop.f32.mrf.mxu0 }
 0x37e   :  { %vm3330_vm8 = vcmp.gt.f32.partialorder %v3298_v24, 1.5707964  ;;  %v3614_v52 = vmul.f32 %v3582_v3, %v7154_v55  ;;  %vm3424_vm9 = vcmp.lt.f32.partialorder %v3392_v57, -1.5707964  ;;  %v3362_v50 = vsub.f32 3.1415927, %v3298_v24 }
 0x37f   :  { %v3709_v2 = vadd.f32 0.008333333, %v3677_v11  ;;  %v3267_v26 = vmul.f32 0.0019353072, %v3171_v56  ;;  %v3057_v36 = vadd.f32 %v6833_v35, %v3056_v47  ;;  %v3235_v46 = vsub.f32 %v3054_v10, %v3203_v16 }
 0x380   :  { %v3646_v41 = vadd.f32 -0.0001984127, %v3614_v52  ;;  %v3927_v23 = vadd.f32 %v7160_v49, %v3926_v22  ;;  %v7177_v20 = vsel %vm3423_vm7, %v3455_v45, %v3391_v12  ;;  %v7184_v28 = vsel %vm3424_vm9, %v3456_v42, %v3392_v57 }
 0x381   :  { %v3741_v7 = vmul.f32 %v3709_v2, %v7133_v43  ;;  %v3108_v25 = vmul.f32 0.15915494, %v3057_v36  ;;  %v7182_v62 = vmul.f32 %v7177_v20, %v7177_v20  ;;  %v3299_v4 = vsub.f32 %v3235_v46, %v3267_v26 }
 0x382   :  { %v3678_v9 = vmul.f32 %v3646_v41, %v7154_v55  ;;  %4021 = vst.msk [vmem:[%s7543_s11 + $0x8] sm:$0xff] %vm4019_vm6, %v3927_v23  ;;  %v7193_v58 = vmul.f32 %v7184_v28, %v7184_v28  ;;  %v3393_v40 = vsel %vm3329_vm5, %v3361_v37, %v7129_v34  ;;  %v3868_v51 = vadd.f32 %v3836_v33, %v7100_v8 }
 0x383   :  { %v3773_v1 = vadd.f32 -0.16666667, %v3741_v7  ;;  %v3140_v18 = vadd.f32 0.5, %v3108_v25  ;;  %v3551_v12 = vmul.f32 -2.5052108e-08, %v7182_v62  ;;  %v3394_v6 = vsel %vm3330_vm8, %v3362_v50, %v3298_v24 }
 0x384   :  { %v3710_v19 = vadd.f32 0.008333333, %v3678_v9  ;;  %v3059_v10 = vpop.f32.mrf.mxu3  ;;  %v3552_v31 = vmul.f32 -2.5052108e-08, %v7193_v58  ;;  %vm3425_vm10 = vcmp.lt.f32.partialorder %v3393_v40, -1.5707964 }
 0x385   :  { %3961 = vmatmul.f32.gmra.mxu0 %v3867_v27  ;;  %v3805_v54 = vmul.f32 %v3773_v1, %v7133_v43  ;;  %v3172_v30 = vfloor.f32 %v3140_v18  ;;  %v3583_v53 = vadd.f32 2.7557319e-06, %v3551_v12  ;;  %v3060_v59 = vadd.f32 %v6833_v35, %v3059_v10 }
 0x386   :  { %v3742_v48 = vmul.f32 %v3710_v19, %v7154_v55  ;;  %v3457_v15 = vsub.f32 -3.1415927, %v3393_v40  ;;  %vm3331_vm11 = vcmp.gt.f32.partialorder %v3299_v4, 1.5707964  ;;  %v3363_v34 = vsub.f32 3.1415927, %v3299_v4 }
 0x387   :  { %v3204_v8 = vmul.f32 6.28125, %v3172_v30  ;;  %v3615_v37 = vmul.f32 %v3583_v53, %v7182_v62  ;;  %v3837_v38 = vmul.f32 %v3805_v54, %v7124_v61  ;;  %v3109_v29 = vmul.f32 0.15915494, %v3060_v59 }
 0x388   :  { %v3584_v43 = vadd.f32 2.7557319e-06, %v3552_v31  ;;  %v7207_v60 = vsel %vm3425_vm10, %v3457_v15, %v3393_v40  ;;  %v3268_v21 = vmul.f32 0.0019353072, %v3172_v30  ;;  %v3929_v32 = vpop.f32.mrf.mxu0  ;;  %v3774_v0 = vadd.f32 -0.16666667, %v3742_v48 }
 0x389   :  { %v3236_v5 = vsub.f32 %v3057_v36, %v3204_v8  ;;  %v3647_v13 = vadd.f32 -0.0001984127, %v3615_v37  ;;  %v7211_v44 = vmul.f32 %v7207_v60, %v7207_v60  ;;  %v3141_v57 = vadd.f32 0.5, %v3109_v29  ;;  %v7249_v48 = vld [vmem:[%s7540_s8] ss:$0 sm:$0xff] }
 0x38a   :  { %v3930_v63 = vadd.f32 %v7160_v49, %v3929_v32  ;;  %v3616_v17 = vmul.f32 %v3584_v43, %v7193_v58  ;;  %vm3426_vm12 = vcmp.lt.f32.partialorder %v3394_v6, -1.5707964  ;;  %v3458_v27 = vsub.f32 -3.1415927, %v3394_v6 }
 0x38b   :  { %v3300_v14 = vsub.f32 %v3236_v5, %v3268_v21  ;;  %v3679_v24 = vmul.f32 %v3647_v13, %v7182_v62  ;;  %v3553_v56 = vmul.f32 -2.5052108e-08, %v7211_v44  ;;  %v3173_v3 = vfloor.f32 %v3141_v57 }
 0x38c   :  { %4022 = vst.msk [vmem:[%s7543_s11 + $0x10] sm:$0xff] %vm4019_vm6, %v3930_v63  ;;  %v3648_v45 = vadd.f32 -0.0001984127, %v3616_v17  ;;  %v3869_v33 = vadd.f32 %v3837_v38, %v7124_v61  ;;  %v3062_v47 = vpop.f32.mrf.mxu3  ;;  %v3395_v42 = vsel %vm3331_vm11, %v3363_v34, %v3299_v4  ;;  %v3806_v16 = vmul.f32 %v3774_v0, %v7154_v55 }
 0x38d   :  { %3964 = vmatmul.f32.gmra.mxu0 %v3868_v51  ;;  %v3711_v11 = vadd.f32 0.008333333, %v3679_v24  ;;  %vm3332_vm13 = vcmp.gt.f32.partialorder %v3300_v14, 1.5707964  ;;  %v3205_v52 = vmul.f32 6.28125, %v3173_v3  ;;  %v3063_v2 = vadd.f32 %v6833_v35, %v3062_v47 }
 0x38e   :  { %v3680_v22 = vmul.f32 %v3648_v45, %v7193_v58  ;;  %v3585_v26 = vadd.f32 2.7557319e-06, %v3553_v56  ;;  %v7228_v36 = vsel %vm3426_vm12, %v3458_v27, %v3394_v6  ;;  %v3364_v46 = vsub.f32 3.1415927, %v3300_v14 }
 0x38f   :  { %v3743_v50 = vmul.f32 %v3711_v11, %v7182_v62  ;;  %v3237_v61 = vsub.f32 %v3060_v59, %v3205_v52  ;;  %v7232_v41 = vmul.f32 %v7228_v36, %v7228_v36  ;;  %vm3427_vm14 = vcmp.lt.f32.partialorder %v3395_v42, -1.5707964 }
 0x390   :  { %v3269_v55 = vmul.f32 0.0019353072, %v3173_v3  ;;  %v3110_v23 = vmul.f32 0.15915494, %v3063_v2  ;;  %v3617_v7 = vmul.f32 %v3585_v26, %v7211_v44  ;;  %v3459_v25 = vsub.f32 -3.1415927, %v3395_v42 }
 0x391   :  { %v3775_v4 = vadd.f32 -0.16666667, %v3743_v50  ;;  %v3712_v9 = vadd.f32 0.008333333, %v3680_v22  ;;  %v3554_v35 = vmul.f32 -2.5052108e-08, %v7232_v41  ;;  %v3838_v1 = vmul.f32 %v3806_v16, %v7145_v39 }
 0x392   :  { %v3301_v18 = vsub.f32 %v3237_v61, %v3269_v55  ;;  %v3142_v12 = vadd.f32 0.5, %v3110_v23  ;;  %v7237_v40 = vsel %vm3427_vm14, %v3459_v25, %v3395_v42  ;;  %v3649_v51 = vadd.f32 -0.0001984127, %v3617_v7 }
 0x393   :  { %v7241_v19 = vmul.f32 %v7237_v40, %v7237_v40  ;;  %v3586_v30 = vadd.f32 2.7557319e-06, %v3554_v35  ;;  %v3396_v53 = vsel %vm3332_vm13, %v3364_v46, %v3300_v14  ;;  %v3807_v10 = vmul.f32 %v3775_v4, %v7182_v62 }
 0x394   :  { %v3174_v6 = vfloor.f32 %v3142_v12  ;;  %v3065_v54 = vpop.f32.mrf.mxu3  ;;  %v3744_v31 = vmul.f32 %v3712_v9, %v7193_v58  ;;  %v3870_v15 = vadd.f32 %v3838_v1, %v7145_v39  ;;  %vm3333_vm15 = vcmp.gt.f32.partialorder %v3301_v18, 1.5707964 }
 0x395   :  { %3967 = vmatmul.f32.gmra.mxu0 %v3869_v33  ;;  %v3066_v59 = vadd.f32 %v7249_v48, %v3065_v54  ;;  %v3555_v8 = vmul.f32 -2.5052108e-08, %v7241_v19  ;;  %v3365_v37 = vsub.f32 3.1415927, %v3301_v18  ;;  %v3681_v38 = vmul.f32 %v3649_v51, %v7211_v44 }
 0x396   :  { %v3206_v34 = vmul.f32 6.28125, %v3174_v6  ;;  %vm3428_vm0 = vcmp.lt.f32.partialorder %v3396_v53, -1.5707964  ;;  %v3270_v43 = vmul.f32 0.0019353072, %v3174_v6  ;;  %v3618_v5 = vmul.f32 %v3586_v30, %v7232_v41 }
 0x397   :  { %v3111_v29 = vmul.f32 0.15915494, %v3066_v59  ;;  %v3460_v21 = vsub.f32 -3.1415927, %v3396_v53  ;;  %v3839_v13 = vmul.f32 %v3807_v10, %v7177_v20  ;;  %v3776_v32 = vadd.f32 -0.16666667, %v3744_v31 }
 0x398   :  { %v3238_v62 = vsub.f32 %v3063_v2, %v3206_v34  ;;  %v3587_v17 = vadd.f32 2.7557319e-06, %v3555_v8  ;;  %v3713_v24 = vadd.f32 0.008333333, %v3681_v38  ;;  %v3397_v45 = vsel %vm3333_vm15, %v3365_v37, %v3301_v18 }
 0x399   :  { %v3932_v0 = vpop.f32.mrf.mxu0  ;;  %v3143_v57 = vadd.f32 0.5, %v3111_v29  ;;  %v7258_v14 = vsel %vm3428_vm0, %v3460_v21, %v3396_v53  ;;  %v3650_v33 = vadd.f32 -0.0001984127, %v3618_v5  ;;  %v3808_v47 = vmul.f32 %v3776_v32, %v7193_v58 }
 0x39a   :  { %v3302_v39 = vsub.f32 %v3238_v62, %v3270_v43  ;;  %v3933_v63 = vadd.f32 %v7160_v49, %v3932_v0  ;;  %v7262_v3 = vmul.f32 %v7258_v14, %v7258_v14  ;;  %v3619_v42 = vmul.f32 %v3587_v17, %v7241_v19 }
 0x39b   :  { %v3175_v56 = vfloor.f32 %v3143_v57  ;;  %vm3429_vm2 = vcmp.lt.f32.partialorder %v3397_v45, -1.5707964  ;;  %v3461_v16 = vsub.f32 -3.1415927, %v3397_v45  ;;  %v3871_v52 = vadd.f32 %v3839_v13, %v7177_v20 }
 0x39c   :  { %v3366_v27 = vsub.f32 3.1415927, %v3302_v39  ;;  %4023 = vst.msk [vmem:[%s7543_s11 + $0x18] sm:$0xff] %vm4019_vm6, %v3933_v63  ;;  %vm3334_vm1 = vcmp.gt.f32.partialorder %v3302_v39, 1.5707964  ;;  %v3745_v26 = vmul.f32 %v3713_v24, %v7211_v44  ;;  %v3682_v46 = vmul.f32 %v3650_v33, %v7232_v41 }
 0x39d   :  { %3970 = vmatmul.f32.gmra.mxu0 %v3870_v15  ;;  %v3207_v11 = vmul.f32 6.28125, %v3175_v56  ;;  %v3271_v50 = vmul.f32 0.0019353072, %v3175_v56  ;;  %v3556_v2 = vmul.f32 -2.5052108e-08, %v7262_v3  ;;  %v7275_v61 = vsel %vm3429_vm2, %v3461_v16, %v3397_v45 }
 0x39e   :  { %v3398_v55 = vsel %vm3334_vm1, %v3366_v27, %v3302_v39  ;;  %v7279_v58 = vmul.f32 %v7275_v61, %v7275_v61  ;;  %v3651_v7 = vadd.f32 -0.0001984127, %v3619_v42  ;;  %v3840_v20 = vmul.f32 %v3808_v47, %v7184_v28 }
 0x39f   :  { %v3239_v22 = vsub.f32 %v3066_v59, %v3207_v11  ;;  %v3462_v25 = vsub.f32 -3.1415927, %v3398_v55  ;;  %v3588_v4 = vadd.f32 2.7557319e-06, %v3556_v2  ;;  %vm3430_vm3 = vcmp.lt.f32.partialorder %v3398_v55, -1.5707964 }
 0x3a0   :  { %v3777_v9 = vadd.f32 -0.16666667, %v3745_v26  ;;  %v3714_v1 = vadd.f32 0.008333333, %v3682_v46  ;;  %v3557_v12 = vmul.f32 -2.5052108e-08, %v7279_v58  ;;  %v3683_v6 = vmul.f32 %v3651_v7, %v7241_v19 }
 0x3a1   :  { %v3303_v23 = vsub.f32 %v3239_v22, %v3271_v50  ;;  %v7285_v54 = vsel %vm3430_vm3, %v3462_v25, %v3398_v55  ;;  %v3872_v30 = vadd.f32 %v3840_v20, %v7184_v28  ;;  %v3620_v53 = vmul.f32 %v3588_v4, %v7262_v3 }
 0x3a2   :  { %v3809_v10 = vmul.f32 %v3777_v9, %v7211_v44  ;;  %v3746_v59 = vmul.f32 %v3714_v1, %v7232_v41  ;;  %v3589_v37 = vadd.f32 2.7557319e-06, %v3557_v12  ;;  %v7294_v38 = vmul.f32 %v7285_v54, %v7285_v54 }
 0x3a3   :  { %v3367_v35 = vsub.f32 3.1415927, %v3303_v23  ;;  %vm3335_vm4 = vcmp.gt.f32.partialorder %v3303_v23, 1.5707964  ;;  %v3715_v62 = vadd.f32 0.008333333, %v3683_v6 }
 0x3a4   :  { %v3652_v28 = vadd.f32 -0.0001984127, %v3620_v53  ;;  %v3841_v43 = vmul.f32 %v3809_v10, %v7207_v60  ;;  %v3778_v5 = vadd.f32 -0.16666667, %v3746_v59  ;;  %v3621_v13 = vmul.f32 %v3589_v37, %v7279_v58 }
 0x3a5   :  { %3973 = vmatmul.f32.gmra.mxu0 %v3871_v52  ;;  %v3399_v34 = vsel %vm3335_vm4, %v3367_v35, %v3303_v23  ;;  %v3558_v32 = vmul.f32 -2.5052108e-08, %v7294_v38  ;;  %v3747_v57 = vmul.f32 %v3715_v62, %v7241_v19 }
 0x3a6   :  { %v3068_v18 = vpop.f32.mrf.mxu3  ;;  %v3463_v44 = vsub.f32 -3.1415927, %v3399_v34  ;;  %vm3431_vm5 = vcmp.lt.f32.partialorder %v3399_v34, -1.5707964  ;;  %v3684_v39 = vmul.f32 %v3652_v28, %v7262_v3  ;;  %v3873_v17 = vadd.f32 %v3841_v43, %v7207_v60 }
 0x3a7   :  { %v3069_v51 = vadd.f32 %v7249_v48, %v3068_v18  ;;  %v3810_v24 = vmul.f32 %v3778_v5, %v7232_v41  ;;  %v3653_v33 = vadd.f32 -0.0001984127, %v3621_v13  ;;  %v3590_v11 = vadd.f32 2.7557319e-06, %v3558_v32 }
 0x3a8   :  { %v7305_v63 = vsel %vm3431_vm5, %v3463_v44, %v3399_v34  ;;  %v3779_v50 = vadd.f32 -0.16666667, %v3747_v57  ;;  %v3716_v2 = vadd.f32 0.008333333, %v3684_v39 }
 0x3a9   :  { %v3935_v31 = vpop.f32.mrf.mxu0  ;;  %v3112_v15 = vmul.f32 0.15915494, %v3069_v51  ;;  %v7312_v52 = vmul.f32 %v7305_v63, %v7305_v63  ;;  %v3842_v60 = vmul.f32 %v3810_v24, %v7228_v36  ;;  %v3685_v46 = vmul.f32 %v3653_v33, %v7279_v58 }
 0x3aa   :  { %v3936_v8 = vadd.f32 %v7160_v49, %v3935_v31  ;;  %v3622_v55 = vmul.f32 %v3590_v11, %v7294_v38  ;;  %v3811_v9 = vmul.f32 %v3779_v50, %v7241_v19  ;;  %v3748_v1 = vmul.f32 %v3716_v2, %v7262_v3 }
 0x3ab   :  { %v3144_v29 = vadd.f32 0.5, %v3112_v15  ;;  %v3559_v7 = vmul.f32 -2.5052108e-08, %v7312_v52  ;;  %v3874_v4 = vadd.f32 %v3842_v60, %v7228_v36  ;;  %v3717_v18 = vadd.f32 0.008333333, %v3685_v46 }
 0x3ac   :  { %4024 = vst.msk [vmem:[%s7543_s11 + $0x20] sm:$0xff] %vm4019_vm6, %v3936_v8  ;;  %v3654_v12 = vadd.f32 -0.0001984127, %v3622_v55  ;;  %v3843_v10 = vmul.f32 %v3811_v9, %v7237_v40  ;;  %v3780_v59 = vadd.f32 -0.16666667, %v3748_v1 }
 0x3ad   :  { %3976 = vmatmul.f32.gmra.mxu0 %v3872_v30  ;;  %v3176_v21 = vfloor.f32 %v3144_v29  ;;  %v3591_v30 = vadd.f32 2.7557319e-06, %v3559_v7  ;;  %v3749_v19 = vmul.f32 %v3717_v18, %v7279_v58 }
 0x3ae   :  { %v3686_v15 = vmul.f32 %v3654_v12, %v7294_v38  ;;  %v3875_v29 = vadd.f32 %v3843_v10, %v7237_v40  ;;  %v3812_v44 = vmul.f32 %v3780_v59, %v7262_v3 }
 0x3af   :  { %v3208_v0 = vmul.f32 6.28125, %v3176_v21  ;;  %v3272_v45 = vmul.f32 0.0019353072, %v3176_v21  ;;  %v3623_v8 = vmul.f32 %v3591_v30, %v7312_v52  ;;  %v3781_v21 = vadd.f32 -0.16666667, %v3749_v19 }
 0x3b0   :  { %v3718_v13 = vadd.f32 0.008333333, %v3686_v15  ;;  %v3844_v3 = vmul.f32 %v3812_v44, %v7258_v14 }
 0x3b1   :  { %v3240_v56 = vsub.f32 %v3069_v51, %v3208_v0  ;;  %v3071_v27 = vpop.f32.mrf.mxu3  ;;  %v3655_v0 = vadd.f32 -0.0001984127, %v3623_v8  ;;  %v3813_v33 = vmul.f32 %v3781_v21, %v7279_v58 }
 0x3b2   :  { %v3072_v16 = vadd.f32 %v7249_v48, %v3071_v27 }
 0x3b3   :  { %v3304_v47 = vsub.f32 %v3240_v56, %v3272_v45  ;;  %v3938_v42 = vpop.f32.mrf.mxu0  ;;  %v3750_v45 = vmul.f32 %v3718_v13, %v7294_v38  ;;  %v3687_v11 = vmul.f32 %v3655_v0, %v7312_v52  ;;  %v3845_v55 = vmul.f32 %v3813_v33, %v7275_v61 }
 0x3b4   :  { %v3939_v22 = vadd.f32 %v7160_v49, %v3938_v42  ;;  %v3113_v26 = vmul.f32 0.15915494, %v3072_v16  ;;  %v3876_v42 = vadd.f32 %v3844_v3, %v7258_v14 }
 0x3b5   :  { %3979 = vmatmul.f32.gmra.mxu0 %v3873_v17  ;;  %vm3336_vm7 = vcmp.gt.f32.partialorder %v3304_v47, 1.5707964  ;;  %v3368_v41 = vsub.f32 3.1415927, %v3304_v47  ;;  %v3782_v46 = vadd.f32 -0.16666667, %v3750_v45  ;;  %v3877_v1 = vadd.f32 %v3845_v55, %v7275_v61 }
 0x3b6   :  { %4025 = vst.msk [vmem:[%s7543_s11 + $0x28] sm:$0xff] %vm4019_vm6, %v3939_v22  ;;  %v3145_v23 = vadd.f32 0.5, %v3113_v26  ;;  %v3719_v58 = vadd.f32 0.008333333, %v3687_v11 }
 0x3b7   :  { %v3400_v25 = vsel %vm3336_vm7, %v3368_v41, %v3304_v47  ;;  %v3814_v18 = vmul.f32 %v3782_v46, %v7294_v38 }
 0x3b8   :  { %vm3432_vm8 = vcmp.lt.f32.partialorder %v3400_v25, -1.5707964  ;;  %v3464_v20 = vsub.f32 -3.1415927, %v3400_v25  ;;  %v3177_v35 = vfloor.f32 %v3145_v23  ;;  %v3751_v12 = vmul.f32 %v3719_v58, %v7312_v52 }
 0x3b9   :  { %v3846_v15 = vmul.f32 %v3814_v18, %v7285_v54 }
 0x3ba   :  { %v7326_v51 = vsel %vm3432_vm8, %v3464_v20, %v3400_v25  ;;  %v3209_v6 = vmul.f32 6.28125, %v3177_v35  ;;  %v3273_v36 = vmul.f32 0.0019353072, %v3177_v35 }
 0x3bb   :  { %v7330_v53 = vmul.f32 %v7326_v51, %v7326_v51 }
 0x3bc   :  { %v3241_v31 = vsub.f32 %v3072_v16, %v3209_v6 }
 0x3bd   :  { %3982 = vmatmul.f32.gmra.mxu0 %v3874_v4  ;;  %v3560_v37 = vmul.f32 -2.5052108e-08, %v7330_v53 }
 0x3be   :  { %v3305_v34 = vsub.f32 %v3241_v31, %v3273_v36 }
 0x3bf   :  { %v3592_v57 = vadd.f32 2.7557319e-06, %v3560_v37  ;;  %v3783_v37 = vadd.f32 -0.16666667, %v3751_v12 }
 0x3c0   :  { %vm3337_vm9 = vcmp.gt.f32.partialorder %v3305_v34, 1.5707964  ;;  %v3369_v62 = vsub.f32 3.1415927, %v3305_v34 }
 0x3c1   :  { %v3941_v28 = vpop.f32.mrf.mxu0  ;;  %v3624_v47 = vmul.f32 %v3592_v57, %v7330_v53 }
 0x3c2   :  { %v3942_v43 = vadd.f32 %v7160_v49, %v3941_v28  ;;  %v3074_v5 = vpop.f32.mrf.mxu3  ;;  %v3401_v39 = vsel %vm3337_vm9, %v3369_v62, %v3305_v34 }
 0x3c3   :  { %v3075_v32 = vadd.f32 %v7249_v48, %v3074_v5  ;;  %vm3433_vm10 = vcmp.lt.f32.partialorder %v3401_v39, -1.5707964  ;;  %v3465_v40 = vsub.f32 -3.1415927, %v3401_v39  ;;  %v3656_v23 = vadd.f32 -0.0001984127, %v3624_v47 }
 0x3c4   :  { %4026 = vst.msk [vmem:[%s7543_s11 + $0x30] sm:$0xff] %vm4019_vm6, %v3942_v43 }
 0x3c5   :  { %3985 = vmatmul.f32.gmra.mxu0 %v3875_v29  ;;  %v3114_v17 = vmul.f32 0.15915494, %v3075_v32  ;;  %v7346_v24 = vsel %vm3433_vm10, %v3465_v40, %v3401_v39  ;;  %v3688_v10 = vmul.f32 %v3656_v23, %v7330_v53  ;;  %v3815_v39 = vmul.f32 %v3783_v37, %v7312_v52 }
 0x3c6   :  { %v7351_v27 = vmul.f32 %v7346_v24, %v7346_v24 }
 0x3c7   :  { %v3146_v56 = vadd.f32 0.5, %v3114_v17  ;;  %v3720_v29 = vadd.f32 0.008333333, %v3688_v10 }
 0x3c8   :  { %v3561_v22 = vmul.f32 -2.5052108e-08, %v7351_v27 }
 0x3c9   :  { %v3178_v16 = vfloor.f32 %v3146_v56  ;;  %v3752_v40 = vmul.f32 %v3720_v29, %v7330_v53 }
 0x3ca   :  { %v3944_v50 = vpop.f32.mrf.mxu0  ;;  %v3077_v2 = vpop.f32.mrf.mxu3  ;;  %v3593_v7 = vadd.f32 2.7557319e-06, %v3561_v22 }
 0x3cb   :  { %v3210_v60 = vmul.f32 6.28125, %v3178_v16  ;;  %v3945_v41 = vadd.f32 %v7160_v49, %v3944_v50  ;;  %v3078_v26 = vadd.f32 %v7249_v48, %v3077_v2  ;;  %v3274_v20 = vmul.f32 0.0019353072, %v3178_v16 }
 0x3cc   :  { %v3625_v35 = vmul.f32 %v3593_v7, %v7351_v27  ;;  %v3784_v47 = vadd.f32 -0.16666667, %v3752_v40 }
 0x3cd   :  { %3988 = vmatmul.f32.gmra.mxu0 %v3876_v42  ;;  %v3242_v25 = vsub.f32 %v3075_v32, %v3210_v60  ;;  %4027 = vst.msk [vmem:[%s7543_s11 + $0x38] sm:$0xff] %vm4019_vm6, %v3945_v41  ;;  %v3115_v14 = vmul.f32 0.15915494, %v3078_v26  ;;  %v3878_v32 = vadd.f32 %v3846_v15, %v7285_v54  ;;  %v3847_v54 = vmul.f32 %v3815_v39, %v7305_v63 }
 0x3ce   :  { %v3657_v59 = vadd.f32 -0.0001984127, %v3625_v35  ;;  %v3816_v55 = vmul.f32 %v3784_v47, %v7330_v53 }
 0x3cf   :  { %v3306_v4 = vsub.f32 %v3242_v25, %v3274_v20  ;;  %v3147_v9 = vadd.f32 0.5, %v3115_v14  ;;  %v3879_v46 = vadd.f32 %v3847_v54, %v7305_v63 }
 0x3d0   :  { %v3689_v21 = vmul.f32 %v3657_v59, %v7351_v27  ;;  %v3848_v53 = vmul.f32 %v3816_v55, %v7326_v51 }
 0x3d1   :  { %vm3338_vm11 = vcmp.gt.f32.partialorder %v3306_v4, 1.5707964  ;;  %v3370_v6 = vsub.f32 3.1415927, %v3306_v4  ;;  %v3179_v30 = vfloor.f32 %v3147_v9 }
 0x3d2   :  { %v3721_v56 = vadd.f32 0.008333333, %v3689_v21 }
 0x3d3   :  { %v3211_v31 = vmul.f32 6.28125, %v3179_v30  ;;  %v3080_v36 = vpop.f32.mrf.mxu3  ;;  %v3402_v19 = vsel %vm3338_vm11, %v3370_v6, %v3306_v4  ;;  %v3275_v38 = vmul.f32 0.0019353072, %v3179_v30 }
 0x3d4   :  { %v3081_v34 = vadd.f32 %v7249_v48, %v3080_v36  ;;  %vm3434_vm12 = vcmp.lt.f32.partialorder %v3402_v19, -1.5707964  ;;  %v3466_v8 = vsub.f32 -3.1415927, %v3402_v19  ;;  %v3753_v52 = vmul.f32 %v3721_v56, %v7351_v27 }
 0x3d5   :  { %3991 = vmatmul.f32.gmra.mxu0 %v3877_v1  ;;  %v3243_v61 = vsub.f32 %v3078_v26, %v3211_v31 }
 0x3d6   :  { %v3947_v62 = vpop.f32.mrf.mxu0  ;;  %v3116_v28 = vmul.f32 0.15915494, %v3081_v34  ;;  %v7372_v44 = vsel %vm3434_vm12, %v3466_v8, %v3402_v19  ;;  %v3785_v4 = vadd.f32 -0.16666667, %v3753_v52 }
 0x3d7   :  { %v3307_v43 = vsub.f32 %v3243_v61, %v3275_v38  ;;  %v3948_v5 = vadd.f32 %v7160_v49, %v3947_v62  ;;  %v7378_v13 = vmul.f32 %v7372_v44, %v7372_v44 }
 0x3d8   :  { %v3148_v0 = vadd.f32 0.5, %v3116_v28  ;;  %v3817_v59 = vmul.f32 %v3785_v4, %v7351_v27 }
 0x3d9   :  { %vm3339_vm13 = vcmp.gt.f32.partialorder %v3307_v43, 1.5707964  ;;  %v3371_v57 = vsub.f32 3.1415927, %v3307_v43  ;;  %4028 = vst.msk [vmem:[%s7543_s11 + $0x40] sm:$0xff] %vm4019_vm6, %v3948_v5 }
 0x3da   :  { %v3180_v3 = vfloor.f32 %v3148_v0  ;;  %v3562_v17 = vmul.f32 -2.5052108e-08, %v7378_v13 }
 0x3db   :  { %v3403_v45 = vsel %vm3339_vm13, %v3371_v57, %v3307_v43 }
 0x3dc   :  { %v3212_v33 = vmul.f32 6.28125, %v3180_v3  ;;  %v3594_v11 = vadd.f32 2.7557319e-06, %v3562_v17  ;;  %vm3435_vm14 = vcmp.lt.f32.partialorder %v3403_v45, -1.5707964 }
 0x3dd   :  { %3994 = vmatmul.f32.gmra.mxu0 %v3878_v32  ;;  %v3467_v42 = vsub.f32 -3.1415927, %v3403_v45  ;;  %v3276_v22 = vmul.f32 0.0019353072, %v3180_v3 }
 0x3de   :  { %v3244_v16 = vsub.f32 %v3081_v34, %v3212_v33  ;;  %v3626_v50 = vmul.f32 %v3594_v11, %v7378_v13 }
 0x3df   :  { %v7391_v2 = vsel %vm3435_vm14, %v3467_v42, %v3403_v45 }
 0x3e0   :  { %v3308_v60 = vsub.f32 %v3244_v16, %v3276_v22  ;;  %v3658_v41 = vadd.f32 -0.0001984127, %v3626_v50  ;;  %v7395_v26 = vmul.f32 %v7391_v2, %v7391_v2 }
 0x3e2   :  { %vm3340_vm15 = vcmp.gt.f32.partialorder %v3308_v60, 1.5707964  ;;  %v3372_v58 = vsub.f32 3.1415927, %v3308_v60  ;;  %v3950_v23 = vpop.f32.mrf.mxu0  ;;  %v3690_v7 = vmul.f32 %v3658_v41, %v7378_v13  ;;  %v3563_v25 = vmul.f32 -2.5052108e-08, %v7395_v26 }
 0x3e3   :  { %v3951_v20 = vadd.f32 %v7160_v49, %v3950_v23  ;;  %v3083_v14 = vpop.f32.mrf.mxu3 }
 0x3e4   :  { %v3404_v9 = vsel %vm3340_vm15, %v3372_v58, %v3308_v60  ;;  %v3084_v35 = vadd.f32 %v7249_v48, %v3083_v14  ;;  %v3722_v1 = vadd.f32 0.008333333, %v3690_v7  ;;  %v3595_v18 = vadd.f32 2.7557319e-06, %v3563_v25 }
 0x3e5   :  { %vm3436_vm0 = vcmp.lt.f32.partialorder %v3404_v9, -1.5707964  ;;  %v3468_v63 = vsub.f32 -3.1415927, %v3404_v9  ;;  %4029 = vst.msk [vmem:[%s7543_s11 + $0x48] sm:$0xff] %vm4019_vm6, %v3951_v20  ;;  %3997 = vmatmul.f32.gmra.mxu0 %v3879_v46  ;;  %v3880_v48 = vadd.f32 %v3848_v53, %v7326_v51  ;;  %v3849_v51 = vmul.f32 %v3817_v59, %v7346_v24 }
 0x3e6   :  { %v3117_v12 = vmul.f32 0.15915494, %v3084_v35  ;;  %v3627_v6 = vmul.f32 %v3595_v18, %v7395_v26  ;;  %v3754_v19 = vmul.f32 %v3722_v1, %v7378_v13 }
 0x3e7   :  { %v3500_v30 = vsel %vm3436_vm0, %v3468_v63, %v3404_v9  ;;  %v3881_v57 = vadd.f32 %v3849_v51, %v7346_v24 }
 0x3e8   :  { %v3532_v10 = vmul.f32 %v3500_v30, %v3500_v30  ;;  %v3149_v31 = vadd.f32 0.5, %v3117_v12  ;;  %v3659_v36 = vadd.f32 -0.0001984127, %v3627_v6  ;;  %v3786_v27 = vadd.f32 -0.16666667, %v3754_v19 }
 0x3ea   :  { %v3564_v15 = vmul.f32 -2.5052108e-08, %v3532_v10  ;;  %v3181_v34 = vfloor.f32 %v3149_v31  ;;  %v3953_v8 = vpop.f32.mrf.mxu0  ;;  %v3691_v61 = vmul.f32 %v3659_v36, %v7395_v26  ;;  %v3818_v39 = vmul.f32 %v3786_v27, %v7378_v13 }
 0x3eb   :  { %v3954_v38 = vadd.f32 %v7160_v49, %v3953_v8 }
 0x3ec   :  { %v3596_v37 = vadd.f32 2.7557319e-06, %v3564_v15  ;;  %v3213_v29 = vmul.f32 6.28125, %v3181_v34  ;;  %v3723_v62 = vadd.f32 0.008333333, %v3691_v61  ;;  %v3850_v54 = vmul.f32 %v3818_v39, %v7372_v44 }
 0x3ed   :  { %4030 = vst.msk [vmem:[%s7543_s11 + $0x50] sm:$0xff] %vm4019_vm6, %v3954_v38  ;;  %4000 = vmatmul.f32.gmra.mxu0 %v3880_v48  ;;  %v3277_v5 = vmul.f32 0.0019353072, %v3181_v34 }
 0x3ee   :  { %v3628_v28 = vmul.f32 %v3596_v37, %v3532_v10  ;;  %v3245_v43 = vsub.f32 %v3084_v35, %v3213_v29  ;;  %v3755_v0 = vmul.f32 %v3723_v62, %v7395_v26  ;;  %v3882_v22 = vadd.f32 %v3850_v54, %v7372_v44 }
 0x3f0   :  { %v3660_v21 = vadd.f32 -0.0001984127, %v3628_v28  ;;  %v3309_v32 = vsub.f32 %v3245_v43, %v3277_v5  ;;  %v3787_v33 = vadd.f32 -0.16666667, %v3755_v0 }
 0x3f2   :  { %v3692_v40 = vmul.f32 %v3660_v21, %v3532_v10  ;;  %vm3341_vm1 = vcmp.gt.f32.partialorder %v3309_v32, 1.5707964  ;;  %v3373_v3 = vsub.f32 3.1415927, %v3309_v32  ;;  %v3956_v17 = vpop.f32.mrf.mxu0  ;;  %v3819_v50 = vmul.f32 %v3787_v33, %v7395_v26 }
 0x3f3   :  { %v3957_v56 = vadd.f32 %v7160_v49, %v3956_v17 }
 0x3f4   :  { %v3724_v45 = vadd.f32 0.008333333, %v3692_v40  ;;  %v3405_v11 = vsel %vm3341_vm1, %v3373_v3, %v3309_v32  ;;  %v3851_v23 = vmul.f32 %v3819_v50, %v7391_v2 }
 0x3f5   :  { %4031 = vst.msk [vmem:[%s7543_s11 + $0x58] sm:$0xff] %vm4019_vm6, %v3957_v56  ;;  %4003 = vmatmul.f32.gmra.mxu0 %v3881_v57  ;;  %vm3437_vm2 = vcmp.lt.f32.partialorder %v3405_v11, -1.5707964  ;;  %v3469_v24 = vsub.f32 -3.1415927, %v3405_v11 }
 0x3f6   :  { %v3756_v13 = vmul.f32 %v3724_v45, %v3532_v10  ;;  %v3883_v26 = vadd.f32 %v3851_v23, %v7391_v2 }
 0x3f7   :  { %v3501_v47 = vsel %vm3437_vm2, %v3469_v24, %v3405_v11 }
 0x3f8   :  { %v3788_v42 = vadd.f32 -0.16666667, %v3756_v13  ;;  %v3533_v16 = vmul.f32 %v3501_v47, %v3501_v47 }
 0x3fa   :  { %v3820_v52 = vmul.f32 %v3788_v42, %v3532_v10  ;;  %v3959_v60 = vpop.f32.mrf.mxu0  ;;  %v3565_v41 = vmul.f32 -2.5052108e-08, %v3533_v16 }
 0x3fb   :  { %v3960_v46 = vadd.f32 %v7160_v49, %v3959_v60 }
 0x3fc   :  { %v3852_v55 = vmul.f32 %v3820_v52, %v3500_v30  ;;  %v3597_v58 = vadd.f32 2.7557319e-06, %v3565_v41 }
 0x3fd   :  { %4032 = vst.msk [vmem:[%s7543_s11 + $0x60] sm:$0xff] %vm4019_vm6, %v3960_v46  ;;  %4006 = vmatmul.f32.gmra.mxu0 %v3882_v22 }
 0x3fe   :  { %v3884_v7 = vadd.f32 %v3852_v55, %v3500_v30  ;;  %v3629_v25 = vmul.f32 %v3597_v58, %v3533_v16 }
 0x400   :  { %4012 = vmatmul.f32.vlgmr.msra.gmra.mxu3 %v3884_v7  ;;  %v3661_v44 = vadd.f32 -0.0001984127, %v3629_v25 }
 0x402   :  { %v3962_v20 = vpop.f32.mrf.mxu0  ;;  %v3693_v14 = vmul.f32 %v3661_v44, %v3533_v16 }
 0x403   :  { %v3963_v4 = vadd.f32 %v7160_v49, %v3962_v20 }
 0x404   :  { %v3725_v9 = vadd.f32 0.008333333, %v3693_v14 }
 0x405   :  { %4033 = vst.msk [vmem:[%s7543_s11 + $0x68] sm:$0xff] %vm4019_vm6, %v3963_v4  ;;  %4009 = vmatmul.f32.gmra.mxu0 %v3883_v26 }
 0x406   :  { %v3757_v35 = vmul.f32 %v3725_v9, %v3533_v16 }
 0x408   :  { %v3789_v1 = vadd.f32 -0.16666667, %v3757_v35 }
 0x40a   :  { %v3965_v18 = vpop.f32.mrf.mxu0  ;;  %v3821_v63 = vmul.f32 %v3789_v1, %v3533_v16 }
 0x40b   :  { %v3966_v53 = vadd.f32 %v7160_v49, %v3965_v18 }
 0x40c   :  { %v3853_v12 = vmul.f32 %v3821_v63, %v3501_v47 }
 0x40d   :  { %4034 = vst.msk [vmem:[%s7543_s11 + $0x70] sm:$0xff] %vm4019_vm6, %v3966_v53 }
 0x40e   :  { %v3885_v2 = vadd.f32 %v3853_v12, %v3501_v47 }
 0x410   :  { %4015 = vmatmul.f32.gmra.mxu3 %v3885_v2 }
 0x412   :  { %v3968_v6 = vpop.f32.mrf.mxu0 }
 0x413   :  { %v3969_v30 = vadd.f32 %v7160_v49, %v3968_v6 }
 0x415   :  { %4035 = vst.msk [vmem:[%s7543_s11 + $0x78] sm:$0xff] %vm4019_vm6, %v3969_v30 }
 0x41a   :  { %v3971_v10 = vpop.f32.mrf.mxu0 }
 0x41b   :  { %v3972_v31 = vadd.f32 %v7160_v49, %v3971_v10 }
 0x41d   :  { %4036 = vst.msk [vmem:[%s7543_s11 + $0x80] sm:$0xff] %vm4019_vm6, %v3972_v31 }
 0x422   :  { %v3974_v36 = vpop.f32.mrf.mxu0 }
 0x423   :  { %v3975_v48 = vadd.f32 %v7160_v49, %v3974_v36 }
 0x425   :  { %4037 = vst.msk [vmem:[%s7543_s11 + $0x88] sm:$0xff] %vm4019_vm6, %v3975_v48 }
 0x42a   :  { %v3977_v59 = vpop.f32.mrf.mxu0 }
 0x42b   :  { %v3978_v19 = vadd.f32 %v7160_v49, %v3977_v59 }
 0x42d   :  { %4038 = vst.msk [vmem:[%s7543_s11 + $0x90] sm:$0xff] %vm4019_vm6, %v3978_v19 }
 0x432   :  { %v3980_v15 = vpop.f32.mrf.mxu0 }
 0x433   :  { %v3981_v34 = vadd.f32 %v7160_v49, %v3980_v15 }
 0x435   :  { %4039 = vst.msk [vmem:[%s7543_s11 + $0x98] sm:$0xff] %vm4019_vm6, %v3981_v34 }
 0x43a   :  { %v3983_v8 = vpop.f32.mrf.mxu0 }
 0x43b   :  { %v3984_v61 = vadd.f32 %v7160_v49, %v3983_v8 }
 0x43d   :  { %4040 = vst.msk [vmem:[%s7543_s11 + $0xa0] sm:$0xff] %vm4019_vm6, %v3984_v61 }
 0x442   :  { %v3986_v38 = vpop.f32.mrf.mxu0 }
 0x443   :  { %v3987_v37 = vadd.f32 %v7160_v49, %v3986_v38 }
 0x445   :  { %4041 = vst.msk [vmem:[%s7543_s11 + $0xa8] sm:$0xff] %vm4019_vm6, %v3987_v37 }
 0x44a   :  { %v3989_v29 = vpop.f32.mrf.mxu0 }
 0x44b   :  { %v3990_v51 = vadd.f32 %v7160_v49, %v3989_v29 }
 0x44d   :  { %4042 = vst.msk [vmem:[%s7543_s11 + $0xb0] sm:$0xff] %vm4019_vm6, %v3990_v51 }
 0x452   :  { %v3992_v27 = vpop.f32.mrf.mxu0 }
 0x453   :  { %v3993_v62 = vadd.f32 %v7160_v49, %v3992_v27 }
 0x455   :  { %4043 = vst.msk [vmem:[%s7543_s11 + $0xb8] sm:$0xff] %vm4019_vm6, %v3993_v62 }
 0x45a   :  { %v3995_v28 = vpop.f32.mrf.mxu0 }
 0x45b   :  { %v3996_v43 = vadd.f32 %v7160_v49, %v3995_v28 }
 0x45d   :  { %4044 = vst.msk [vmem:[%s7543_s11 + $0xc0] sm:$0xff] %vm4019_vm6, %v3996_v43 }
 0x462   :  { %v3998_v5 = vpop.f32.mrf.mxu0 }
 0x463   :  { %v3999_v21 = vadd.f32 %v7160_v49, %v3998_v5 }
 0x465   :  { %4045 = vst.msk [vmem:[%s7543_s11 + $0xc8] sm:$0xff] %vm4019_vm6, %v3999_v21 }
 0x46a   :  { %v4001_v32 = vpop.f32.mrf.mxu0 }
 0x46b   :  { %v4002_v0 = vadd.f32 %v7160_v49, %v4001_v32 }
 0x46d   :  { %4046 = vst.msk [vmem:[%s7543_s11 + $0xd0] sm:$0xff] %vm4019_vm6, %v4002_v0 }
 0x472   :  { %v4004_v57 = vpop.f32.mrf.mxu0 }
 0x473   :  { %v4005_v39 = vadd.f32 %v7160_v49, %v4004_v57 }
 0x475   :  { %4047 = vst.msk [vmem:[%s7543_s11 + $0xd8] sm:$0xff] %vm4019_vm6, %v4005_v39 }
 0x47a   :  { %v4007_v40 = vpop.f32.mrf.mxu0 }
 0x47b   :  { %v4008_v3 = vadd.f32 %v7160_v49, %v4007_v40 }
 0x47d   :  { %4048 = vst.msk [vmem:[%s7543_s11 + $0xe0] sm:$0xff] %vm4019_vm6, %v4008_v3 }
 0x482   :  { %v4010_v17 = vpop.f32.mrf.mxu0 }
 0x483   :  { %v4011_v56 = vadd.f32 %v7160_v49, %v4010_v17  ;;  %v4013_v45 = vpop.f32.mrf.mxu3 }
 0x484   :  { %v4014_v33 = vadd.f32 %v7160_v49, %v4013_v45 }
 0x485   :  { %4049 = vst.msk [vmem:[%s7543_s11 + $0xe8] sm:$0xff] %vm4019_vm6, %v4011_v56 }
 0x486   :  { %4050 = vst.msk [vmem:[%s7543_s11 + $0xf0] sm:$0xff] %vm4019_vm6, %v4014_v33 }
 0x493   :  { %v4016_v11 = vpop.f32.mrf.mxu3 }
 0x494   :  { %v4017_v54 = vadd.f32 %v7160_v49, %v4016_v11 }
 0x496   :  { %4051 = vst.msk [vmem:[%s7543_s11 + $0xf8] sm:$0xff] %vm4019_vm6, %v4017_v54 }

</bundles_post_ra>
